<compile_context>
chip_gen: v6e
topology: v6e:2x2x1
jax: 0.10.0
libtpu: 0.0.40
codegen_flags: <defaults>
</compile_context>

<pallas_src>
import math

import jax
import jax.numpy as jnp
from jax.experimental import pallas as pl
from jax.experimental.pallas import tpu as pltpu

EPS = 1e-4
SILU_GAIN = 1.0 / 0.596          # mp_silu(x) = silu(x) / 0.596
RES_BALANCE = 0.3                # Network.res_balance

# fp32 is bit-faithful to the PyTorch non-CUDA path; jnp.bfloat16 trades
# ~1e-3 numerics for ~4x MXU throughput on v6e/v7x.
MXU_DTYPE = jnp.float32


def _round_up(x, m):
    return (x + m - 1) // m * m


def _pad2(a, rows, cols):
    pr, pc = rows - a.shape[0], cols - a.shape[1]
    return a if (pr == 0 and pc == 0) else jnp.pad(a, ((0, pr), (0, pc)))


# ---------------------------------------------------------------------------
# Hoisted weight preparation: fold normalize(w) * gain / sqrt(cin) into the
# (transposed, padded) weight columns ONCE, outside the jitted forward.
# ---------------------------------------------------------------------------
def _fold_weight_t(w, gain=1.0):
    """Return w_t (cin, cout) with the MPConv scale folded into each column."""
    w = w.astype(jnp.float32)
    cout, cin = w.shape
    norm = jnp.sqrt(jnp.sum(w * w, axis=1))                 # (cout,)
    scale = gain / (EPS * math.sqrt(cin) + norm)            # == normalize * gain/sqrt(cin)
    return jnp.transpose(w) * scale[None, :]


def prepare_params(params):
    """Fold + transpose + pad all MPConv weights (done once, not per call)."""
    hidden = params["emb_noise_w"].shape[0]
    layers = params["layers"]
    assert len(layers) >= 1

    hp = _round_up(hidden, 128)                      # lane-dense hidden
    cinp = _round_up(params["x_embed_w"].shape[1], 128)
    coutp = _round_up(params["final"]["post_w"].shape[0], 128)

    w_xe = _pad2(_fold_weight_t(params["x_embed_w"]), cinp, hp)
    w_pre = jnp.stack(
        [_pad2(_fold_weight_t(l["pre_w"]), hp, hp) for l in layers]
        + [_pad2(_fold_weight_t(params["final"]["pre_w"]), hp, hp)])
    w_post = jnp.stack([_pad2(_fold_weight_t(l["post_w"]), hp, hp) for l in layers])
    w_fin = _pad2(_fold_weight_t(params["final"]["post_w"], params["final_out_gain"]),
                  hp, coutp)

    # temb / per-layer `c` weights stay unpadded: they run as tiny (batch-1 in
    # the common scalar-sigma case) XLA dots outside the fused kernel.
    w_noise = _fold_weight_t(params["emb_noise_w"])                          # (h, h)
    w_emb = jnp.stack([_fold_weight_t(l["emb_w"], l["gain"]) for l in layers]
                      + [_fold_weight_t(params["final"]["emb_w"],
                                        params["final_emb_gain"])])          # (d+1,h,h)

    return {
        "basis": params["basis"], "freqs": params["freqs"], "phases": params["phases"],
        "w_xe": w_xe, "w_pre": w_pre, "w_post": w_post, "w_fin": w_fin,
        "w_noise": w_noise, "w_emb": w_emb,
    }


# ---------------------------------------------------------------------------
# Fused whole-network Pallas kernel (one row tile of points per grid step).
# ---------------------------------------------------------------------------
def _make_network_kernel(depth, hidden_true, mxu_dtype):
    inv_res = 1.0 / math.sqrt((1.0 - RES_BALANCE) ** 2 + RES_BALANCE ** 2)
    alpha = 1.0 / math.sqrt(hidden_true)          # pixel-norm uses TRUE hidden

    def mdot(a, b):
        return jnp.dot(a.astype(mxu_dtype), b.astype(mxu_dtype),
                       preferred_element_type=jnp.float32)

    def mp_silu(v):                               # exp rides the EUP slot
        return v * (1.0 / (1.0 + jnp.exp(-v))) * SILU_GAIN

    def kernel(xf_ref, wxe_ref, wpre_ref, wpost_ref, wfin_ref, c_ref, o_ref):
        h = mdot(xf_ref[...], wxe_ref[...])                      # x_embedder
        for l in range(depth + 1):
            n = jnp.sqrt(jnp.sum(h * h, axis=-1, keepdims=True))  # XLU reduce
            hn = h / (EPS + n * alpha)                             # pixel norm
            y = mdot(mp_silu(hn), wpre_ref[l])
            y = mp_silu(y * c_ref[l])                              # (1|tm, hp) bcast
            if l < depth:
                y = mdot(y, wpost_ref[l])
                h = (hn * (1.0 - RES_BALANCE) + y * RES_BALANCE) * inv_res
            else:
                o_ref[...] = mdot(y, wfin_ref[...]).astype(o_ref.dtype)

    return kernel


# ---------------------------------------------------------------------------
# Plain-JAX glue (tiny; no HBM round-trips of (N, hidden) activations).
# ---------------------------------------------------------------------------
def _mp_silu(x):
    return x * (1.0 / (1.0 + jnp.exp(-x))) * SILU_GAIN


def _mp_fourier(t, freqs, phases):
    y = t.astype(jnp.float32)[:, None] * freqs.astype(jnp.float32)[None, :]
    return jnp.cos(y + phases.astype(jnp.float32)[None, :]) * math.sqrt(2.0)


def _point_basis(hidden_dim=48):
    m = hidden_dim // 6
    e = (2.0 ** jnp.arange(m, dtype=jnp.float32)) * math.pi
    z = jnp.zeros((m,), jnp.float32)
    return jnp.stack([jnp.concatenate([e, z, z]),
                      jnp.concatenate([z, e, z]),
                      jnp.concatenate([z, z, e])], axis=0)   # (3, hidden_dim//2)


def _point_embed_features(p, basis):
    if p.shape[1] != 3:
        pin, others = p[:, :3], p[:, 3:]
    else:
        pin, others = p, None
    proj = pin.astype(jnp.float32) @ basis                    # (N, 3) @ (3, 24)
    feats = [jnp.sin(proj), jnp.cos(proj), pin]
    if others is not None:
        feats.append(others)
    return jnp.concatenate(feats, axis=1)


# ---------------------------------------------------------------------------
# Network.forward / EDMPrecond.forward (single fused pallas_call).
# ---------------------------------------------------------------------------
def network_forward(prep, x, t):
    hidden = prep["w_noise"].shape[0]
    hp = prep["w_pre"].shape[-1]
    depth = prep["w_post"].shape[0]
    cinp = prep["w_xe"].shape[0]
    coutp = prep["w_fin"].shape[-1]
    channels = x.shape[-1]
    n = x.shape[0]

    # ----- row tiling: >=2 "parallel" steps so v7x's two TCs both work ------
    np_ = _round_up(max(n, 16), 16)
    if np_ <= 256:
        tm = np_ // 2
    else:
        np_ = _round_up(n, 128)
        tm = 128

    # ----- point-embedding features (sin/cos) + padding ---------------------
    feats = _point_embed_features(x, prep["basis"])
    feats_p = _pad2(feats.astype(jnp.float32), np_, cinp)

    # ----- temb / per-layer `c` (batch-1 when sigma is scalar) --------------
    # TODO(synk): per-point sigma keeps the emb GEMMs in XLA; they could also
    # be fused, but scalar sigma is the common sampling case.
    four = _mp_fourier(t, prep["freqs"], prep["phases"])          # (B, hidden)
    temb = _mp_silu(four @ prep["w_noise"])                        # (B, hidden)
    c = jnp.einsum("bh,lhk->lbk", temb, prep["w_emb"]) + 1.0       # (d+1, B, hidden)
    broadcast_c = (t.shape[0] == 1)
    if broadcast_c:
        c_p = jnp.pad(c, ((0, 0), (0, 0), (0, hp - hidden)))
        c_spec = pl.BlockSpec((depth + 1, 1, hp), lambda i: (0, 0, 0))
        c_block_rows = 1
    else:
        c_p = jnp.pad(c, ((0, 0), (0, np_ - n), (0, hp - hidden)))
        c_spec = pl.BlockSpec((depth + 1, tm, hp), lambda i: (0, i, 0))
        c_block_rows = tm

    # ----- VMEM budget from the actual resident footprint -------------------
    w_bytes = 4 * (prep["w_xe"].size + prep["w_pre"].size
                   + prep["w_post"].size + prep["w_fin"].size)
    io_bytes = 4 * (tm * cinp + tm * coutp + (depth + 1) * c_block_rows * hp)
    vmem_limit = min(2 * (w_bytes + io_bytes) + 16 * 1024 * 1024, 128 * 1024 * 1024)

    out = pl.pallas_call(
        _make_network_kernel(depth, hidden, MXU_DTYPE),
        out_shape=jax.ShapeDtypeStruct((np_, coutp), jnp.float32),
        grid_spec=pltpu.PrefetchScalarGridSpec(
            num_scalar_prefetch=0,
            grid=(np_ // tm,),
            in_specs=[
                pl.BlockSpec((tm, cinp), lambda i: (i, 0)),          # point feats
                pl.BlockSpec((cinp, hp), lambda i: (0, 0)),          # x_embed (resident)
                pl.BlockSpec((depth + 1, hp, hp), lambda i: (0, 0, 0)),  # pre stack
                pl.BlockSpec((depth, hp, hp), lambda i: (0, 0, 0)),      # post stack
                pl.BlockSpec((hp, coutp), lambda i: (0, 0)),         # final post
                c_spec,                                              # per-layer c
            ],
            out_specs=pl.BlockSpec((tm, coutp), lambda i: (i, 0)),
        ),
        compiler_params=pltpu.CompilerParams(
            dimension_semantics=("parallel",),
            vmem_limit_bytes=int(vmem_limit),
        ),
    )(feats_p, prep["w_xe"], prep["w_pre"], prep["w_post"], prep["w_fin"], c_p)

    return out[:n, :channels]


def edm_precond_forward(prep, x, sigma, sigma_data=1.0):
    # On non-CUDA devices the PyTorch module forces float32 (even with use_fp16).
    x = x.astype(jnp.float32)
    sigma = sigma.astype(jnp.float32).reshape(-1, 1)
    c_skip = sigma_data ** 2 / (sigma ** 2 + sigma_data ** 2)
    c_out = sigma * sigma_data / jnp.sqrt(sigma ** 2 + sigma_data ** 2)
    c_in = 1.0 / jnp.sqrt(sigma_data ** 2 + sigma ** 2)
    c_noise = jnp.log(sigma) / 4.0
    f_x = network_forward(prep, c_in * x, c_noise.reshape(-1))
    return c_skip * x + c_out * f_x


# ---------------------------------------------------------------------------
# Pure-JAX reference (mirrors the PyTorch forward exactly; uses RAW params).
# ---------------------------------------------------------------------------
def _ref_normalize(x, eps=EPS):
    dims = tuple(range(1, x.ndim))
    norm = jnp.sqrt(jnp.sum(jnp.square(x.astype(jnp.float32)),
                            axis=dims, keepdims=True))
    alpha = math.sqrt(norm.size / x.size)
    return x / (eps + alpha * norm)


def _ref_mpconv(x, w, gain=1.0):
    w = _ref_normalize(w.astype(jnp.float32))
    w = w * (gain / math.sqrt(w.shape[1]))
    return x @ w.T


def _mp_sum(a, b, t):
    return (a * (1.0 - t) + b * t) / math.sqrt((1.0 - t) ** 2 + t ** 2)


def ref_network_forward(params, x, t):
    h = _ref_mpconv(_point_embed_features(x, params["basis"]), params["x_embed_w"])
    if t.shape[0] == 1:
        t = jnp.broadcast_to(t, (x.shape[0],))
    temb = _mp_silu(_ref_mpconv(_mp_fourier(t, params["freqs"], params["phases"]),
                                params["emb_noise_w"]))
    for layer in params["layers"]:
        c = _ref_mpconv(temb, layer["emb_w"], layer["gain"]) + 1.0
        h = _ref_normalize(h)
        y = _ref_mpconv(_mp_silu(h), layer["pre_w"])
        y = _mp_silu(y * c)
        y = _ref_mpconv(y, layer["post_w"])
        h = _mp_sum(h, y, RES_BALANCE)
    fin = params["final"]
    c = _ref_mpconv(temb, fin["emb_w"], params["final_emb_gain"]) + 1.0
    y = _ref_mpconv(_mp_silu(_ref_normalize(h)), fin["pre_w"])
    y = _mp_silu(y * c)
    return _ref_mpconv(y, fin["post_w"], params["final_out_gain"])


def ref_edm_precond_forward(params, x, sigma, sigma_data=1.0):
    x = x.astype(jnp.float32)
    sigma = sigma.astype(jnp.float32).reshape(-1, 1)
    c_skip = sigma_data ** 2 / (sigma ** 2 + sigma_data ** 2)
    c_out = sigma * sigma_data / jnp.sqrt(sigma ** 2 + sigma_data ** 2)
    c_in = 1.0 / jnp.sqrt(sigma_data ** 2 + sigma ** 2)
    c_noise = jnp.log(sigma) / 4.0
    f_x = ref_network_forward(params, c_in * x, c_noise.reshape(-1))
    return c_skip * x + c_out * f_x


# ---------------------------------------------------------------------------
# Parameter init (matches the PyTorch module's parameter/buffer shapes).
# ---------------------------------------------------------------------------
def init_params(key, channels=3, hidden=256, depth=3, point_hidden=48):
    assert point_hidden % 6 == 0
    keys = iter(jax.random.split(key, 4 * depth + 16))
    nk = lambda: next(keys)
    rnd = lambda shape: jax.random.normal(nk(), shape, jnp.float32)
    return {
        "basis": _point_basis(point_hidden),
        "freqs": 2.0 * math.pi * rnd((hidden,)),
        "phases": 2.0 * math.pi * jax.random.uniform(nk(), (hidden,), jnp.float32),
        "emb_noise_w": rnd((hidden, hidden)),
        "x_embed_w": rnd((hidden, point_hidden + channels)),
        "layers": [
            {
                "pre_w": rnd((hidden, hidden)),
                "post_w": rnd((hidden, hidden)),
                "emb_w": rnd((hidden, hidden)),
                # PyTorch initialises the block gains to 0 (degenerate output:
                # c == 1, final out == 0); random scalars exercise the full
                # compute path.  Forward math is identical.
                "gain": 0.5 * rnd(()),
            }
            for _ in range(depth)
        ],
        "final": {
            "pre_w": rnd((hidden, hidden)),
            "post_w": rnd((channels, hidden)),
            "emb_w": rnd((hidden, hidden)),
        },
        "final_emb_gain": 0.5 * rnd(()),
        "final_out_gain": 0.5 * rnd(()),
    }


if __name__ == "__main__":
    channels, hidden, depth, n_points = 3, 256, 3, 64
    root = jax.random.PRNGKey(0)
    pkey, xkey, skey = jax.random.split(root, 3)
    params = init_params(pkey, channels=channels, hidden=hidden, depth=depth)
    prep = prepare_params(params)            # weight prep hoisted out of forward

    x = jax.random.normal(xkey, (n_points, channels), jnp.float32)   # point cloud

    fwd = jax.jit(edm_precond_forward)

    # --- common case: single scalar sigma (broadcast `c` path) -------------
    sigma = jnp.array([2.0], jnp.float32)
    out = jax.block_until_ready(fwd(prep, x, sigma))
    ref = jax.block_until_ready(ref_edm_precond_forward(params, x, sigma))
    assert out.shape == ref.shape == (n_points, channels)
    assert bool(jnp.all(jnp.isfinite(out)))
    err = float(jnp.max(jnp.abs(out - ref)))
    assert jnp.allclose(out, ref, atol=3e-3, rtol=3e-3), err

    # --- per-point sigma (row-tiled `c` path) -------------------------------
    sigma_pp = jnp.exp(0.5 * jax.random.normal(skey, (n_points,), jnp.float32))
    out2 = jax.block_until_ready(fwd(prep, x, sigma_pp))
    ref2 = jax.block_until_ready(ref_edm_precond_forward(params, x, sigma_pp))
    err2 = float(jnp.max(jnp.abs(out2 - ref2)))
    assert bool(jnp.all(jnp.isfinite(out2)))
    assert jnp.allclose(out2, ref2, atol=3e-3, rtol=3e-3), err2

    print("KERNEL_OK")
</pallas_src>

<mosaic_0001>
module attributes {stable_mosaic.version = 11 : i64} {
  func.func @kernel(%arg0: i32, %arg1: memref<32x128xf32, #tpu.memory_space<vmem>>, %arg2: memref<128x256xf32, #tpu.memory_space<vmem>>, %arg3: memref<4x256x256xf32, #tpu.memory_space<vmem>>, %arg4: memref<3x256x256xf32, #tpu.memory_space<vmem>>, %arg5: memref<256x128xf32, #tpu.memory_space<vmem>>, %arg6: memref<4x1x256xf32, #tpu.memory_space<vmem>>, %arg7: memref<32x128xf32, #tpu.memory_space<vmem>>) attributes {dimension_semantics = [#tpu.dimension_semantics<parallel>], iteration_bounds = array<i64: 2>, scalar_prefetch = 0 : i64, scratch_operands = 0 : i64, tpu.core_type = #tpu.core_type<tc>, window_params = [{transform_indices = @transform_0, window_bounds = array<i64: 32, 128>}, {pipeline_mode = #tpu.pipeline_mode<synchronous>, transform_indices = @transform_1, window_bounds = array<i64: 128, 256>}, {pipeline_mode = #tpu.pipeline_mode<synchronous>, transform_indices = @transform_2, window_bounds = array<i64: 4, 256, 256>}, {pipeline_mode = #tpu.pipeline_mode<synchronous>, transform_indices = @transform_3, window_bounds = array<i64: 3, 256, 256>}, {pipeline_mode = #tpu.pipeline_mode<synchronous>, transform_indices = @transform_4, window_bounds = array<i64: 256, 128>}, {pipeline_mode = #tpu.pipeline_mode<synchronous>, transform_indices = @transform_5, window_bounds = array<i64: 4, 1, 256>}, {transform_indices = @transform_6, window_bounds = array<i64: 32, 128>}]} {
    %c0 = arith.constant 0 : index
    %c0_0 = arith.constant 0 : index
    %0 = vector.load %arg1[%c0, %c0_0] : memref<32x128xf32, #tpu.memory_space<vmem>>, vector<32x128xf32>
    %c0_1 = arith.constant 0 : index
    %c0_2 = arith.constant 0 : index
    %1 = vector.load %arg2[%c0_1, %c0_2] : memref<128x256xf32, #tpu.memory_space<vmem>>, vector<128x256xf32>
    %cst = arith.constant dense<0.000000e+00> : vector<32x256xf32>
    %2 = tpu.matmul %0, %1, %cst {dimension_numbers = #tpu.dot_dimension_numbers<[1], [0], [0], [1], [0, 0, 1, 1], [], []>} : vector<32x128xf32>, vector<128x256xf32>, vector<32x256xf32> -> vector<32x256xf32>
    %3 = arith.mulf %2, %2 : vector<32x256xf32>
    %cst_3 = arith.constant dense<0.000000e+00> : vector<32xf32>
    %4 = vector.multi_reduction <add>, %3, %cst_3 [1] : vector<32x256xf32> to vector<32xf32>
    %5 = vector.shape_cast %4 : vector<32xf32> to vector<32x1xf32>
    %6 = math.sqrt %5 : vector<32x1xf32>
    %cst_4 = arith.constant 6.250000e-02 : f32
    %7 = vector.broadcast %cst_4 : f32 to vector<32x1xf32>
    %8 = arith.mulf %6, %7 : vector<32x1xf32>
    %cst_5 = arith.constant 9.99999974E-5 : f32
    %9 = vector.broadcast %cst_5 : f32 to vector<32x1xf32>
    %10 = arith.addf %9, %8 : vector<32x1xf32>
    %11 = vector.broadcast %10 : vector<32x1xf32> to vector<32x256xf32>
    %12 = arith.divf %2, %11 : vector<32x256xf32>
    %cst_6 = arith.constant 0.000000e+00 : f32
    %13 = vector.broadcast %cst_6 : f32 to vector<32x256xf32>
    %14 = arith.subf %13, %12 : vector<32x256xf32>
    %15 = math.exp %14 : vector<32x256xf32>
    %cst_7 = arith.constant 1.000000e+00 : f32
    %16 = vector.broadcast %cst_7 : f32 to vector<32x256xf32>
    %17 = arith.addf %16, %15 : vector<32x256xf32>
    %cst_8 = arith.constant 1.000000e+00 : f32
    %18 = vector.broadcast %cst_8 : f32 to vector<32x256xf32>
    %19 = arith.divf %18, %17 : vector<32x256xf32>
    %20 = arith.mulf %12, %19 : vector<32x256xf32>
    %cst_9 = arith.constant 1.67785239 : f32
    %21 = vector.broadcast %cst_9 : f32 to vector<32x256xf32>
    %22 = arith.mulf %20, %21 : vector<32x256xf32>
    %c0_10 = arith.constant 0 : index
    %c0_11 = arith.constant 0 : index
    %c0_12 = arith.constant 0 : index
    %23 = vector.load %arg3[%c0_10, %c0_11, %c0_12] : memref<4x256x256xf32, #tpu.memory_space<vmem>>, vector<1x256x256xf32>
    %24 = vector.shape_cast %23 : vector<1x256x256xf32> to vector<256x256xf32>
    %cst_13 = arith.constant dense<0.000000e+00> : vector<32x256xf32>
    %25 = tpu.matmul %22, %24, %cst_13 {dimension_numbers = #tpu.dot_dimension_numbers<[1], [0], [0], [1], [0, 0, 1, 1], [], []>} : vector<32x256xf32>, vector<256x256xf32>, vector<32x256xf32> -> vector<32x256xf32>
    %c0_14 = arith.constant 0 : index
    %c0_15 = arith.constant 0 : index
    %c0_16 = arith.constant 0 : index
    %26 = vector.load %arg6[%c0_14, %c0_15, %c0_16] : memref<4x1x256xf32, #tpu.memory_space<vmem>>, vector<1x1x256xf32>
    %27 = vector.shape_cast %26 : vector<1x1x256xf32> to vector<1x256xf32>
    %28 = vector.broadcast %27 : vector<1x256xf32> to vector<32x256xf32>
    %29 = arith.mulf %25, %28 : vector<32x256xf32>
    %cst_17 = arith.constant 0.000000e+00 : f32
    %30 = vector.broadcast %cst_17 : f32 to vector<32x256xf32>
    %31 = arith.subf %30, %29 : vector<32x256xf32>
    %32 = math.exp %31 : vector<32x256xf32>
    %cst_18 = arith.constant 1.000000e+00 : f32
    %33 = vector.broadcast %cst_18 : f32 to vector<32x256xf32>
    %34 = arith.addf %33, %32 : vector<32x256xf32>
    %cst_19 = arith.constant 1.000000e+00 : f32
    %35 = vector.broadcast %cst_19 : f32 to vector<32x256xf32>
    %36 = arith.divf %35, %34 : vector<32x256xf32>
    %37 = arith.mulf %29, %36 : vector<32x256xf32>
    %cst_20 = arith.constant 1.67785239 : f32
    %38 = vector.broadcast %cst_20 : f32 to vector<32x256xf32>
    %39 = arith.mulf %37, %38 : vector<32x256xf32>
    %c0_21 = arith.constant 0 : index
    %c0_22 = arith.constant 0 : index
    %c0_23 = arith.constant 0 : index
    %40 = vector.load %arg4[%c0_21, %c0_22, %c0_23] : memref<3x256x256xf32, #tpu.memory_space<vmem>>, vector<1x256x256xf32>
    %41 = vector.shape_cast %40 : vector<1x256x256xf32> to vector<256x256xf32>
    %cst_24 = arith.constant dense<0.000000e+00> : vector<32x256xf32>
    %42 = tpu.matmul %39, %41, %cst_24 {dimension_numbers = #tpu.dot_dimension_numbers<[1], [0], [0], [1], [0, 0, 1, 1], [], []>} : vector<32x256xf32>, vector<256x256xf32>, vector<32x256xf32> -> vector<32x256xf32>
    %cst_25 = arith.constant 0.699999988 : f32
    %43 = vector.broadcast %cst_25 : f32 to vector<32x256xf32>
    %44 = arith.mulf %12, %43 : vector<32x256xf32>
    %cst_26 = arith.constant 3.000000e-01 : f32
    %45 = vector.broadcast %cst_26 : f32 to vector<32x256xf32>
    %46 = arith.mulf %42, %45 : vector<32x256xf32>
    %47 = arith.addf %44, %46 : vector<32x256xf32>
    %cst_27 = arith.constant 1.31306434 : f32
    %48 = vector.broadcast %cst_27 : f32 to vector<32x256xf32>
    %49 = arith.mulf %47, %48 : vector<32x256xf32>
    %50 = arith.mulf %49, %49 : vector<32x256xf32>
    %cst_28 = arith.constant dense<0.000000e+00> : vector<32xf32>
    %51 = vector.multi_reduction <add>, %50, %cst_28 [1] : vector<32x256xf32> to vector<32xf32>
    %52 = vector.shape_cast %51 : vector<32xf32> to vector<32x1xf32>
    %53 = math.sqrt %52 : vector<32x1xf32>
    %cst_29 = arith.constant 6.250000e-02 : f32
    %54 = vector.broadcast %cst_29 : f32 to vector<32x1xf32>
    %55 = arith.mulf %53, %54 : vector<32x1xf32>
    %cst_30 = arith.constant 9.99999974E-5 : f32
    %56 = vector.broadcast %cst_30 : f32 to vector<32x1xf32>
    %57 = arith.addf %56, %55 : vector<32x1xf32>
    %58 = vector.broadcast %57 : vector<32x1xf32> to vector<32x256xf32>
    %59 = arith.divf %49, %58 : vector<32x256xf32>
    %cst_31 = arith.constant 0.000000e+00 : f32
    %60 = vector.broadcast %cst_31 : f32 to vector<32x256xf32>
    %61 = arith.subf %60, %59 : vector<32x256xf32>
    %62 = math.exp %61 : vector<32x256xf32>
    %cst_32 = arith.constant 1.000000e+00 : f32
    %63 = vector.broadcast %cst_32 : f32 to vector<32x256xf32>
    %64 = arith.addf %63, %62 : vector<32x256xf32>
    %cst_33 = arith.constant 1.000000e+00 : f32
    %65 = vector.broadcast %cst_33 : f32 to vector<32x256xf32>
    %66 = arith.divf %65, %64 : vector<32x256xf32>
    %67 = arith.mulf %59, %66 : vector<32x256xf32>
    %cst_34 = arith.constant 1.67785239 : f32
    %68 = vector.broadcast %cst_34 : f32 to vector<32x256xf32>
    %69 = arith.mulf %67, %68 : vector<32x256xf32>
    %c1 = arith.constant 1 : index
    %c0_35 = arith.constant 0 : index
    %c0_36 = arith.constant 0 : index
    %70 = vector.load %arg3[%c1, %c0_35, %c0_36] : memref<4x256x256xf32, #tpu.memory_space<vmem>>, vector<1x256x256xf32>
    %71 = vector.shape_cast %70 : vector<1x256x256xf32> to vector<256x256xf32>
    %cst_37 = arith.constant dense<0.000000e+00> : vector<32x256xf32>
    %72 = tpu.matmul %69, %71, %cst_37 {dimension_numbers = #tpu.dot_dimension_numbers<[1], [0], [0], [1], [0, 0, 1, 1], [], []>} : vector<32x256xf32>, vector<256x256xf32>, vector<32x256xf32> -> vector<32x256xf32>
    %c1_38 = arith.constant 1 : index
    %c0_39 = arith.constant 0 : index
    %c0_40 = arith.constant 0 : index
    %73 = vector.load %arg6[%c1_38, %c0_39, %c0_40] : memref<4x1x256xf32, #tpu.memory_space<vmem>>, vector<1x1x256xf32>
    %74 = vector.shape_cast %73 : vector<1x1x256xf32> to vector<1x256xf32>
    %75 = vector.broadcast %74 : vector<1x256xf32> to vector<32x256xf32>
    %76 = arith.mulf %72, %75 : vector<32x256xf32>
    %cst_41 = arith.constant 0.000000e+00 : f32
    %77 = vector.broadcast %cst_41 : f32 to vector<32x256xf32>
    %78 = arith.subf %77, %76 : vector<32x256xf32>
    %79 = math.exp %78 : vector<32x256xf32>
    %cst_42 = arith.constant 1.000000e+00 : f32
    %80 = vector.broadcast %cst_42 : f32 to vector<32x256xf32>
    %81 = arith.addf %80, %79 : vector<32x256xf32>
    %cst_43 = arith.constant 1.000000e+00 : f32
    %82 = vector.broadcast %cst_43 : f32 to vector<32x256xf32>
    %83 = arith.divf %82, %81 : vector<32x256xf32>
    %84 = arith.mulf %76, %83 : vector<32x256xf32>
    %cst_44 = arith.constant 1.67785239 : f32
    %85 = vector.broadcast %cst_44 : f32 to vector<32x256xf32>
    %86 = arith.mulf %84, %85 : vector<32x256xf32>
    %c1_45 = arith.constant 1 : index
    %c0_46 = arith.constant 0 : index
    %c0_47 = arith.constant 0 : index
    %87 = vector.load %arg4[%c1_45, %c0_46, %c0_47] : memref<3x256x256xf32, #tpu.memory_space<vmem>>, vector<1x256x256xf32>
    %88 = vector.shape_cast %87 : vector<1x256x256xf32> to vector<256x256xf32>
    %cst_48 = arith.constant dense<0.000000e+00> : vector<32x256xf32>
    %89 = tpu.matmul %86, %88, %cst_48 {dimension_numbers = #tpu.dot_dimension_numbers<[1], [0], [0], [1], [0, 0, 1, 1], [], []>} : vector<32x256xf32>, vector<256x256xf32>, vector<32x256xf32> -> vector<32x256xf32>
    %cst_49 = arith.constant 0.699999988 : f32
    %90 = vector.broadcast %cst_49 : f32 to vector<32x256xf32>
    %91 = arith.mulf %59, %90 : vector<32x256xf32>
    %cst_50 = arith.constant 3.000000e-01 : f32
    %92 = vector.broadcast %cst_50 : f32 to vector<32x256xf32>
    %93 = arith.mulf %89, %92 : vector<32x256xf32>
    %94 = arith.addf %91, %93 : vector<32x256xf32>
    %cst_51 = arith.constant 1.31306434 : f32
    %95 = vector.broadcast %cst_51 : f32 to vector<32x256xf32>
    %96 = arith.mulf %94, %95 : vector<32x256xf32>
    %97 = arith.mulf %96, %96 : vector<32x256xf32>
    %cst_52 = arith.constant dense<0.000000e+00> : vector<32xf32>
    %98 = vector.multi_reduction <add>, %97, %cst_52 [1] : vector<32x256xf32> to vector<32xf32>
    %99 = vector.shape_cast %98 : vector<32xf32> to vector<32x1xf32>
    %100 = math.sqrt %99 : vector<32x1xf32>
    %cst_53 = arith.constant 6.250000e-02 : f32
    %101 = vector.broadcast %cst_53 : f32 to vector<32x1xf32>
    %102 = arith.mulf %100, %101 : vector<32x1xf32>
    %cst_54 = arith.constant 9.99999974E-5 : f32
    %103 = vector.broadcast %cst_54 : f32 to vector<32x1xf32>
    %104 = arith.addf %103, %102 : vector<32x1xf32>
    %105 = vector.broadcast %104 : vector<32x1xf32> to vector<32x256xf32>
    %106 = arith.divf %96, %105 : vector<32x256xf32>
    %cst_55 = arith.constant 0.000000e+00 : f32
    %107 = vector.broadcast %cst_55 : f32 to vector<32x256xf32>
    %108 = arith.subf %107, %106 : vector<32x256xf32>
    %109 = math.exp %108 : vector<32x256xf32>
    %cst_56 = arith.constant 1.000000e+00 : f32
    %110 = vector.broadcast %cst_56 : f32 to vector<32x256xf32>
    %111 = arith.addf %110, %109 : vector<32x256xf32>
    %cst_57 = arith.constant 1.000000e+00 : f32
    %112 = vector.broadcast %cst_57 : f32 to vector<32x256xf32>
    %113 = arith.divf %112, %111 : vector<32x256xf32>
    %114 = arith.mulf %106, %113 : vector<32x256xf32>
    %cst_58 = arith.constant 1.67785239 : f32
    %115 = vector.broadcast %cst_58 : f32 to vector<32x256xf32>
    %116 = arith.mulf %114, %115 : vector<32x256xf32>
    %c2 = arith.constant 2 : index
    %c0_59 = arith.constant 0 : index
    %c0_60 = arith.constant 0 : index
    %117 = vector.load %arg3[%c2, %c0_59, %c0_60] : memref<4x256x256xf32, #tpu.memory_space<vmem>>, vector<1x256x256xf32>
    %118 = vector.shape_cast %117 : vector<1x256x256xf32> to vector<256x256xf32>
    %cst_61 = arith.constant dense<0.000000e+00> : vector<32x256xf32>
    %119 = tpu.matmul %116, %118, %cst_61 {dimension_numbers = #tpu.dot_dimension_numbers<[1], [0], [0], [1], [0, 0, 1, 1], [], []>} : vector<32x256xf32>, vector<256x256xf32>, vector<32x256xf32> -> vector<32x256xf32>
    %c2_62 = arith.constant 2 : index
    %c0_63 = arith.constant 0 : index
    %c0_64 = arith.constant 0 : index
    %120 = vector.load %arg6[%c2_62, %c0_63, %c0_64] : memref<4x1x256xf32, #tpu.memory_space<vmem>>, vector<1x1x256xf32>
    %121 = vector.shape_cast %120 : vector<1x1x256xf32> to vector<1x256xf32>
    %122 = vector.broadcast %121 : vector<1x256xf32> to vector<32x256xf32>
    %123 = arith.mulf %119, %122 : vector<32x256xf32>
    %cst_65 = arith.constant 0.000000e+00 : f32
    %124 = vector.broadcast %cst_65 : f32 to vector<32x256xf32>
    %125 = arith.subf %124, %123 : vector<32x256xf32>
    %126 = math.exp %125 : vector<32x256xf32>
    %cst_66 = arith.constant 1.000000e+00 : f32
    %127 = vector.broadcast %cst_66 : f32 to vector<32x256xf32>
    %128 = arith.addf %127, %126 : vector<32x256xf32>
    %cst_67 = arith.constant 1.000000e+00 : f32
    %129 = vector.broadcast %cst_67 : f32 to vector<32x256xf32>
    %130 = arith.divf %129, %128 : vector<32x256xf32>
    %131 = arith.mulf %123, %130 : vector<32x256xf32>
    %cst_68 = arith.constant 1.67785239 : f32
    %132 = vector.broadcast %cst_68 : f32 to vector<32x256xf32>
    %133 = arith.mulf %131, %132 : vector<32x256xf32>
    %c2_69 = arith.constant 2 : index
    %c0_70 = arith.constant 0 : index
    %c0_71 = arith.constant 0 : index
    %134 = vector.load %arg4[%c2_69, %c0_70, %c0_71] : memref<3x256x256xf32, #tpu.memory_space<vmem>>, vector<1x256x256xf32>
    %135 = vector.shape_cast %134 : vector<1x256x256xf32> to vector<256x256xf32>
    %cst_72 = arith.constant dense<0.000000e+00> : vector<32x256xf32>
    %136 = tpu.matmul %133, %135, %cst_72 {dimension_numbers = #tpu.dot_dimension_numbers<[1], [0], [0], [1], [0, 0, 1, 1], [], []>} : vector<32x256xf32>, vector<256x256xf32>, vector<32x256xf32> -> vector<32x256xf32>
    %cst_73 = arith.constant 0.699999988 : f32
    %137 = vector.broadcast %cst_73 : f32 to vector<32x256xf32>
    %138 = arith.mulf %106, %137 : vector<32x256xf32>
    %cst_74 = arith.constant 3.000000e-01 : f32
    %139 = vector.broadcast %cst_74 : f32 to vector<32x256xf32>
    %140 = arith.mulf %136, %139 : vector<32x256xf32>
    %141 = arith.addf %138, %140 : vector<32x256xf32>
    %cst_75 = arith.constant 1.31306434 : f32
    %142 = vector.broadcast %cst_75 : f32 to vector<32x256xf32>
    %143 = arith.mulf %141, %142 : vector<32x256xf32>
    %144 = arith.mulf %143, %143 : vector<32x256xf32>
    %cst_76 = arith.constant dense<0.000000e+00> : vector<32xf32>
    %145 = vector.multi_reduction <add>, %144, %cst_76 [1] : vector<32x256xf32> to vector<32xf32>
    %146 = vector.shape_cast %145 : vector<32xf32> to vector<32x1xf32>
    %147 = math.sqrt %146 : vector<32x1xf32>
    %cst_77 = arith.constant 6.250000e-02 : f32
    %148 = vector.broadcast %cst_77 : f32 to vector<32x1xf32>
    %149 = arith.mulf %147, %148 : vector<32x1xf32>
    %cst_78 = arith.constant 9.99999974E-5 : f32
    %150 = vector.broadcast %cst_78 : f32 to vector<32x1xf32>
    %151 = arith.addf %150, %149 : vector<32x1xf32>
    %152 = vector.broadcast %151 : vector<32x1xf32> to vector<32x256xf32>
    %153 = arith.divf %143, %152 : vector<32x256xf32>
    %cst_79 = arith.constant 0.000000e+00 : f32
    %154 = vector.broadcast %cst_79 : f32 to vector<32x256xf32>
    %155 = arith.subf %154, %153 : vector<32x256xf32>
    %156 = math.exp %155 : vector<32x256xf32>
    %cst_80 = arith.constant 1.000000e+00 : f32
    %157 = vector.broadcast %cst_80 : f32 to vector<32x256xf32>
    %158 = arith.addf %157, %156 : vector<32x256xf32>
    %cst_81 = arith.constant 1.000000e+00 : f32
    %159 = vector.broadcast %cst_81 : f32 to vector<32x256xf32>
    %160 = arith.divf %159, %158 : vector<32x256xf32>
    %161 = arith.mulf %153, %160 : vector<32x256xf32>
    %cst_82 = arith.constant 1.67785239 : f32
    %162 = vector.broadcast %cst_82 : f32 to vector<32x256xf32>
    %163 = arith.mulf %161, %162 : vector<32x256xf32>
    %c3 = arith.constant 3 : index
    %c0_83 = arith.constant 0 : index
    %c0_84 = arith.constant 0 : index
    %164 = vector.load %arg3[%c3, %c0_83, %c0_84] : memref<4x256x256xf32, #tpu.memory_space<vmem>>, vector<1x256x256xf32>
    %165 = vector.shape_cast %164 : vector<1x256x256xf32> to vector<256x256xf32>
    %cst_85 = arith.constant dense<0.000000e+00> : vector<32x256xf32>
    %166 = tpu.matmul %163, %165, %cst_85 {dimension_numbers = #tpu.dot_dimension_numbers<[1], [0], [0], [1], [0, 0, 1, 1], [], []>} : vector<32x256xf32>, vector<256x256xf32>, vector<32x256xf32> -> vector<32x256xf32>
    %c3_86 = arith.constant 3 : index
    %c0_87 = arith.constant 0 : index
    %c0_88 = arith.constant 0 : index
    %167 = vector.load %arg6[%c3_86, %c0_87, %c0_88] : memref<4x1x256xf32, #tpu.memory_space<vmem>>, vector<1x1x256xf32>
    %168 = vector.shape_cast %167 : vector<1x1x256xf32> to vector<1x256xf32>
    %169 = vector.broadcast %168 : vector<1x256xf32> to vector<32x256xf32>
    %170 = arith.mulf %166, %169 : vector<32x256xf32>
    %cst_89 = arith.constant 0.000000e+00 : f32
    %171 = vector.broadcast %cst_89 : f32 to vector<32x256xf32>
    %172 = arith.subf %171, %170 : vector<32x256xf32>
    %173 = math.exp %172 : vector<32x256xf32>
    %cst_90 = arith.constant 1.000000e+00 : f32
    %174 = vector.broadcast %cst_90 : f32 to vector<32x256xf32>
    %175 = arith.addf %174, %173 : vector<32x256xf32>
    %cst_91 = arith.constant 1.000000e+00 : f32
    %176 = vector.broadcast %cst_91 : f32 to vector<32x256xf32>
    %177 = arith.divf %176, %175 : vector<32x256xf32>
    %178 = arith.mulf %170, %177 : vector<32x256xf32>
    %cst_92 = arith.constant 1.67785239 : f32
    %179 = vector.broadcast %cst_92 : f32 to vector<32x256xf32>
    %180 = arith.mulf %178, %179 : vector<32x256xf32>
    %c0_93 = arith.constant 0 : index
    %c0_94 = arith.constant 0 : index
    %181 = vector.load %arg5[%c0_93, %c0_94] : memref<256x128xf32, #tpu.memory_space<vmem>>, vector<256x128xf32>
    %cst_95 = arith.constant dense<0.000000e+00> : vector<32x128xf32>
    %182 = tpu.matmul %180, %181, %cst_95 {dimension_numbers = #tpu.dot_dimension_numbers<[1], [0], [0], [1], [0, 0, 1, 1], [], []>} : vector<32x256xf32>, vector<256x128xf32>, vector<32x128xf32> -> vector<32x128xf32>
    %c0_96 = arith.constant 0 : index
    %c0_97 = arith.constant 0 : index
    %183 = vector.load %arg7[%c0_96, %c0_97] : memref<32x128xf32, #tpu.memory_space<vmem>>, vector<32x128xf32>
    tpu.vector_store %arg7[%c0_96, %c0_97], %182 {strides = array<i32>} : memref<32x128xf32, #tpu.memory_space<vmem>>, vector<32x128xf32>,
    return
  }
  func.func @transform_0(%arg0: i32) -> (i32, i32) {
    %c0_i32 = arith.constant 0 : i32
    %c0_i32_0 = arith.constant 0 : i32
    return %arg0, %c0_i32 : i32, i32
  }
  func.func @transform_1(%arg0: i32) -> (i32, i32) {
    %c0_i32 = arith.constant 0 : i32
    %c0_i32_0 = arith.constant 0 : i32
    %c0_i32_1 = arith.constant 0 : i32
    return %c0_i32, %c0_i32_0 : i32, i32
  }
  func.func @transform_2(%arg0: i32) -> (i32, i32, i32) {
    %c0_i32 = arith.constant 0 : i32
    %c0_i32_0 = arith.constant 0 : i32
    %c0_i32_1 = arith.constant 0 : i32
    %c0_i32_2 = arith.constant 0 : i32
    return %c0_i32, %c0_i32_0, %c0_i32_1 : i32, i32, i32
  }
  func.func @transform_3(%arg0: i32) -> (i32, i32, i32) {
    %c0_i32 = arith.constant 0 : i32
    %c0_i32_0 = arith.constant 0 : i32
    %c0_i32_1 = arith.constant 0 : i32
    %c0_i32_2 = arith.constant 0 : i32
    return %c0_i32, %c0_i32_0, %c0_i32_1 : i32, i32, i32
  }
  func.func @transform_4(%arg0: i32) -> (i32, i32) {
    %c0_i32 = arith.constant 0 : i32
    %c0_i32_0 = arith.constant 0 : i32
    %c0_i32_1 = arith.constant 0 : i32
    return %c0_i32, %c0_i32_0 : i32, i32
  }
  func.func @transform_5(%arg0: i32) -> (i32, i32, i32) {
    %c0_i32 = arith.constant 0 : i32
    %c0_i32_0 = arith.constant 0 : i32
    %c0_i32_1 = arith.constant 0 : i32
    %c0_i32_2 = arith.constant 0 : i32
    return %c0_i32, %c0_i32_0, %c0_i32_1 : i32, i32, i32
  }
  func.func @transform_6(%arg0: i32) -> (i32, i32) {
    %c0_i32 = arith.constant 0 : i32
    %c0_i32_0 = arith.constant 0 : i32
    return %arg0, %c0_i32 : i32, i32
  }
}

</mosaic_0001>

<bundles_post_ra>
// kernel: edm_precond_forward.1
= control target key start
LH: loop header
LB: loop body
LE: loop exit
PB: predicated region body
PF: predicated region fallthrough
CT: control target
= control target key end

     0   :  { %11 = vsyncpa [#allocation3], 0  ;;  %s3294_s21 = smov 0   ;;  %s4659_s0 = inlined_call_operand.vmem [shape: f32[64,128], index: 0, kind: input, shape index: {}]   ;;  %s4660_s1 = inlined_call_operand.vmem [shape: f32[128,256], index: 1, kind: input, shape index: {}]   ;;  %s4661_s2 = inlined_call_operand.vmem [shape: f32[4,256,256], index: 2, kind: input, shape index: {}]   ;;  %s4662_s3 = inlined_call_operand.hbm [shape: f32[3,256,256], index: 3, kind: input, shape index: {}]   ;;  %s4663_s4 = inlined_call_operand.vmem [shape: f32[256,128], index: 4, kind: input, shape index: {}]   ;;  %s4664_s5 = inlined_call_operand.vmem [shape: f32[4,1,256], index: 5, kind: input, shape index: {}]   ;;  %s4665_s6 = inlined_call_operand.vmem [shape: f32[64,128], index: 6, kind: output, shape index: {}]  }
   0x1 LB: > { %s2623_s22 = sadd.s32 4294967295, %s3253_s21   ;;  %p2625_p0 = scmp.ge.s32.totalorder %s3253_s21, 1  ;;  %s3253_s21 = sphi %s3294_s21, %s17_s21  }
   0x2   : > { %p179_p1 = scmp.lt.s32.totalorder %s3253_s21, 3  ;;  %s3255_s23 = smov [#allocation2]  }
   0x3   : > { %s197_s24 = sshll.u32 %s3255_s23, 4  ;;  %p3308_p3 = scmp.eq.s32.totalorder %s2623_s22, 0  ;;  %s198_s24 = int_to_ptr.vmem [resolvable:$true] %s197_s24 }
   0x4   : > { %p3302_p2 = pnand %p2625_p0, %p179_p1  ;;  %s3228_s27 = scalar_lea.vmem %s198_s24, 24576 }
   0x5   : > { %p3229_p7 = scmp.ne.s32.totalorder %s198_s24, %s3228_s27  ;;  %p3236_p10 = scmp.lt.s32.totalorder %s198_s24, %s198_s24 }
   0x6   : > { %p2879_p4 = pneg %p3302_p2  ;;  %p3237_p11 = scmp.lt.s32.totalorder %s3228_s27, %s3228_s27 }
   0x8   : > { %p2880_p5 = pnand %p3308_p3, %p2879_p4  ;;  %p3238_p12 = por %p3237_p11, %p3236_p10 }
   0xa   : > { %p3219_p6 = pneg %p2880_p5 }
   0xc   : > { %p3231_p8 = pnand %p3229_p7, %p3219_p6 }
   0xe   : > { %p3232_p9 = pneg %p3231_p8 }
  0x10   : > { %p3239_p13 = pnand %p3238_p12, %p3232_p9 }
  0x12   : > { %3242 = shalt.err (!%p3239_p13)
}
  0x13   : > { %s3256_s28 = smov 256   ;;  %s3257_s29 = smov 16  }
  0x14   : > { %2882 = dma.hbm_to_vmem [thread:$0]  (!%p2880_p5), %s4662_s3, 24576, %s198_s24, [#allocation3], %s3256_s28, %s3256_s28, %s3257_s29  }
  0x15   : > { %228 = sbr.rel (%p3302_p2) target bundleno = 2888 (0xb48), region = 44 }
  0x1a   : > { %3248 = dma.done.wait (%p3308_p3), [#allocation3], 24576  }
  0x1b   : > { %3250 = vsyncadd (%p3308_p3), [#allocation3], 4294942720  ;;  %v3258_v0 = vmov 0.0   ;;  %v305_v1 = vld [vmem:[%s4660_s1 + $0xf8] sm:$0xff]  ;;  %v304_v2 = vld [vmem:[%s4660_s1 + $0xf0] sm:$0xff]  ;;  %s2630_s18 = sshll.u32 %s2623_s22, 2 }
  0x1c   : > { %370 = vmatprep.mubr.f32.mxu0 %v3258_v0  ;;  %v303_v3 = vld [vmem:[%s4660_s1 + $0xe8] sm:$0xff]  ;;  %306 = vmatprep.subr.mxu0 %v305_v1  ;;  %v302_v4 = vld [vmem:[%s4660_s1 + $0xe0] sm:$0xff]  ;;  %v301_v5 = vld [vmem:[%s4660_s1 + $0xd8] sm:$0xff]  ;;  %p259_p0 = scmp.lt.s32.totalorder %s2630_s18, 7 }
  0x1d   : > { %307 = vmatpush1.msra.mxu0 %v304_v2  ;;  %v300_v6 = vld [vmem:[%s4660_s1 + $0xd0] sm:$0xff]  ;;  %v299_v7 = vld [vmem:[%s4660_s1 + $0xc8] sm:$0xff]  ;;  %v298_v8 = vld [vmem:[%s4660_s1 + $0xc0] sm:$0xff] }
  0x1e   : > { %308 = vmatprep.subr.mxu0 %v303_v3  ;;  %v297_v9 = vld [vmem:[%s4660_s1 + $0xb8] sm:$0xff]  ;;  %v296_v10 = vld [vmem:[%s4660_s1 + $0xb0] sm:$0xff]  ;;  %v295_v11 = vld [vmem:[%s4660_s1 + $0xa8] sm:$0xff]  ;;  %s4669_s18 = smov (!%p259_p0, %s2630_s18), 7 }
  0x1f   : > { %309 = vmatpush1.msra.mxu0 %v302_v4  ;;  %v294_v12 = vld [vmem:[%s4660_s1 + $0xa0] sm:$0xff]  ;;  %v293_v13 = vld [vmem:[%s4660_s1 + $0x98] sm:$0xff]  ;;  %v292_v14 = vld [vmem:[%s4660_s1 + $0x90] sm:$0xff]  ;;  %s2631_s19 = sshll.u32 %s4669_s18, 3 }
  0x20   : > { %310 = vmatprep.subr.mxu0 %v301_v5  ;;  %v291_v15 = vld [vmem:[%s4660_s1 + $0x88] sm:$0xff]  ;;  %v290_v16 = vld [vmem:[%s4660_s1 + $0x80] sm:$0xff]  ;;  %v289_v17 = vld [vmem:[%s4660_s1 + $0x78] sm:$0xff]  ;;  %s262_s29 = scalar_lea.vmem %s4659_s0, %s2631_s19  ;;  %s268_s8 = scalar_lea.vmem %s4665_s6, %s2631_s19 }
  0x21   : > { %311 = vmatpush1.msra.mxu0 %v300_v6  ;;  %v288_v18 = vld [vmem:[%s4660_s1 + $0x70] sm:$0xff]  ;;  %v287_v19 = vld [vmem:[%s4660_s1 + $0x68] sm:$0xff]  ;;  %v286_v20 = vld [vmem:[%s4660_s1 + $0x60] sm:$0xff] }
  0x22   : > { %312 = vmatprep.subr.mxu0 %v299_v7  ;;  %v285_v21 = vld [vmem:[%s4660_s1 + $0x58] sm:$0xff]  ;;  %v284_v22 = vld [vmem:[%s4660_s1 + $0x50] sm:$0xff]  ;;  %v283_v23 = vld [vmem:[%s4660_s1 + $0x48] sm:$0xff] }
  0x23   : > { %313 = vmatpush1.msra.mxu0 %v298_v8  ;;  %v282_v24 = vld [vmem:[%s4660_s1 + $0x40] sm:$0xff]  ;;  %v281_v25 = vld [vmem:[%s4660_s1 + $0x38] sm:$0xff]  ;;  %v280_v26 = vld [vmem:[%s4660_s1 + $0x30] sm:$0xff] }
  0x24   : > { %314 = vmatprep.subr.mxu0 %v297_v9  ;;  %v279_v27 = vld [vmem:[%s4660_s1 + $0x28] sm:$0xff]  ;;  %v278_v28 = vld [vmem:[%s4660_s1 + $0x20] sm:$0xff]  ;;  %v277_v29 = vld [vmem:[%s4660_s1 + $0x18] sm:$0xff] }
  0x25   : > { %315 = vmatpush1.msra.mxu0 %v296_v10  ;;  %v276_v30 = vld [vmem:[%s4660_s1 + $0x10] sm:$0xff]  ;;  %v275_v31 = vld [vmem:[%s4660_s1 + $0x8] sm:$0xff]  ;;  %v274_v32 = vld [vmem:[%s4660_s1] sm:$0xff] }
  0x26   : > { %316 = vmatprep.subr.mxu0 %v295_v11  ;;  %v270_v33 = vld [vmem:[%s262_s29] sm:$0xff]  ;;  %v271_v34 = vld [vmem:[%s262_s29 + $0x8] sm:$0xff]  ;;  %v272_v35 = vld [vmem:[%s262_s29 + $0x10] sm:$0xff] }
  0x27   : > { %317 = vmatpush1.msra.mxu0 %v294_v12  ;;  %v273_v36 = vld [vmem:[%s262_s29 + $0x18] sm:$0xff]  ;;  %v557_v58 = vld [vmem:[%s4661_s2 + $0xf0] sm:$0xff]  ;;  %v556_v59 = vld [vmem:[%s4661_s2 + $0xe8] sm:$0xff] }
  0x28   : > { %318 = vmatprep.subr.mxu0 %v293_v13  ;;  %v558_v57 = vld [vmem:[%s4661_s2 + $0xf8] sm:$0xff]  ;;  %v555_v60 = vld [vmem:[%s4661_s2 + $0xe0] sm:$0xff]  ;;  %v553_v62 = vld [vmem:[%s4661_s2 + $0xd0] sm:$0xff] }
  0x29   : > { %319 = vmatpush1.msra.mxu0 %v292_v14  ;;  %591 = vmatprep.subr.mxu1 %v558_v57  ;;  %v554_v61 = vld [vmem:[%s4661_s2 + $0xd8] sm:$0xff]  ;;  %v552_v63 = vld [vmem:[%s4661_s2 + $0xc8] sm:$0xff]  ;;  %v549_v2 = vld [vmem:[%s4661_s2 + $0xb0] sm:$0xff] }
  0x2a   : > { %320 = vmatprep.subr.mxu0 %v291_v15  ;;  %592 = vmatpush1.msra.mxu1 %v557_v58  ;;  %v550_v1 = vld [vmem:[%s4661_s2 + $0xb8] sm:$0xff]  ;;  %v548_v3 = vld [vmem:[%s4661_s2 + $0xa8] sm:$0xff]  ;;  %v547_v4 = vld [vmem:[%s4661_s2 + $0xa0] sm:$0xff] }
  0x2b   : > { %321 = vmatpush1.msra.mxu0 %v290_v16  ;;  %593 = vmatprep.subr.mxu1 %v556_v59  ;;  %v546_v5 = vld [vmem:[%s4661_s2 + $0x98] sm:$0xff]  ;;  %v545_v6 = vld [vmem:[%s4661_s2 + $0x90] sm:$0xff]  ;;  %v544_v7 = vld [vmem:[%s4661_s2 + $0x88] sm:$0xff] }
  0x2c   : > { %322 = vmatprep.subr.mxu0 %v289_v17  ;;  %594 = vmatpush1.msra.mxu1 %v555_v60  ;;  %v543_v8 = vld [vmem:[%s4661_s2 + $0x80] sm:$0xff]  ;;  %v542_v9 = vld [vmem:[%s4661_s2 + $0x78] sm:$0xff]  ;;  %v541_v10 = vld [vmem:[%s4661_s2 + $0x70] sm:$0xff] }
  0x2d   : > { %323 = vmatpush1.msra.mxu0 %v288_v18  ;;  %595 = vmatprep.subr.mxu1 %v554_v61  ;;  %v540_v11 = vld [vmem:[%s4661_s2 + $0x68] sm:$0xff]  ;;  %v539_v12 = vld [vmem:[%s4661_s2 + $0x60] sm:$0xff]  ;;  %v538_v13 = vld [vmem:[%s4661_s2 + $0x58] sm:$0xff] }
  0x2e   : > { %324 = vmatprep.subr.mxu0 %v287_v19  ;;  %596 = vmatpush1.msra.mxu1 %v553_v62  ;;  %v537_v14 = vld [vmem:[%s4661_s2 + $0x50] sm:$0xff]  ;;  %v536_v15 = vld [vmem:[%s4661_s2 + $0x48] sm:$0xff]  ;;  %v535_v16 = vld [vmem:[%s4661_s2 + $0x40] sm:$0xff] }
  0x2f   : > { %325 = vmatpush1.msra.mxu0 %v286_v20  ;;  %597 = vmatprep.subr.mxu1 %v552_v63  ;;  %v534_v17 = vld [vmem:[%s4661_s2 + $0x38] sm:$0xff]  ;;  %v533_v18 = vld [vmem:[%s4661_s2 + $0x30] sm:$0xff]  ;;  %v532_v19 = vld [vmem:[%s4661_s2 + $0x28] sm:$0xff] }
  0x30   : > { %326 = vmatprep.subr.mxu0 %v285_v21  ;;  %v531_v20 = vld [vmem:[%s4661_s2 + $0x20] sm:$0xff]  ;;  %v530_v21 = vld [vmem:[%s4661_s2 + $0x18] sm:$0xff]  ;;  %v565_v58 = vld [vmem:[%s4661_s2 + $0x130] sm:$0xff] }
  0x31   : > { %327 = vmatpush1.msra.mxu0 %v284_v22  ;;  %v529_v22 = vld [vmem:[%s4661_s2 + $0x10] sm:$0xff]  ;;  %v566_v57 = vld [vmem:[%s4661_s2 + $0x138] sm:$0xff]  ;;  %v564_v59 = vld [vmem:[%s4661_s2 + $0x128] sm:$0xff] }
  0x32   : > { %328 = vmatprep.subr.mxu0 %v283_v23  ;;  %v528_v23 = vld [vmem:[%s4661_s2 + $0x8] sm:$0xff]  ;;  %v563_v60 = vld [vmem:[%s4661_s2 + $0x120] sm:$0xff]  ;;  %v562_v61 = vld [vmem:[%s4661_s2 + $0x118] sm:$0xff] }
  0x33   : > { %329 = vmatpush1.msra.mxu0 %v282_v24  ;;  %v527_v24 = vld [vmem:[%s4661_s2] sm:$0xff]  ;;  %v561_v62 = vld [vmem:[%s4661_s2 + $0x110] sm:$0xff]  ;;  %v560_v63 = vld [vmem:[%s4661_s2 + $0x108] sm:$0xff] }
  0x34   : > { %330 = vmatprep.subr.mxu0 %v281_v25  ;;  %v590_v25 = vld [vmem:[%s4661_s2 + $0x1f8] sm:$0xff] }
  0x35   : > { %331 = vmatpush1.msra.mxu0 %v280_v26  ;;  %v589_v26 = vld [vmem:[%s4661_s2 + $0x1f0] sm:$0xff] }
  0x36   : > { %332 = vmatprep.subr.mxu0 %v279_v27  ;;  %v588_v27 = vld [vmem:[%s4661_s2 + $0x1e8] sm:$0xff] }
  0x37   : > { %333 = vmatpush1.msra.mxu0 %v278_v28  ;;  %v587_v28 = vld [vmem:[%s4661_s2 + $0x1e0] sm:$0xff] }
  0x38   : > { %334 = vmatprep.subr.mxu0 %v277_v29  ;;  %v586_v29 = vld [vmem:[%s4661_s2 + $0x1d8] sm:$0xff] }
  0x39   : > { %335 = vmatpush1.msra.mxu0 %v276_v30  ;;  %v585_v30 = vld [vmem:[%s4661_s2 + $0x1d0] sm:$0xff] }
  0x3a   : > { %336 = vmatprep.subr.mxu0 %v275_v31  ;;  %v584_v31 = vld [vmem:[%s4661_s2 + $0x1c8] sm:$0xff] }
  0x3b   : > { %337 = vmatpush1.msra.mxu0 %v274_v32  ;;  %v583_v32 = vld [vmem:[%s4661_s2 + $0x1c0] sm:$0xff] }
  0x3c   : > { %371 = vmatmul.mubr.f32.vlgmr.msra.gmra.mxu0 %v270_v33  ;;  %v582_v33 = vld [vmem:[%s4661_s2 + $0x1b8] sm:$0xff] }
  0x3d   : > { %376 = vmatprep.mubr.f32.mxu0 %v3258_v0 }
  0x40   : > { %377 = vmatmul.mubr.f32.gmra.mxu0 %v271_v34  ;;  %v581_v34 = vld [vmem:[%s4661_s2 + $0x1b0] sm:$0xff] }
  0x41   : > { %382 = vmatprep.mubr.f32.mxu0 %v3258_v0 }
  0x44   : > { %383 = vmatmul.mubr.f32.gmra.mxu0 %v272_v35  ;;  %v580_v35 = vld [vmem:[%s4661_s2 + $0x1a8] sm:$0xff] }
  0x45   : > { %388 = vmatprep.mubr.f32.mxu0 %v3258_v0  ;;  %v551_v0 = vld [vmem:[%s4661_s2 + $0xc0] sm:$0xff] }
  0x46   : > { %598 = vmatpush1.msra.mxu1 %v551_v0  ;;  %v559_v0 = vld [vmem:[%s4661_s2 + $0x100] sm:$0xff] }
  0x47   : > { %599 = vmatprep.subr.mxu1 %v550_v1  ;;  %v795_v1 = vld [vmem:[#allocation2 + $0xf8] sm:$0xff] }
  0x48   : > { %389 = vmatmul.mubr.f32.gmra.mxu0 %v273_v36  ;;  %600 = vmatpush1.msra.mxu1 %v549_v2  ;;  %v579_v36 = vld [vmem:[%s4661_s2 + $0x1a0] sm:$0xff]  ;;  %v794_v2 = vld [vmem:[#allocation2 + $0xf0] sm:$0xff] }
  0x49   : > { %601 = vmatprep.subr.mxu1 %v548_v3  ;;  %v793_v3 = vld [vmem:[#allocation2 + $0xe8] sm:$0xff]  ;;  %828 = vmatprep.subr.mxu0 %v795_v1 }
  0x4a   : > { %602 = vmatpush1.msra.mxu1 %v547_v4  ;;  %v792_v4 = vld [vmem:[#allocation2 + $0xe0] sm:$0xff]  ;;  %829 = vmatpush1.msra.mxu0 %v794_v2 }
  0x4b   : > { %603 = vmatprep.subr.mxu1 %v546_v5  ;;  %v791_v5 = vld [vmem:[#allocation2 + $0xd8] sm:$0xff]  ;;  %830 = vmatprep.subr.mxu0 %v793_v3 }
  0x4c   : > { %604 = vmatpush1.msra.mxu1 %v545_v6  ;;  %v790_v6 = vld [vmem:[#allocation2 + $0xd0] sm:$0xff]  ;;  %831 = vmatpush1.msra.mxu0 %v792_v4 }
  0x4d   : > { %605 = vmatprep.subr.mxu1 %v544_v7  ;;  %v789_v7 = vld [vmem:[#allocation2 + $0xc8] sm:$0xff]  ;;  %832 = vmatprep.subr.mxu0 %v791_v5 }
  0x4e   : > { %606 = vmatpush1.msra.mxu1 %v543_v8  ;;  %v788_v8 = vld [vmem:[#allocation2 + $0xc0] sm:$0xff]  ;;  %833 = vmatpush1.msra.mxu0 %v790_v6 }
  0x4f   : > { %607 = vmatprep.subr.mxu1 %v542_v9  ;;  %v787_v9 = vld [vmem:[#allocation2 + $0xb8] sm:$0xff]  ;;  %834 = vmatprep.subr.mxu0 %v789_v7 }
  0x50   : > { %608 = vmatpush1.msra.mxu1 %v541_v10  ;;  %v786_v10 = vld [vmem:[#allocation2 + $0xb0] sm:$0xff]  ;;  %835 = vmatpush1.msra.mxu0 %v788_v8 }
  0x51   : > { %609 = vmatprep.subr.mxu1 %v540_v11  ;;  %v785_v11 = vld [vmem:[#allocation2 + $0xa8] sm:$0xff]  ;;  %836 = vmatprep.subr.mxu0 %v787_v9 }
  0x52   : > { %610 = vmatpush1.msra.mxu1 %v539_v12  ;;  %v784_v12 = vld [vmem:[#allocation2 + $0xa0] sm:$0xff]  ;;  %837 = vmatpush1.msra.mxu0 %v786_v10 }
  0x53   : > { %611 = vmatprep.subr.mxu1 %v538_v13  ;;  %v783_v13 = vld [vmem:[#allocation2 + $0x98] sm:$0xff]  ;;  %838 = vmatprep.subr.mxu0 %v785_v11 }
  0x54   : > { %612 = vmatpush1.msra.mxu1 %v537_v14  ;;  %v782_v14 = vld [vmem:[#allocation2 + $0x90] sm:$0xff]  ;;  %839 = vmatpush1.msra.mxu0 %v784_v12 }
  0x55   : > { %613 = vmatprep.subr.mxu1 %v536_v15  ;;  %v781_v15 = vld [vmem:[#allocation2 + $0x88] sm:$0xff]  ;;  %840 = vmatprep.subr.mxu0 %v783_v13 }
  0x56   : > { %614 = vmatpush1.msra.mxu1 %v535_v16  ;;  %v780_v16 = vld [vmem:[#allocation2 + $0x80] sm:$0xff]  ;;  %841 = vmatpush1.msra.mxu0 %v782_v14 }
  0x57   : > { %615 = vmatprep.subr.mxu1 %v534_v17  ;;  %v779_v17 = vld [vmem:[#allocation2 + $0x78] sm:$0xff]  ;;  %842 = vmatprep.subr.mxu0 %v781_v15 }
  0x58   : > { %616 = vmatpush1.msra.mxu1 %v533_v18  ;;  %v778_v18 = vld [vmem:[#allocation2 + $0x70] sm:$0xff]  ;;  %843 = vmatpush1.msra.mxu0 %v780_v16 }
  0x59   : > { %617 = vmatprep.subr.mxu1 %v532_v19  ;;  %v777_v19 = vld [vmem:[#allocation2 + $0x68] sm:$0xff]  ;;  %844 = vmatprep.subr.mxu0 %v779_v17 }
  0x5a   : > { %618 = vmatpush1.msra.mxu1 %v531_v20  ;;  %v776_v20 = vld [vmem:[#allocation2 + $0x60] sm:$0xff]  ;;  %845 = vmatpush1.msra.mxu0 %v778_v18 }
  0x5b   : > { %619 = vmatprep.subr.mxu1 %v530_v21  ;;  %846 = vmatprep.subr.mxu0 %v777_v19 }
  0x5c   : > { %620 = vmatpush1.msra.mxu1 %v529_v22  ;;  %847 = vmatpush1.msra.mxu0 %v776_v20 }
  0x5d   : > { %621 = vmatprep.subr.mxu1 %v528_v23 }
  0x5e   : > { %622 = vmatpush1.msra.mxu1 %v527_v24 }
  0x5f   : > { %623 = vmatprep.subr.mxu1 %v590_v25 }
  0x60   : > { %624 = vmatpush2.msra.mxu1 %v589_v26 }
  0x61   : > { %625 = vmatprep.subr.mxu1 %v588_v27 }
  0x62   : > { %626 = vmatpush2.msra.mxu1 %v587_v28 }
  0x63   : > { %627 = vmatprep.subr.mxu1 %v586_v29 }
  0x64   : > { %628 = vmatpush2.msra.mxu1 %v585_v30 }
  0x65   : > { %629 = vmatprep.subr.mxu1 %v584_v31 }
  0x66   : > { %630 = vmatpush2.msra.mxu1 %v583_v32 }
  0x67   : > { %631 = vmatprep.subr.mxu1 %v582_v33 }
  0x68   : > { %632 = vmatpush2.msra.mxu1 %v581_v34 }
  0x69   : > { %633 = vmatprep.subr.mxu1 %v580_v35 }
  0x6a   : > { %634 = vmatpush2.msra.mxu1 %v579_v36 }
  0xfc   : > { %v3435_v37 = vpop.f32.mrf.mxu0 }
  0xfd   : > { %v395_v39 = vmul.f32 %v3435_v37, %v3435_v37 }
  0xfe   : > { %v3437_v38 = vpop.f32.mrf.mxu0 }
  0xff   : > { %v396_v40 = vmul.f32 %v3437_v38, %v3437_v38 }
 0x100   : > { %v3443_v41 = vpop.f32.mrf.mxu0 }
 0x101   : > { %v403_v42 = vadd.f32 %v396_v40, %v395_v39  ;;  %v397_v44 = vmul.f32 %v3443_v41, %v3443_v41  ;;  %v578_v39 = vld [vmem:[%s4661_s2 + $0x198] sm:$0xff]  ;;  %v577_v40 = vld [vmem:[%s4661_s2 + $0x190] sm:$0xff] }
 0x102   : > { %v3445_v43 = vpop.f32.mrf.mxu0  ;;  %635 = vmatprep.subr.mxu1 %v578_v39 }
 0x103   : > { %v398_v45 = vmul.f32 %v3445_v43, %v3445_v43  ;;  %404 = vadd.xlane.f32.xlu0 %v403_v42  ;;  %v576_v42 = vld [vmem:[%s4661_s2 + $0x188] sm:$0xff]  ;;  %636 = vmatpush2.msra.mxu1 %v577_v40 }
 0x104   : > { %v3451_v46 = vpop.f32.mrf.mxu0  ;;  %637 = vmatprep.subr.mxu1 %v576_v42 }
 0x105   : > { %v406_v47 = vadd.f32 %v398_v45, %v397_v44  ;;  %v399_v49 = vmul.f32 %v3451_v46, %v3451_v46  ;;  %v575_v44 = vld [vmem:[%s4661_s2 + $0x180] sm:$0xff]  ;;  %v574_v45 = vld [vmem:[%s4661_s2 + $0x178] sm:$0xff] }
 0x106   : > { %v3453_v48 = vpop.f32.mrf.mxu0  ;;  %638 = vmatpush2.msra.mxu1 %v575_v44 }
 0x107   : > { %v400_v50 = vmul.f32 %v3453_v48, %v3453_v48  ;;  %407 = vadd.xlane.f32.xlu0 %v406_v47  ;;  %v573_v47 = vld [vmem:[%s4661_s2 + $0x170] sm:$0xff]  ;;  %639 = vmatprep.subr.mxu1 %v574_v45 }
 0x108   : > { %v3459_v51 = vpop.f32.mrf.mxu0  ;;  %640 = vmatpush2.msra.mxu1 %v573_v47 }
 0x109   : > { %v409_v52 = vadd.f32 %v400_v50, %v399_v49  ;;  %v401_v54 = vmul.f32 %v3459_v51, %v3459_v51  ;;  %v572_v49 = vld [vmem:[%s4661_s2 + $0x168] sm:$0xff]  ;;  %v571_v50 = vld [vmem:[%s4661_s2 + $0x160] sm:$0xff] }
 0x10a   : > { %v3461_v53 = vpop.f32.mrf.mxu0  ;;  %641 = vmatprep.subr.mxu1 %v572_v49 }
 0x10b   : > { %v402_v55 = vmul.f32 %v3461_v53, %v3461_v53  ;;  %410 = vadd.xlane.f32.xlu1 %v409_v52  ;;  %v570_v52 = vld [vmem:[%s4661_s2 + $0x158] sm:$0xff]  ;;  %642 = vmatpush2.msra.mxu1 %v571_v50 }
 0x10c   : > { %643 = vmatprep.subr.mxu1 %v570_v52 }
 0x10d   : > { %v412_v56 = vadd.f32 %v402_v55, %v401_v54  ;;  %v569_v54 = vld [vmem:[%s4661_s2 + $0x150] sm:$0xff]  ;;  %v568_v55 = vld [vmem:[%s4661_s2 + $0x148] sm:$0xff] }
 0x10e   : > { %644 = vmatpush2.msra.mxu1 %v569_v54 }
 0x10f   : > { %413 = vadd.xlane.f32.xlu1 %v412_v56  ;;  %v567_v56 = vld [vmem:[%s4661_s2 + $0x140] sm:$0xff]  ;;  %645 = vmatprep.subr.mxu1 %v568_v55 }
 0x110   : > { %646 = vmatpush2.msra.mxu1 %v567_v56 }
 0x111   : > { %647 = vmatprep.subr.mxu1 %v566_v57 }
 0x112   : > { %648 = vmatpush2.msra.mxu1 %v565_v58 }
 0x113   : > { %649 = vmatprep.subr.mxu1 %v564_v59 }
 0x114   : > { %650 = vmatpush2.msra.mxu1 %v563_v60 }
 0x115   : > { %651 = vmatprep.subr.mxu1 %v562_v61 }
 0x116   : > { %652 = vmatpush2.msra.mxu1 %v561_v62 }
 0x117   : > { %653 = vmatprep.subr.mxu1 %v560_v63 }
 0x118   : > { %654 = vmatpush2.msra.mxu1 %v559_v0 }
 0x18c   : > { %v405_v21 = vpop.xlane.xlu0 %404 }
 0x18d   : > { %2897 = vrsqrt.f32 %v405_v21  ;;  %vm417_vm0 = vcmp.eq.f32.partialorder %v405_v21, inf  ;;  %v420_v27 = vand.u32 2147483648, %v405_v21  ;;  %vm419_vm1 = vcmp.eq.f32.partialorder %v405_v21, 0.0 }
 0x190   : > { %v408_v22 = vpop.xlane.xlu0 %407 }
 0x191   : > { %2899 = vrsqrt.f32 %v408_v22  ;;  %vm424_vm2 = vcmp.eq.f32.partialorder %v408_v22, inf  ;;  %v427_v33 = vand.u32 2147483648, %v408_v22  ;;  %vm426_vm3 = vcmp.eq.f32.partialorder %v408_v22, 0.0 }
 0x194   : > { %v411_v23 = vpop.xlane.xlu1 %410 }
 0x195   : > { %2901 = vrsqrt.f32 %v411_v23  ;;  %vm431_vm4 = vcmp.eq.f32.partialorder %v411_v23, inf  ;;  %v434_v44 = vand.u32 2147483648, %v411_v23  ;;  %vm433_vm5 = vcmp.eq.f32.partialorder %v411_v23, 0.0 }
 0x198   : > { %v414_v24 = vpop.xlane.xlu1 %413 }
 0x199   : > { %2903 = vrsqrt.f32 %v414_v24  ;;  %vm438_vm6 = vcmp.eq.f32.partialorder %v414_v24, inf  ;;  %v441_v55 = vand.u32 2147483648, %v414_v24  ;;  %vm440_vm7 = vcmp.eq.f32.partialorder %v414_v24, 0.0 }
 0x19a   : > { %v2898_v25 = vpop.eup %2897 }
 0x19b   : > { %v416_v26 = vmul.f32 %v2898_v25, %v405_v21 }
 0x19d   : > { %v418_v28 = vsel %vm417_vm0, %v405_v21, %v416_v26 }
 0x19e   : > { %v2900_v29 = vpop.eup %2899  ;;  %v421_v30 = vsel %vm419_vm1, %v420_v27, %v418_v28 }
 0x19f   : > { %v443_v31 = vmul.f32 0.0625, %v421_v30  ;;  %v423_v32 = vmul.f32 %v2900_v29, %v408_v22 }
 0x1a1   : > { %v447_v34 = vadd.f32 0.0001, %v443_v31  ;;  %v425_v35 = vsel %vm424_vm2, %v408_v22, %v423_v32 }
 0x1a2   : > { %v2902_v36 = vpop.eup %2901  ;;  %v428_v39 = vsel %vm426_vm3, %v427_v33, %v425_v35 }
 0x1a3   : > { %2905 = vrcp.f32 %v447_v34  ;;  %v444_v40 = vmul.f32 0.0625, %v428_v39  ;;  %v430_v42 = vmul.f32 %v2902_v36, %v411_v23 }
 0x1a5   : > { %v448_v45 = vadd.f32 0.0001, %v444_v40  ;;  %v432_v47 = vsel %vm431_vm4, %v411_v23, %v430_v42 }
 0x1a6   : > { %v2904_v49 = vpop.eup %2903  ;;  %v435_v50 = vsel %vm433_vm5, %v434_v44, %v432_v47 }
 0x1a7   : > { %2907 = vrcp.f32 %v448_v45  ;;  %v445_v52 = vmul.f32 0.0625, %v435_v50  ;;  %v437_v54 = vmul.f32 %v2904_v49, %v414_v24 }
 0x1a9   : > { %v449_v56 = vadd.f32 0.0001, %v445_v52  ;;  %v439_v57 = vsel %vm438_vm6, %v414_v24, %v437_v54 }
 0x1aa   : > { %v442_v58 = vsel %vm440_vm7, %v441_v55, %v439_v57 }
 0x1ab   : > { %2909 = vrcp.f32 %v449_v56  ;;  %v446_v59 = vmul.f32 0.0625, %v442_v58 }
 0x1ad   : > { %v450_v60 = vadd.f32 0.0001, %v446_v59 }
 0x1af   : > { %2911 = vrcp.f32 %v450_v60 }
 0x1b0   : > { %v2906_v61 = vpop.eup %2905 }
 0x1b1   : > { %v3660_v62 = vmul.f32 %v2906_v61, %v3437_v38  ;;  %v3663_v63 = vmul.f32 %v2906_v61, %v3435_v37 }
 0x1b3   : > { %v464_v0 = vsub.f32 0.0, %v3660_v62  ;;  %v463_v1 = vsub.f32 0.0, %v3663_v63 }
 0x1b4   : > { %v2908_v2 = vpop.eup %2907 }
 0x1b5   : > { %v473_v3 = vmul.f32 1.442695, %v464_v0  ;;  %v471_v4 = vmul.f32 1.442695, %v463_v1  ;;  %v3668_v5 = vmul.f32 %v2908_v2, %v3445_v43  ;;  %v3671_v6 = vmul.f32 %v2908_v2, %v3443_v41 }
 0x1b7   : > { %2913 = vpow2.f32 %v473_v3  ;;  %v466_v38 = vsub.f32 0.0, %v3668_v5  ;;  %v465_v7 = vsub.f32 0.0, %v3671_v6  ;;  %v775_v3 = vld [vmem:[#allocation2 + $0x58] sm:$0xff] }
 0x1b8   : > { %v2910_v37 = vpop.eup %2909  ;;  %2915 = vpow2.f32 %v471_v4  ;;  %848 = vmatprep.subr.mxu0 %v775_v3  ;;  %v774_v4 = vld [vmem:[#allocation2 + $0x50] sm:$0xff] }
 0x1b9   : > { %v477_v8 = vmul.f32 1.442695, %v466_v38  ;;  %v475_v9 = vmul.f32 1.442695, %v465_v7  ;;  %v3676_v10 = vmul.f32 %v2910_v37, %v3453_v48  ;;  %v3679_v11 = vmul.f32 %v2910_v37, %v3451_v46  ;;  %849 = vmatpush1.msra.mxu0 %v774_v4  ;;  %v773_v38 = vld [vmem:[#allocation2 + $0x48] sm:$0xff]  ;;  %v772_v7 = vld [vmem:[#allocation2 + $0x40] sm:$0xff] }
 0x1ba   : > { %850 = vmatprep.subr.mxu0 %v773_v38  ;;  %v771_v37 = vld [vmem:[#allocation2 + $0x38] sm:$0xff] }
 0x1bb   : > { %2917 = vpow2.f32 %v477_v8  ;;  %v468_v43 = vsub.f32 0.0, %v3676_v10  ;;  %v467_v41 = vsub.f32 0.0, %v3679_v11  ;;  %851 = vmatpush1.msra.mxu0 %v772_v7  ;;  %v770_v8 = vld [vmem:[#allocation2 + $0x30] sm:$0xff] }
 0x1bc   : > { %v2912_v12 = vpop.eup %2911  ;;  %2919 = vpow2.f32 %v475_v9  ;;  %852 = vmatprep.subr.mxu0 %v771_v37  ;;  %v769_v9 = vld [vmem:[#allocation2 + $0x28] sm:$0xff] }
 0x1bd   : > { %v481_v13 = vmul.f32 1.442695, %v468_v43  ;;  %v479_v14 = vmul.f32 1.442695, %v467_v41  ;;  %v3684_v15 = vmul.f32 %v2912_v12, %v3461_v53  ;;  %v3687_v16 = vmul.f32 %v2912_v12, %v3459_v51  ;;  %853 = vmatpush1.msra.mxu0 %v770_v8  ;;  %v768_v43 = vld [vmem:[#allocation2 + $0x20] sm:$0xff]  ;;  %v767_v41 = vld [vmem:[#allocation2 + $0x18] sm:$0xff] }
 0x1be   : > { %854 = vmatprep.subr.mxu0 %v769_v9  ;;  %v766_v12 = vld [vmem:[#allocation2 + $0x10] sm:$0xff] }
 0x1bf   : > { %2921 = vpow2.f32 %v481_v13  ;;  %v470_v48 = vsub.f32 0.0, %v3684_v15  ;;  %v469_v46 = vsub.f32 0.0, %v3687_v16  ;;  %855 = vmatpush1.msra.mxu0 %v768_v43  ;;  %v765_v13 = vld [vmem:[#allocation2 + $0x8] sm:$0xff] }
 0x1c0   : > { %2923 = vpow2.f32 %v479_v14  ;;  %856 = vmatprep.subr.mxu0 %v767_v41  ;;  %v764_v14 = vld [vmem:[#allocation2] sm:$0xff] }
 0x1c1   : > { %v485_v17 = vmul.f32 1.442695, %v470_v48  ;;  %v483_v18 = vmul.f32 1.442695, %v469_v46  ;;  %857 = vmatpush1.msra.mxu0 %v766_v12  ;;  %v827_v48 = vld [vmem:[#allocation2 + $0x1f8] sm:$0xff]  ;;  %v826_v46 = vld [vmem:[#allocation2 + $0x1f0] sm:$0xff] }
 0x1c2   : > { %858 = vmatprep.subr.mxu0 %v765_v13 }
 0x1c3   : > { %2925 = vpow2.f32 %v485_v17  ;;  %859 = vmatpush1.msra.mxu0 %v764_v14  ;;  %v825_v17 = vld [vmem:[#allocation2 + $0x1e8] sm:$0xff] }
 0x1c4   : > { %v2914_v19 = vpop.eup %2913  ;;  %2927 = vpow2.f32 %v483_v18  ;;  %860 = vmatprep.subr.mxu0 %v827_v48  ;;  %v824_v18 = vld [vmem:[#allocation2 + $0x1e0] sm:$0xff] }
 0x1c5   : > { %v2916_v20 = vpop.eup %2915  ;;  %v488_v21 = vadd.f32 1.0, %v2914_v19  ;;  %861 = vmatpush2.msra.mxu0 %v826_v46  ;;  %v823_v19 = vld [vmem:[#allocation2 + $0x1d8] sm:$0xff] }
 0x1c6   : > { %v487_v22 = vadd.f32 1.0, %v2916_v20  ;;  %862 = vmatprep.subr.mxu0 %v825_v17  ;;  %v822_v20 = vld [vmem:[#allocation2 + $0x1d0] sm:$0xff] }
 0x1c7   : > { %2929 = vrcp.f32 %v488_v21  ;;  %863 = vmatpush2.msra.mxu0 %v824_v18  ;;  %v821_v21 = vld [vmem:[#allocation2 + $0x1c8] sm:$0xff] }
 0x1c8   : > { %v2918_v53 = vpop.eup %2917  ;;  %2931 = vrcp.f32 %v487_v22  ;;  %864 = vmatprep.subr.mxu0 %v823_v19  ;;  %v820_v22 = vld [vmem:[#allocation2 + $0x1c0] sm:$0xff] }
 0x1c9   : > { %v2920_v23 = vpop.eup %2919  ;;  %v490_v51 = vadd.f32 1.0, %v2918_v53  ;;  %865 = vmatpush2.msra.mxu0 %v822_v20  ;;  %v819_v53 = vld [vmem:[#allocation2 + $0x1b8] sm:$0xff] }
 0x1ca   : > { %v489_v24 = vadd.f32 1.0, %v2920_v23  ;;  %866 = vmatprep.subr.mxu0 %v821_v21  ;;  %v818_v23 = vld [vmem:[#allocation2 + $0x1b0] sm:$0xff] }
 0x1cb   : > { %2933 = vrcp.f32 %v490_v51  ;;  %867 = vmatpush2.msra.mxu0 %v820_v22  ;;  %v817_v51 = vld [vmem:[#allocation2 + $0x1a8] sm:$0xff] }
 0x1cc   : > { %v2922_v25 = vpop.eup %2921  ;;  %2935 = vrcp.f32 %v489_v24  ;;  %868 = vmatprep.subr.mxu0 %v819_v53  ;;  %v816_v24 = vld [vmem:[#allocation2 + $0x1a0] sm:$0xff] }
 0x1cd   : > { %v2924_v26 = vpop.eup %2923  ;;  %v492_v27 = vadd.f32 1.0, %v2922_v25  ;;  %869 = vmatpush2.msra.mxu0 %v818_v23  ;;  %v815_v25 = vld [vmem:[#allocation2 + $0x198] sm:$0xff] }
 0x1ce   : > { %v491_v28 = vadd.f32 1.0, %v2924_v26  ;;  %870 = vmatprep.subr.mxu0 %v817_v51  ;;  %v814_v26 = vld [vmem:[#allocation2 + $0x190] sm:$0xff] }
 0x1cf   : > { %2937 = vrcp.f32 %v492_v27  ;;  %871 = vmatpush2.msra.mxu0 %v816_v24  ;;  %v813_v27 = vld [vmem:[#allocation2 + $0x188] sm:$0xff] }
 0x1d0   : > { %v2926_v29 = vpop.eup %2925  ;;  %2939 = vrcp.f32 %v491_v28  ;;  %872 = vmatprep.subr.mxu0 %v815_v25  ;;  %v812_v28 = vld [vmem:[#allocation2 + $0x180] sm:$0xff] }
 0x1d1   : > { %v2928_v30 = vpop.eup %2927  ;;  %v494_v31 = vadd.f32 1.0, %v2926_v29  ;;  %873 = vmatpush2.msra.mxu0 %v814_v26  ;;  %v811_v29 = vld [vmem:[#allocation2 + $0x178] sm:$0xff] }
 0x1d2   : > { %v493_v32 = vadd.f32 1.0, %v2928_v30  ;;  %874 = vmatprep.subr.mxu0 %v813_v27  ;;  %v810_v30 = vld [vmem:[#allocation2 + $0x170] sm:$0xff] }
 0x1d3   : > { %2941 = vrcp.f32 %v494_v31  ;;  %875 = vmatpush2.msra.mxu0 %v812_v28  ;;  %v809_v31 = vld [vmem:[#allocation2 + $0x168] sm:$0xff] }
 0x1d4   : > { %v2930_v33 = vpop.eup %2929  ;;  %2943 = vrcp.f32 %v493_v32  ;;  %876 = vmatprep.subr.mxu0 %v811_v29  ;;  %v808_v32 = vld [vmem:[#allocation2 + $0x160] sm:$0xff] }
 0x1d5   : > { %v2932_v34 = vpop.eup %2931  ;;  %v512_v35 = vmul.f32 %v2930_v33, %v3660_v62  ;;  %877 = vmatpush2.msra.mxu0 %v810_v30  ;;  %v807_v33 = vld [vmem:[#allocation2 + $0x158] sm:$0xff] }
 0x1d6   : > { %v511_v36 = vmul.f32 %v2932_v34, %v3663_v63  ;;  %878 = vmatprep.subr.mxu0 %v809_v31  ;;  %v806_v34 = vld [vmem:[#allocation2 + $0x150] sm:$0xff] }
 0x1d7   : > { %v520_v39 = vmul.f32 1.6778524, %v512_v35  ;;  %879 = vmatpush2.msra.mxu0 %v808_v32  ;;  %v805_v35 = vld [vmem:[#allocation2 + $0x148] sm:$0xff] }
 0x1d8   : > { %v2934_v40 = vpop.eup %2933  ;;  %v519_v42 = vmul.f32 1.6778524, %v511_v36  ;;  %880 = vmatprep.subr.mxu0 %v807_v33  ;;  %v804_v36 = vld [vmem:[#allocation2 + $0x140] sm:$0xff] }
 0x1d9   : > { %v2936_v44 = vpop.eup %2935  ;;  %655 = vmatprep.mubr.f32.mxu1 %v520_v39  ;;  %v514_v45 = vmul.f32 %v2934_v40, %v3668_v5  ;;  %881 = vmatpush2.msra.mxu0 %v806_v34  ;;  %v803_v39 = vld [vmem:[#allocation2 + $0x138] sm:$0xff]  ;;  %v802_v40 = vld [vmem:[#allocation2 + $0x130] sm:$0xff] }
 0x1da   : > { %656 = vmatmul.mubr.f32.vlgmr.msra.gmra.mxu1 %v519_v42  ;;  %v513_v47 = vmul.f32 %v2936_v44, %v3671_v6  ;;  %882 = vmatprep.subr.mxu0 %v805_v35  ;;  %v801_v42 = vld [vmem:[#allocation2 + $0x128] sm:$0xff]  ;;  %v800_v44 = vld [vmem:[#allocation2 + $0x120] sm:$0xff] }
 0x1db   : > { %v522_v49 = vmul.f32 1.6778524, %v514_v45  ;;  %883 = vmatpush2.msra.mxu0 %v804_v36  ;;  %v799_v45 = vld [vmem:[#allocation2 + $0x118] sm:$0xff] }
 0x1dc   : > { %v2938_v50 = vpop.eup %2937  ;;  %v521_v52 = vmul.f32 1.6778524, %v513_v47  ;;  %884 = vmatprep.subr.mxu0 %v803_v39  ;;  %v798_v47 = vld [vmem:[#allocation2 + $0x110] sm:$0xff] }
 0x1dd   : > { %v2940_v54 = vpop.eup %2939  ;;  %661 = vmatprep.mubr.f32.mxu1 %v522_v49  ;;  %v516_v55 = vmul.f32 %v2938_v50, %v3676_v10  ;;  %885 = vmatpush2.msra.mxu0 %v802_v40  ;;  %v797_v49 = vld [vmem:[#allocation2 + $0x108] sm:$0xff]  ;;  %v796_v50 = vld [vmem:[#allocation2 + $0x100] sm:$0xff] }
 0x1de   : > { %662 = vmatmul.mubr.f32.gmra.mxu1 %v521_v52  ;;  %v515_v56 = vmul.f32 %v2940_v54, %v3679_v11  ;;  %886 = vmatprep.subr.mxu0 %v801_v42  ;;  %v682_v52 = vlaneseq }
 0x1df   : > { %v524_v57 = vmul.f32 1.6778524, %v516_v55  ;;  %887 = vmatpush2.msra.mxu0 %v800_v44 }
 0x1e0   : > { %v2942_v58 = vpop.eup %2941  ;;  %v523_v59 = vmul.f32 1.6778524, %v515_v56  ;;  %888 = vmatprep.subr.mxu0 %v799_v45  ;;  %v683_v54 = vshrl.u32 %v682_v52, 7  ;;  %v680_v56 = vld [vmem:[%s4664_s5] sm:$0x3] }
 0x1e1   : > { %v2944_v60 = vpop.eup %2943  ;;  %667 = vmatprep.mubr.f32.mxu1 %v524_v57  ;;  %v518_v61 = vmul.f32 %v2942_v58, %v3684_v15  ;;  %889 = vmatpush2.msra.mxu0 %v798_v47 }
 0x1e2   : > { %668 = vmatmul.mubr.f32.gmra.mxu1 %v523_v59  ;;  %v517_v0 = vmul.f32 %v2944_v60, %v3687_v16  ;;  %890 = vmatprep.subr.mxu0 %v797_v49  ;;  %v3699_v55 = vsub.s32 0, %v683_v54  ;;  %v3704_v57 = vsub.s32 1, %v683_v54 }
 0x1e3   : > { %v526_v1 = vmul.f32 1.6778524, %v518_v61  ;;  %891 = vmatpush2.msra.mxu0 %v796_v50 }
 0x1e4   : > { %v525_v2 = vmul.f32 1.6778524, %v517_v0  ;;  %v685_v58 = vrot.slane %v680_v56, %v3699_v55  ;;  %v689_v59 = vrot.slane %v680_v56, %v3704_v57 }
 0x1e5   : > { %673 = vmatprep.mubr.f32.mxu1 %v526_v1 }
 0x1e6   : > { %674 = vmatmul.mubr.f32.gmra.mxu1 %v525_v2 }
 0x29a   : > { %v657_v60 = vpop.f32.mrf.mxu1 }
 0x29b   : > { %v3708_v61 = vmul.f32 %v685_v58, %v657_v60 }
 0x29c   : > { %v659_v0 = vpop.f32.mrf.mxu1 }
 0x29d   : > { %v700_v1 = vsub.f32 0.0, %v3708_v61  ;;  %v3711_v2 = vmul.f32 %v689_v59, %v659_v0 }
 0x29e   : > { %v663_v3 = vpop.f32.mrf.mxu1 }
 0x29f   : > { %v708_v4 = vmul.f32 1.442695, %v700_v1  ;;  %v701_v38 = vsub.f32 0.0, %v3711_v2  ;;  %v3714_v7 = vmul.f32 %v685_v58, %v663_v3 }
 0x2a0   : > { %v665_v37 = vpop.f32.mrf.mxu1 }
 0x2a1   : > { %2945 = vpow2.f32 %v708_v4  ;;  %v710_v8 = vmul.f32 1.442695, %v701_v38  ;;  %v702_v9 = vsub.f32 0.0, %v3714_v7  ;;  %v695_v43 = vmul.f32 %v689_v59, %v665_v37 }
 0x2a2   : > { %v669_v41 = vpop.f32.mrf.mxu1 }
 0x2a3   : > { %2947 = vpow2.f32 %v710_v8  ;;  %v712_v12 = vmul.f32 1.442695, %v702_v9  ;;  %v703_v13 = vsub.f32 0.0, %v695_v43  ;;  %v696_v14 = vmul.f32 %v685_v58, %v669_v41 }
 0x2a4   : > { %v671_v48 = vpop.f32.mrf.mxu1 }
 0x2a5   : > { %2949 = vpow2.f32 %v712_v12  ;;  %v714_v46 = vmul.f32 1.442695, %v703_v13  ;;  %v704_v17 = vsub.f32 0.0, %v696_v14  ;;  %v697_v18 = vmul.f32 %v689_v59, %v671_v48 }
 0x2a6   : > { %v675_v19 = vpop.f32.mrf.mxu1 }
 0x2a7   : > { %2951 = vpow2.f32 %v714_v46  ;;  %v716_v20 = vmul.f32 1.442695, %v704_v17  ;;  %v705_v21 = vsub.f32 0.0, %v697_v18  ;;  %v698_v22 = vmul.f32 %v685_v58, %v675_v19 }
 0x2a8   : > { %v677_v53 = vpop.f32.mrf.mxu1  ;;  %v917_v19 = vmul.f32 0.7, %v3663_v63 }
 0x2a9   : > { %2953 = vpow2.f32 %v716_v20  ;;  %v718_v23 = vmul.f32 1.442695, %v705_v21  ;;  %v706_v51 = vsub.f32 0.0, %v698_v22  ;;  %v699_v24 = vmul.f32 %v689_v59, %v677_v53 }
 0x2aa   : > { %v918_v21 = vmul.f32 0.7, %v3660_v62 }
 0x2ab   : > { %2955 = vpow2.f32 %v718_v23  ;;  %v720_v25 = vmul.f32 1.442695, %v706_v51  ;;  %v707_v26 = vsub.f32 0.0, %v699_v24 }
 0x2ad   : > { %2957 = vpow2.f32 %v720_v25  ;;  %v722_v27 = vmul.f32 1.442695, %v707_v26 }
 0x2ae   : > { %v2946_v28 = vpop.eup %2945 }
 0x2af   : > { %v724_v29 = vadd.f32 1.0, %v2946_v28  ;;  %2959 = vpow2.f32 %v722_v27 }
 0x2b0   : > { %v2948_v30 = vpop.eup %2947 }
 0x2b1   : > { %2961 = vrcp.f32 %v724_v29  ;;  %v725_v31 = vadd.f32 1.0, %v2948_v30  ;;  %v920_v29 = vmul.f32 0.7, %v3668_v5 }
 0x2b2   : > { %v2950_v32 = vpop.eup %2949 }
 0x2b3   : > { %2963 = vrcp.f32 %v725_v31  ;;  %v726_v33 = vadd.f32 1.0, %v2950_v32  ;;  %v921_v31 = vmul.f32 0.7, %v3679_v11  ;;  %v923_v11 = vmul.f32 0.7, %v3687_v16 }
 0x2b4   : > { %v2952_v34 = vpop.eup %2951 }
 0x2b5   : > { %2965 = vrcp.f32 %v726_v33  ;;  %v727_v35 = vadd.f32 1.0, %v2952_v34 }
 0x2b6   : > { %v2954_v36 = vpop.eup %2953 }
 0x2b7   : > { %2967 = vrcp.f32 %v727_v35  ;;  %v728_v39 = vadd.f32 1.0, %v2954_v36  ;;  %v922_v36 = vmul.f32 0.7, %v3676_v10 }
 0x2b8   : > { %v2956_v40 = vpop.eup %2955 }
 0x2b9   : > { %2969 = vrcp.f32 %v728_v39  ;;  %v729_v42 = vadd.f32 1.0, %v2956_v40 }
 0x2ba   : > { %v2958_v44 = vpop.eup %2957 }
 0x2bb   : > { %2971 = vrcp.f32 %v729_v42  ;;  %v730_v45 = vadd.f32 1.0, %v2958_v44 }
 0x2bc   : > { %v2960_v47 = vpop.eup %2959 }
 0x2bd   : > { %2973 = vrcp.f32 %v730_v45  ;;  %v731_v49 = vadd.f32 1.0, %v2960_v47 }
 0x2be   : > { %v2962_v50 = vpop.eup %2961 }
 0x2bf   : > { %2975 = vrcp.f32 %v731_v49  ;;  %v748_v54 = vmul.f32 %v2962_v50, %v3708_v61 }
 0x2c0   : > { %v2964_v52 = vpop.eup %2963 }
 0x2c1   : > { %v749_v56 = vmul.f32 %v2964_v52, %v3711_v2  ;;  %v756_v0 = vmul.f32 1.6778524, %v748_v54  ;;  %v924_v54 = vmul.f32 0.7, %v3684_v15 }
 0x2c2   : > { %v2966_v58 = vpop.eup %2965 }
 0x2c3   : > { %v757_v59 = vmul.f32 1.6778524, %v749_v56  ;;  %v750_v1 = vmul.f32 %v2966_v58, %v3714_v7 }
 0x2c4   : > { %v2968_v60 = vpop.eup %2967 }
 0x2c5   : > { %v751_v3 = vmul.f32 %v2968_v60, %v695_v43  ;;  %892 = vmatprep.mubr.f32.mxu0 %v757_v59  ;;  %v758_v8 = vmul.f32 1.6778524, %v750_v1 }
 0x2c6   : > { %v2970_v4 = vpop.eup %2969  ;;  %893 = vmatmul.mubr.f32.vlgmr.msra.gmra.mxu0 %v756_v0 }
 0x2c7   : > { %v759_v38 = vmul.f32 1.6778524, %v751_v3  ;;  %v752_v9 = vmul.f32 %v2970_v4, %v696_v14 }
 0x2c8   : > { %v2972_v37 = vpop.eup %2971 }
 0x2c9   : > { %v753_v41 = vmul.f32 %v2972_v37, %v697_v18  ;;  %898 = vmatprep.mubr.f32.mxu0 %v759_v38  ;;  %v760_v13 = vmul.f32 1.6778524, %v752_v9  ;;  %v2665_v9 = vld [vmem:[%s4661_s2 + $0x2f8] sm:$0xff] }
 0x2ca   : > { %v2974_v12 = vpop.eup %2973  ;;  %899 = vmatmul.mubr.f32.gmra.mxu0 %v758_v8  ;;  %1146 = vmatprep.subr.mxu1 %v2665_v9  ;;  %v2675_v9 = vld [vmem:[%s4661_s2 + $0x348] sm:$0xff] }
 0x2cb   : > { %v761_v61 = vmul.f32 1.6778524, %v753_v41  ;;  %v754_v48 = vmul.f32 %v2974_v12, %v698_v22  ;;  %v2664_v41 = vld [vmem:[%s4661_s2 + $0x2f0] sm:$0xff]  ;;  %v2663_v12 = vld [vmem:[%s4661_s2 + $0x2e8] sm:$0xff] }
 0x2cc   : > { %v2976_v2 = vpop.eup %2975  ;;  %1147 = vmatpush1.msra.mxu1 %v2664_v41  ;;  %v2674_v41 = vld [vmem:[%s4661_s2 + $0x340] sm:$0xff] }
 0x2cd   : > { %v755_v46 = vmul.f32 %v2976_v2, %v699_v24  ;;  %904 = vmatprep.mubr.f32.mxu0 %v761_v61  ;;  %v762_v43 = vmul.f32 1.6778524, %v754_v48  ;;  %v919_v24 = vmul.f32 0.7, %v3671_v6  ;;  %1148 = vmatprep.subr.mxu1 %v2663_v12  ;;  %v2662_v61 = vld [vmem:[%s4661_s2 + $0x2e0] sm:$0xff]  ;;  %v2661_v2 = vld [vmem:[%s4661_s2 + $0x2d8] sm:$0xff] }
 0x2ce   : > { %905 = vmatmul.mubr.f32.gmra.mxu0 %v760_v13  ;;  %1149 = vmatpush1.msra.mxu1 %v2662_v61  ;;  %v2660_v13 = vld [vmem:[%s4661_s2 + $0x2d0] sm:$0xff]  ;;  %v2659_v48 = vld [vmem:[%s4661_s2 + $0x2c8] sm:$0xff]  ;;  %v2673_v12 = vld [vmem:[%s4661_s2 + $0x338] sm:$0xff] }
 0x2cf   : > { %v763_v7 = vmul.f32 1.6778524, %v755_v46  ;;  %1150 = vmatprep.subr.mxu1 %v2661_v2  ;;  %v2658_v46 = vld [vmem:[%s4661_s2 + $0x2c0] sm:$0xff]  ;;  %v2672_v61 = vld [vmem:[%s4661_s2 + $0x330] sm:$0xff]  ;;  %v2671_v2 = vld [vmem:[%s4661_s2 + $0x328] sm:$0xff] }
 0x2d0   : > { %1151 = vmatpush1.msra.mxu1 %v2660_v13  ;;  %v2670_v13 = vld [vmem:[%s4661_s2 + $0x320] sm:$0xff] }
 0x2d1   : > { %910 = vmatprep.mubr.f32.mxu0 %v763_v7  ;;  %1152 = vmatprep.subr.mxu1 %v2659_v48  ;;  %v2657_v7 = vld [vmem:[%s4661_s2 + $0x2b8] sm:$0xff] }
 0x2d2   : > { %911 = vmatmul.mubr.f32.gmra.mxu0 %v762_v43  ;;  %1153 = vmatpush1.msra.mxu1 %v2658_v46  ;;  %v2656_v43 = vld [vmem:[%s4661_s2 + $0x2b0] sm:$0xff]  ;;  %v2669_v48 = vld [vmem:[%s4661_s2 + $0x318] sm:$0xff] }
 0x2d3   : > { %1154 = vmatprep.subr.mxu1 %v2657_v7  ;;  %v2668_v46 = vld [vmem:[%s4661_s2 + $0x310] sm:$0xff]  ;;  %v2667_v7 = vld [vmem:[%s4661_s2 + $0x308] sm:$0xff] }
 0x2d4   : > { %1155 = vmatpush1.msra.mxu1 %v2656_v43  ;;  %v2666_v43 = vld [vmem:[%s4661_s2 + $0x300] sm:$0xff] }
 0x386   : > { %v894_v17 = vpop.f32.mrf.mxu0 }
 0x387   : > { %v925_v20 = vmul.f32 0.3, %v894_v17  ;;  %v2655_v17 = vld [vmem:[%s4661_s2 + $0x2a8] sm:$0xff] }
 0x388   : > { %v896_v14 = vpop.f32.mrf.mxu0  ;;  %1156 = vmatprep.subr.mxu1 %v2655_v17  ;;  %v1352_v17 = vld [vmem:[#allocation2 + $0x2f8] sm:$0xff] }
 0x389   : > { %v933_v18 = vadd.f32 %v925_v20, %v917_v19  ;;  %v926_v53 = vmul.f32 0.3, %v896_v14  ;;  %v2654_v19 = vld [vmem:[%s4661_s2 + $0x2a0] sm:$0xff]  ;;  %v2653_v20 = vld [vmem:[%s4661_s2 + $0x298] sm:$0xff]  ;;  %v2652_v14 = vld [vmem:[%s4661_s2 + $0x290] sm:$0xff]  ;;  %1385 = vmatprep.subr.mxu0 %v1352_v17 }
 0x38a   : > { %v900_v23 = vpop.f32.mrf.mxu0  ;;  %1157 = vmatpush1.msra.mxu1 %v2654_v19  ;;  %v1351_v19 = vld [vmem:[#allocation2 + $0x2f0] sm:$0xff] }
 0x38b   : > { %v3722_v51 = vmul.f32 1.3130643, %v933_v18  ;;  %v934_v22 = vadd.f32 %v926_v53, %v918_v21  ;;  %v927_v25 = vmul.f32 0.3, %v900_v23  ;;  %1158 = vmatprep.subr.mxu1 %v2653_v20  ;;  %v2651_v18 = vld [vmem:[%s4661_s2 + $0x288] sm:$0xff]  ;;  %v2650_v21 = vld [vmem:[%s4661_s2 + $0x280] sm:$0xff]  ;;  %1386 = vmatpush1.msra.mxu0 %v1351_v19 }
 0x38c   : > { %v902_v26 = vpop.f32.mrf.mxu0  ;;  %1159 = vmatpush1.msra.mxu1 %v2652_v14  ;;  %v2649_v53 = vld [vmem:[%s4661_s2 + $0x278] sm:$0xff]  ;;  %v2648_v23 = vld [vmem:[%s4661_s2 + $0x270] sm:$0xff]  ;;  %v1350_v20 = vld [vmem:[#allocation2 + $0x2e8] sm:$0xff] }
 0x38d   : > { %v3725_v27 = vmul.f32 1.3130643, %v934_v22  ;;  %v935_v28 = vadd.f32 %v927_v25, %v919_v24  ;;  %v928_v63 = vmul.f32 0.3, %v902_v26  ;;  %v949_v62 = vmul.f32 %v3722_v51, %v3722_v51  ;;  %1160 = vmatprep.subr.mxu1 %v2651_v18  ;;  %v2647_v22 = vld [vmem:[%s4661_s2 + $0x268] sm:$0xff]  ;;  %v2646_v24 = vld [vmem:[%s4661_s2 + $0x260] sm:$0xff]  ;;  %1387 = vmatprep.subr.mxu0 %v1350_v20 }
 0x38e   : > { %v906_v30 = vpop.f32.mrf.mxu0  ;;  %1161 = vmatpush1.msra.mxu1 %v2650_v21  ;;  %v2645_v25 = vld [vmem:[%s4661_s2 + $0x258] sm:$0xff]  ;;  %v2644_v26 = vld [vmem:[%s4661_s2 + $0x250] sm:$0xff]  ;;  %v1349_v14 = vld [vmem:[#allocation2 + $0x2e0] sm:$0xff] }
 0x38f   : > { %v3731_v32 = vmul.f32 1.3130643, %v935_v28  ;;  %v936_v33 = vadd.f32 %v928_v63, %v920_v29  ;;  %v929_v34 = vmul.f32 0.3, %v906_v30  ;;  %v950_v6 = vmul.f32 %v3725_v27, %v3725_v27  ;;  %1162 = vmatprep.subr.mxu1 %v2649_v53  ;;  %v2643_v28 = vld [vmem:[%s4661_s2 + $0x248] sm:$0xff]  ;;  %v2642_v29 = vld [vmem:[%s4661_s2 + $0x240] sm:$0xff]  ;;  %1388 = vmatpush1.msra.mxu0 %v1349_v14 }
 0x390   : > { %v908_v35 = vpop.f32.mrf.mxu0  ;;  %1163 = vmatpush1.msra.mxu1 %v2648_v23  ;;  %v2641_v63 = vld [vmem:[%s4661_s2 + $0x238] sm:$0xff]  ;;  %v2640_v30 = vld [vmem:[%s4661_s2 + $0x230] sm:$0xff]  ;;  %v1346_v53 = vld [vmem:[#allocation2 + $0x2c8] sm:$0xff] }
 0x391   : > { %v3736_v39 = vmul.f32 1.3130643, %v936_v33  ;;  %v937_v5 = vadd.f32 %v929_v34, %v921_v31  ;;  %v930_v40 = vmul.f32 0.3, %v908_v35  ;;  %v957_v42 = vadd.f32 %v950_v6, %v949_v62  ;;  %1164 = vmatprep.subr.mxu1 %v2647_v22  ;;  %v2639_v31 = vld [vmem:[%s4661_s2 + $0x228] sm:$0xff]  ;;  %v2638_v62 = vld [vmem:[%s4661_s2 + $0x220] sm:$0xff] }
 0x392   : > { %v912_v44 = vpop.f32.mrf.mxu0  ;;  %v951_v45 = vmul.f32 %v3731_v32, %v3731_v32  ;;  %1165 = vmatpush1.msra.mxu1 %v2646_v24  ;;  %v2637_v33 = vld [vmem:[%s4661_s2 + $0x218] sm:$0xff]  ;;  %v2636_v34 = vld [vmem:[%s4661_s2 + $0x210] sm:$0xff]  ;;  %v2635_v6 = vld [vmem:[%s4661_s2 + $0x208] sm:$0xff] }
 0x393   : > { %v3741_v47 = vmul.f32 1.3130643, %v937_v5  ;;  %v938_v49 = vadd.f32 %v930_v40, %v922_v36  ;;  %v931_v50 = vmul.f32 0.3, %v912_v44  ;;  %958 = vadd.xlane.f32.xlu0 %v957_v42  ;;  %v952_v52 = vmul.f32 %v3736_v39, %v3736_v39  ;;  %1166 = vmatprep.subr.mxu1 %v2645_v25  ;;  %v2634_v35 = vld [vmem:[%s4661_s2 + $0x200] sm:$0xff]  ;;  %v2697_v36 = vld [vmem:[%s4661_s2 + $0x3f8] sm:$0xff] }
 0x394   : > { %v914_v10 = vpop.f32.mrf.mxu0  ;;  %1167 = vmatpush1.msra.mxu1 %v2644_v26  ;;  %v2696_v5 = vld [vmem:[%s4661_s2 + $0x3f0] sm:$0xff]  ;;  %v2695_v40 = vld [vmem:[%s4661_s2 + $0x3e8] sm:$0xff]  ;;  %v2694_v42 = vld [vmem:[%s4661_s2 + $0x3e0] sm:$0xff] }
 0x395   : > { %v3746_v56 = vmul.f32 1.3130643, %v938_v49  ;;  %v939_v58 = vadd.f32 %v931_v50, %v923_v11  ;;  %v932_v59 = vmul.f32 0.3, %v914_v10  ;;  %v960_v60 = vadd.f32 %v952_v52, %v951_v45  ;;  %1168 = vmatprep.subr.mxu1 %v2643_v28  ;;  %v2693_v44 = vld [vmem:[%s4661_s2 + $0x3d8] sm:$0xff]  ;;  %v2692_v11 = vld [vmem:[%s4661_s2 + $0x3d0] sm:$0xff] }
 0x396   : > { %v953_v1 = vmul.f32 %v3741_v47, %v3741_v47  ;;  %1169 = vmatpush1.msra.mxu1 %v2642_v29  ;;  %v2691_v45 = vld [vmem:[%s4661_s2 + $0x3c8] sm:$0xff]  ;;  %v2690_v49 = vld [vmem:[%s4661_s2 + $0x3c0] sm:$0xff]  ;;  %v2689_v50 = vld [vmem:[%s4661_s2 + $0x3b8] sm:$0xff] }
 0x397   : > { %v3748_v16 = vmul.f32 1.3130643, %v939_v58  ;;  %v940_v0 = vadd.f32 %v932_v59, %v924_v54  ;;  %961 = vadd.xlane.f32.xlu1 %v960_v60  ;;  %v954_v3 = vmul.f32 %v3746_v56, %v3746_v56  ;;  %1170 = vmatprep.subr.mxu1 %v2641_v63  ;;  %v2688_v52 = vld [vmem:[%s4661_s2 + $0x3b0] sm:$0xff]  ;;  %v2687_v10 = vld [vmem:[%s4661_s2 + $0x3a8] sm:$0xff]  ;;  %v2686_v54 = vld [vmem:[%s4661_s2 + $0x3a0] sm:$0xff] }
 0x398   : > { %1171 = vmatpush1.msra.mxu1 %v2640_v30  ;;  %v2685_v58 = vld [vmem:[%s4661_s2 + $0x398] sm:$0xff]  ;;  %v2684_v59 = vld [vmem:[%s4661_s2 + $0x390] sm:$0xff]  ;;  %v2683_v60 = vld [vmem:[%s4661_s2 + $0x388] sm:$0xff] }
 0x399   : > { %v3754_v4 = vmul.f32 1.3130643, %v940_v0  ;;  %v963_v38 = vadd.f32 %v954_v3, %v953_v1  ;;  %v955_v15 = vmul.f32 %v3748_v16, %v3748_v16  ;;  %1172 = vmatprep.subr.mxu1 %v2639_v31  ;;  %v2682_v0 = vld [vmem:[%s4661_s2 + $0x380] sm:$0xff]  ;;  %v2681_v1 = vld [vmem:[%s4661_s2 + $0x378] sm:$0xff]  ;;  %v2680_v3 = vld [vmem:[%s4661_s2 + $0x370] sm:$0xff] }
 0x39a   : > { %1173 = vmatpush1.msra.mxu1 %v2638_v62  ;;  %v1348_v18 = vld [vmem:[#allocation2 + $0x2d8] sm:$0xff]  ;;  %v1347_v21 = vld [vmem:[#allocation2 + $0x2d0] sm:$0xff]  ;;  %v1345_v23 = vld [vmem:[#allocation2 + $0x2c0] sm:$0xff] }
 0x39b   : > { %964 = vadd.xlane.f32.xlu0 %v963_v38  ;;  %v956_v37 = vmul.f32 %v3754_v4, %v3754_v4  ;;  %1174 = vmatprep.subr.mxu1 %v2637_v33  ;;  %v2679_v38 = vld [vmem:[%s4661_s2 + $0x368] sm:$0xff]  ;;  %v1344_v22 = vld [vmem:[#allocation2 + $0x2b8] sm:$0xff]  ;;  %v1343_v24 = vld [vmem:[#allocation2 + $0x2b0] sm:$0xff] }
 0x39c   : > { %1175 = vmatpush1.msra.mxu1 %v2636_v34  ;;  %1389 = vmatprep.subr.mxu0 %v1348_v18  ;;  %v1342_v25 = vld [vmem:[#allocation2 + $0x2a8] sm:$0xff]  ;;  %v1341_v26 = vld [vmem:[#allocation2 + $0x2a0] sm:$0xff]  ;;  %v1340_v28 = vld [vmem:[#allocation2 + $0x298] sm:$0xff] }
 0x39d   : > { %v966_v8 = vadd.f32 %v956_v37, %v955_v15  ;;  %1176 = vmatprep.subr.mxu1 %v2635_v6  ;;  %v2678_v15 = vld [vmem:[%s4661_s2 + $0x360] sm:$0xff]  ;;  %v2677_v37 = vld [vmem:[%s4661_s2 + $0x358] sm:$0xff]  ;;  %1390 = vmatpush1.msra.mxu0 %v1347_v21  ;;  %v1339_v29 = vld [vmem:[#allocation2 + $0x290] sm:$0xff] }
 0x39e   : > { %1177 = vmatpush1.msra.mxu1 %v2634_v35  ;;  %1391 = vmatprep.subr.mxu0 %v1346_v53  ;;  %v1338_v63 = vld [vmem:[#allocation2 + $0x288] sm:$0xff]  ;;  %v1337_v30 = vld [vmem:[#allocation2 + $0x280] sm:$0xff]  ;;  %v1336_v31 = vld [vmem:[#allocation2 + $0x278] sm:$0xff] }
 0x39f   : > { %967 = vadd.xlane.f32.xlu1 %v966_v8  ;;  %1178 = vmatprep.subr.mxu1 %v2697_v36  ;;  %v2676_v8 = vld [vmem:[%s4661_s2 + $0x350] sm:$0xff]  ;;  %v1334_v33 = vld [vmem:[#allocation2 + $0x268] sm:$0xff]  ;;  %v1333_v34 = vld [vmem:[#allocation2 + $0x260] sm:$0xff] }
 0x3a0   : > { %1179 = vmatpush2.msra.mxu1 %v2696_v5  ;;  %1392 = vmatpush1.msra.mxu0 %v1345_v23  ;;  %v1335_v62 = vld [vmem:[#allocation2 + $0x270] sm:$0xff] }
 0x3a1   : > { %1180 = vmatprep.subr.mxu1 %v2695_v40  ;;  %1393 = vmatprep.subr.mxu0 %v1344_v22 }
 0x3a2   : > { %1181 = vmatpush2.msra.mxu1 %v2694_v42  ;;  %1394 = vmatpush1.msra.mxu0 %v1343_v24 }
 0x3a3   : > { %1182 = vmatprep.subr.mxu1 %v2693_v44  ;;  %1395 = vmatprep.subr.mxu0 %v1342_v25 }
 0x3a4   : > { %1183 = vmatpush2.msra.mxu1 %v2692_v11  ;;  %1396 = vmatpush1.msra.mxu0 %v1341_v26 }
 0x3a5   : > { %1184 = vmatprep.subr.mxu1 %v2691_v45  ;;  %1397 = vmatprep.subr.mxu0 %v1340_v28 }
 0x3a6   : > { %1185 = vmatpush2.msra.mxu1 %v2690_v49  ;;  %1398 = vmatpush1.msra.mxu0 %v1339_v29 }
 0x3a7   : > { %1186 = vmatprep.subr.mxu1 %v2689_v50  ;;  %1399 = vmatprep.subr.mxu0 %v1338_v63 }
 0x3a8   : > { %1187 = vmatpush2.msra.mxu1 %v2688_v52  ;;  %1400 = vmatpush1.msra.mxu0 %v1337_v30 }
 0x3a9   : > { %1188 = vmatprep.subr.mxu1 %v2687_v10  ;;  %1401 = vmatprep.subr.mxu0 %v1336_v31 }
 0x3aa   : > { %1189 = vmatpush2.msra.mxu1 %v2686_v54  ;;  %1402 = vmatpush1.msra.mxu0 %v1335_v62 }
 0x3ab   : > { %1190 = vmatprep.subr.mxu1 %v2685_v58  ;;  %1403 = vmatprep.subr.mxu0 %v1334_v33 }
 0x3ac   : > { %1191 = vmatpush2.msra.mxu1 %v2684_v59  ;;  %1404 = vmatpush1.msra.mxu0 %v1333_v34 }
 0x3ad   : > { %1192 = vmatprep.subr.mxu1 %v2683_v60 }
 0x3ae   : > { %1193 = vmatpush2.msra.mxu1 %v2682_v0 }
 0x3af   : > { %1194 = vmatprep.subr.mxu1 %v2681_v1 }
 0x3b0   : > { %1195 = vmatpush2.msra.mxu1 %v2680_v3 }
 0x3b1   : > { %1196 = vmatprep.subr.mxu1 %v2679_v38 }
 0x3b2   : > { %1197 = vmatpush2.msra.mxu1 %v2678_v15 }
 0x3b3   : > { %1198 = vmatprep.subr.mxu1 %v2677_v37 }
 0x3b4   : > { %1199 = vmatpush2.msra.mxu1 %v2676_v8 }
 0x3b5   : > { %1200 = vmatprep.subr.mxu1 %v2675_v9 }
 0x3b6   : > { %1201 = vmatpush2.msra.mxu1 %v2674_v41 }
 0x3b7   : > { %1202 = vmatprep.subr.mxu1 %v2673_v12 }
 0x3b8   : > { %1203 = vmatpush2.msra.mxu1 %v2672_v61 }
 0x3b9   : > { %1204 = vmatprep.subr.mxu1 %v2671_v2 }
 0x3ba   : > { %1205 = vmatpush2.msra.mxu1 %v2670_v13 }
 0x3bb   : > { %1206 = vmatprep.subr.mxu1 %v2669_v48 }
 0x3bc   : > { %1207 = vmatpush2.msra.mxu1 %v2668_v46 }
 0x3bd   : > { %1208 = vmatprep.subr.mxu1 %v2667_v7 }
 0x3be   : > { %1209 = vmatpush2.msra.mxu1 %v2666_v43 }
 0x41c   : > { %v959_v6 = vpop.xlane.xlu0 %958 }
 0x41d   : > { %2977 = vrsqrt.f32 %v959_v6  ;;  %vm971_vm8 = vcmp.eq.f32.partialorder %v959_v6, inf  ;;  %v974_v44 = vand.u32 2147483648, %v959_v6  ;;  %vm973_vm9 = vcmp.eq.f32.partialorder %v959_v6, 0.0 }
 0x420   : > { %v962_v35 = vpop.xlane.xlu1 %961 }
 0x421   : > { %2979 = vrsqrt.f32 %v962_v35  ;;  %vm978_vm10 = vcmp.eq.f32.partialorder %v962_v35, inf  ;;  %v981_v10 = vand.u32 2147483648, %v962_v35  ;;  %vm980_vm11 = vcmp.eq.f32.partialorder %v962_v35, 0.0 }
 0x424   : > { %v965_v36 = vpop.xlane.xlu0 %964 }
 0x425   : > { %2981 = vrsqrt.f32 %v965_v36  ;;  %vm985_vm12 = vcmp.eq.f32.partialorder %v965_v36, inf  ;;  %v988_v3 = vand.u32 2147483648, %v965_v36  ;;  %vm987_vm13 = vcmp.eq.f32.partialorder %v965_v36, 0.0 }
 0x428   : > { %v968_v5 = vpop.xlane.xlu1 %967 }
 0x429   : > { %2983 = vrsqrt.f32 %v968_v5  ;;  %vm992_vm14 = vcmp.eq.f32.partialorder %v968_v5, inf  ;;  %v995_v12 = vand.u32 2147483648, %v968_v5  ;;  %vm994_vm15 = vcmp.eq.f32.partialorder %v968_v5, 0.0 }
 0x42a   : > { %v2978_v40 = vpop.eup %2977 }
 0x42b   : > { %v970_v42 = vmul.f32 %v2978_v40, %v959_v6 }
 0x42d   : > { %v972_v11 = vsel %vm971_vm8, %v959_v6, %v970_v42 }
 0x42e   : > { %v2980_v45 = vpop.eup %2979  ;;  %v975_v49 = vsel %vm973_vm9, %v974_v44, %v972_v11 }
 0x42f   : > { %v997_v50 = vmul.f32 0.0625, %v975_v49  ;;  %v977_v52 = vmul.f32 %v2980_v45, %v962_v35 }
 0x431   : > { %v1001_v54 = vadd.f32 0.0001, %v997_v50  ;;  %v979_v58 = vsel %vm978_vm10, %v962_v35, %v977_v52 }
 0x432   : > { %v2982_v59 = vpop.eup %2981  ;;  %v982_v60 = vsel %vm980_vm11, %v981_v10, %v979_v58 }
 0x433   : > { %2985 = vrcp.f32 %v1001_v54  ;;  %v998_v0 = vmul.f32 0.0625, %v982_v60  ;;  %v984_v1 = vmul.f32 %v2982_v59, %v965_v36 }
 0x435   : > { %v1002_v38 = vadd.f32 0.0001, %v998_v0  ;;  %v986_v15 = vsel %vm985_vm12, %v965_v36, %v984_v1 }
 0x436   : > { %v2984_v37 = vpop.eup %2983  ;;  %v989_v8 = vsel %vm987_vm13, %v988_v3, %v986_v15 }
 0x437   : > { %2987 = vrcp.f32 %v1002_v38  ;;  %v999_v9 = vmul.f32 0.0625, %v989_v8  ;;  %v991_v41 = vmul.f32 %v2984_v37, %v968_v5 }
 0x439   : > { %v1003_v61 = vadd.f32 0.0001, %v999_v9  ;;  %v993_v2 = vsel %vm992_vm14, %v968_v5, %v991_v41 }
 0x43a   : > { %v996_v13 = vsel %vm994_vm15, %v995_v12, %v993_v2 }
 0x43b   : > { %2989 = vrcp.f32 %v1003_v61  ;;  %v1000_v48 = vmul.f32 0.0625, %v996_v13 }
 0x43d   : > { %v1004_v46 = vadd.f32 0.0001, %v1000_v48 }
 0x43f   : > { %2991 = vrcp.f32 %v1004_v46 }
 0x440   : > { %v2986_v7 = vpop.eup %2985 }
 0x441   : > { %v3953_v43 = vmul.f32 %v2986_v7, %v3725_v27  ;;  %v3956_v17 = vmul.f32 %v2986_v7, %v3722_v51 }
 0x443   : > { %v1018_v19 = vsub.f32 0.0, %v3953_v43  ;;  %v1017_v20 = vsub.f32 0.0, %v3956_v17 }
 0x444   : > { %v2988_v14 = vpop.eup %2987 }
 0x445   : > { %v1027_v18 = vmul.f32 1.442695, %v1018_v19  ;;  %v1025_v21 = vmul.f32 1.442695, %v1017_v20  ;;  %v3961_v53 = vmul.f32 %v2988_v14, %v3736_v39  ;;  %v3964_v23 = vmul.f32 %v2988_v14, %v3731_v32 }
 0x447   : > { %2993 = vpow2.f32 %v1027_v18  ;;  %v1020_v27 = vsub.f32 0.0, %v3961_v53  ;;  %v1019_v22 = vsub.f32 0.0, %v3964_v23 }
 0x448   : > { %v2990_v51 = vpop.eup %2989  ;;  %2995 = vpow2.f32 %v1025_v21 }
 0x449   : > { %v1031_v24 = vmul.f32 1.442695, %v1020_v27  ;;  %v1029_v25 = vmul.f32 1.442695, %v1019_v22  ;;  %v3969_v26 = vmul.f32 %v2990_v51, %v3746_v56  ;;  %v3972_v28 = vmul.f32 %v2990_v51, %v3741_v47  ;;  %v1332_v27 = vld [vmem:[#allocation2 + $0x258] sm:$0xff]  ;;  %v1331_v22 = vld [vmem:[#allocation2 + $0x250] sm:$0xff] }
 0x44a   : > { %1405 = vmatprep.subr.mxu0 %v1332_v27  ;;  %v1330_v51 = vld [vmem:[#allocation2 + $0x248] sm:$0xff] }
 0x44b   : > { %2997 = vpow2.f32 %v1031_v24  ;;  %v1022_v39 = vsub.f32 0.0, %v3969_v26  ;;  %v1021_v32 = vsub.f32 0.0, %v3972_v28  ;;  %1406 = vmatpush1.msra.mxu0 %v1331_v22  ;;  %v1329_v24 = vld [vmem:[#allocation2 + $0x240] sm:$0xff] }
 0x44c   : > { %v2992_v29 = vpop.eup %2991  ;;  %2999 = vpow2.f32 %v1029_v25  ;;  %1407 = vmatprep.subr.mxu0 %v1330_v51  ;;  %v1328_v25 = vld [vmem:[#allocation2 + $0x238] sm:$0xff] }
 0x44d   : > { %v1035_v63 = vmul.f32 1.442695, %v1022_v39  ;;  %v1033_v30 = vmul.f32 1.442695, %v1021_v32  ;;  %v3977_v31 = vmul.f32 %v2992_v29, %v3754_v4  ;;  %v3980_v62 = vmul.f32 %v2992_v29, %v3748_v16  ;;  %1408 = vmatpush1.msra.mxu0 %v1329_v24  ;;  %v1327_v39 = vld [vmem:[#allocation2 + $0x230] sm:$0xff]  ;;  %v1326_v32 = vld [vmem:[#allocation2 + $0x228] sm:$0xff] }
 0x44e   : > { %1409 = vmatprep.subr.mxu0 %v1328_v25  ;;  %v1325_v29 = vld [vmem:[#allocation2 + $0x220] sm:$0xff] }
 0x44f   : > { %3001 = vpow2.f32 %v1035_v63  ;;  %v1024_v56 = vsub.f32 0.0, %v3977_v31  ;;  %v1023_v47 = vsub.f32 0.0, %v3980_v62  ;;  %1410 = vmatpush1.msra.mxu0 %v1327_v39  ;;  %v1324_v63 = vld [vmem:[#allocation2 + $0x218] sm:$0xff] }
 0x450   : > { %3003 = vpow2.f32 %v1033_v30  ;;  %1411 = vmatprep.subr.mxu0 %v1326_v32  ;;  %v1323_v30 = vld [vmem:[#allocation2 + $0x210] sm:$0xff] }
 0x451   : > { %v1039_v33 = vmul.f32 1.442695, %v1024_v56  ;;  %v1037_v34 = vmul.f32 1.442695, %v1023_v47  ;;  %1412 = vmatpush1.msra.mxu0 %v1325_v29  ;;  %v1322_v56 = vld [vmem:[#allocation2 + $0x208] sm:$0xff]  ;;  %v1321_v47 = vld [vmem:[#allocation2 + $0x200] sm:$0xff] }
 0x452   : > { %1413 = vmatprep.subr.mxu0 %v1324_v63 }
 0x453   : > { %3005 = vpow2.f32 %v1039_v33  ;;  %1414 = vmatpush1.msra.mxu0 %v1323_v30  ;;  %v1384_v33 = vld [vmem:[#allocation2 + $0x3f8] sm:$0xff] }
 0x454   : > { %v2994_v6 = vpop.eup %2993  ;;  %3007 = vpow2.f32 %v1037_v34  ;;  %1415 = vmatprep.subr.mxu0 %v1322_v56  ;;  %v1383_v34 = vld [vmem:[#allocation2 + $0x3f0] sm:$0xff] }
 0x455   : > { %v2996_v35 = vpop.eup %2995  ;;  %v1042_v36 = vadd.f32 1.0, %v2994_v6  ;;  %1416 = vmatpush1.msra.mxu0 %v1321_v47  ;;  %v1382_v6 = vld [vmem:[#allocation2 + $0x3e8] sm:$0xff] }
 0x456   : > { %v1041_v5 = vadd.f32 1.0, %v2996_v35  ;;  %1417 = vmatprep.subr.mxu0 %v1384_v33  ;;  %v1381_v35 = vld [vmem:[#allocation2 + $0x3e0] sm:$0xff] }
 0x457   : > { %3009 = vrcp.f32 %v1042_v36  ;;  %1418 = vmatpush2.msra.mxu0 %v1383_v34  ;;  %v1380_v36 = vld [vmem:[#allocation2 + $0x3d8] sm:$0xff] }
 0x458   : > { %v2998_v4 = vpop.eup %2997  ;;  %3011 = vrcp.f32 %v1041_v5  ;;  %1419 = vmatprep.subr.mxu0 %v1382_v6  ;;  %v1379_v5 = vld [vmem:[#allocation2 + $0x3d0] sm:$0xff] }
 0x459   : > { %v3000_v40 = vpop.eup %2999  ;;  %v1044_v16 = vadd.f32 1.0, %v2998_v4  ;;  %1420 = vmatpush2.msra.mxu0 %v1381_v35  ;;  %v1378_v4 = vld [vmem:[#allocation2 + $0x3c8] sm:$0xff] }
 0x45a   : > { %v1043_v42 = vadd.f32 1.0, %v3000_v40  ;;  %1421 = vmatprep.subr.mxu0 %v1380_v36  ;;  %v1377_v40 = vld [vmem:[#allocation2 + $0x3c0] sm:$0xff] }
 0x45b   : > { %3013 = vrcp.f32 %v1044_v16  ;;  %1422 = vmatpush2.msra.mxu0 %v1379_v5  ;;  %v1376_v16 = vld [vmem:[#allocation2 + $0x3b8] sm:$0xff] }
 0x45c   : > { %v3002_v44 = vpop.eup %3001  ;;  %3015 = vrcp.f32 %v1043_v42  ;;  %1423 = vmatprep.subr.mxu0 %v1378_v4  ;;  %v1375_v42 = vld [vmem:[#allocation2 + $0x3b0] sm:$0xff] }
 0x45d   : > { %v3004_v11 = vpop.eup %3003  ;;  %v1046_v45 = vadd.f32 1.0, %v3002_v44  ;;  %1424 = vmatpush2.msra.mxu0 %v1377_v40  ;;  %v1374_v44 = vld [vmem:[#allocation2 + $0x3a8] sm:$0xff] }
 0x45e   : > { %v1045_v49 = vadd.f32 1.0, %v3004_v11  ;;  %1425 = vmatprep.subr.mxu0 %v1376_v16  ;;  %v1373_v11 = vld [vmem:[#allocation2 + $0x3a0] sm:$0xff] }
 0x45f   : > { %3017 = vrcp.f32 %v1046_v45  ;;  %1426 = vmatpush2.msra.mxu0 %v1375_v42  ;;  %v1372_v45 = vld [vmem:[#allocation2 + $0x398] sm:$0xff] }
 0x460   : > { %v3006_v50 = vpop.eup %3005  ;;  %3019 = vrcp.f32 %v1045_v49  ;;  %1427 = vmatprep.subr.mxu0 %v1374_v44  ;;  %v1371_v49 = vld [vmem:[#allocation2 + $0x390] sm:$0xff] }
 0x461   : > { %v3008_v52 = vpop.eup %3007  ;;  %v1048_v10 = vadd.f32 1.0, %v3006_v50  ;;  %1428 = vmatpush2.msra.mxu0 %v1373_v11  ;;  %v1370_v50 = vld [vmem:[#allocation2 + $0x388] sm:$0xff] }
 0x462   : > { %v1047_v54 = vadd.f32 1.0, %v3008_v52  ;;  %1429 = vmatprep.subr.mxu0 %v1372_v45  ;;  %v1369_v52 = vld [vmem:[#allocation2 + $0x380] sm:$0xff] }
 0x463   : > { %3021 = vrcp.f32 %v1048_v10  ;;  %1430 = vmatpush2.msra.mxu0 %v1371_v49  ;;  %v1368_v10 = vld [vmem:[#allocation2 + $0x378] sm:$0xff] }
 0x464   : > { %v3010_v58 = vpop.eup %3009  ;;  %3023 = vrcp.f32 %v1047_v54  ;;  %1431 = vmatprep.subr.mxu0 %v1370_v50  ;;  %v1367_v54 = vld [vmem:[#allocation2 + $0x370] sm:$0xff] }
 0x465   : > { %v3012_v59 = vpop.eup %3011  ;;  %v1066_v60 = vmul.f32 %v3010_v58, %v3953_v43  ;;  %1432 = vmatpush2.msra.mxu0 %v1369_v52  ;;  %v1366_v58 = vld [vmem:[#allocation2 + $0x368] sm:$0xff] }
 0x466   : > { %v1065_v0 = vmul.f32 %v3012_v59, %v3956_v17  ;;  %1433 = vmatprep.subr.mxu0 %v1368_v10  ;;  %v1365_v59 = vld [vmem:[#allocation2 + $0x360] sm:$0xff] }
 0x467   : > { %v1074_v1 = vmul.f32 1.6778524, %v1066_v60  ;;  %1434 = vmatpush2.msra.mxu0 %v1367_v54  ;;  %v1364_v60 = vld [vmem:[#allocation2 + $0x358] sm:$0xff] }
 0x468   : > { %v3014_v3 = vpop.eup %3013  ;;  %v1073_v38 = vmul.f32 1.6778524, %v1065_v0  ;;  %1435 = vmatprep.subr.mxu0 %v1366_v58  ;;  %v1363_v0 = vld [vmem:[#allocation2 + $0x350] sm:$0xff] }
 0x469   : > { %v3016_v15 = vpop.eup %3015  ;;  %1210 = vmatprep.mubr.f32.mxu1 %v1074_v1  ;;  %v1068_v37 = vmul.f32 %v3014_v3, %v3961_v53  ;;  %1436 = vmatpush2.msra.mxu0 %v1365_v59  ;;  %v1362_v1 = vld [vmem:[#allocation2 + $0x348] sm:$0xff]  ;;  %v1361_v3 = vld [vmem:[#allocation2 + $0x340] sm:$0xff] }
 0x46a   : > { %1211 = vmatmul.mubr.f32.vlgmr.msra.gmra.mxu1 %v1073_v38  ;;  %v1067_v8 = vmul.f32 %v3016_v15, %v3964_v23  ;;  %1437 = vmatprep.subr.mxu0 %v1364_v60  ;;  %v1360_v38 = vld [vmem:[#allocation2 + $0x338] sm:$0xff]  ;;  %v1359_v15 = vld [vmem:[#allocation2 + $0x330] sm:$0xff] }
 0x46b   : > { %v1076_v9 = vmul.f32 1.6778524, %v1068_v37  ;;  %1438 = vmatpush2.msra.mxu0 %v1363_v0  ;;  %v1358_v37 = vld [vmem:[#allocation2 + $0x328] sm:$0xff] }
 0x46c   : > { %v3018_v41 = vpop.eup %3017  ;;  %v1075_v12 = vmul.f32 1.6778524, %v1067_v8  ;;  %1439 = vmatprep.subr.mxu0 %v1362_v1  ;;  %v1357_v8 = vld [vmem:[#allocation2 + $0x320] sm:$0xff] }
 0x46d   : > { %v3020_v61 = vpop.eup %3019  ;;  %1216 = vmatprep.mubr.f32.mxu1 %v1076_v9  ;;  %v1070_v2 = vmul.f32 %v3018_v41, %v3969_v26  ;;  %1440 = vmatpush2.msra.mxu0 %v1361_v3  ;;  %v1356_v9 = vld [vmem:[#allocation2 + $0x318] sm:$0xff]  ;;  %v1355_v41 = vld [vmem:[#allocation2 + $0x310] sm:$0xff] }
 0x46e   : > { %1217 = vmatmul.mubr.f32.gmra.mxu1 %v1075_v12  ;;  %v1069_v13 = vmul.f32 %v3020_v61, %v3972_v28  ;;  %1441 = vmatprep.subr.mxu0 %v1360_v38  ;;  %v1354_v12 = vld [vmem:[#allocation2 + $0x308] sm:$0xff]  ;;  %v1353_v61 = vld [vmem:[#allocation2 + $0x300] sm:$0xff] }
 0x46f   : > { %v1078_v48 = vmul.f32 1.6778524, %v1070_v2  ;;  %1442 = vmatpush2.msra.mxu0 %v1359_v15  ;;  %v2698_v2 = vld [vmem:[%s4664_s5 + $0x2] sm:$0x3] }
 0x470   : > { %v3022_v46 = vpop.eup %3021  ;;  %v1077_v7 = vmul.f32 1.6778524, %v1069_v13  ;;  %1443 = vmatprep.subr.mxu0 %v1358_v37  ;;  %v1241_v13 = vrot.slane %v2698_v2, %v3699_v55 }
 0x471   : > { %v3024_v19 = vpop.eup %3023  ;;  %1222 = vmatprep.mubr.f32.mxu1 %v1078_v48  ;;  %v1072_v20 = vmul.f32 %v3022_v46, %v3977_v31  ;;  %1444 = vmatpush2.msra.mxu0 %v1357_v8  ;;  %v1245_v48 = vrot.slane %v2698_v2, %v3704_v57 }
 0x472   : > { %1223 = vmatmul.mubr.f32.gmra.mxu1 %v1077_v7  ;;  %v1071_v14 = vmul.f32 %v3024_v19, %v3980_v62  ;;  %1445 = vmatprep.subr.mxu0 %v1356_v9 }
 0x473   : > { %v1080_v18 = vmul.f32 1.6778524, %v1072_v20  ;;  %1446 = vmatpush2.msra.mxu0 %v1355_v41 }
 0x474   : > { %v1079_v21 = vmul.f32 1.6778524, %v1071_v14  ;;  %1447 = vmatprep.subr.mxu0 %v1354_v12 }
 0x475   : > { %1228 = vmatprep.mubr.f32.mxu1 %v1080_v18  ;;  %1448 = vmatpush2.msra.mxu0 %v1353_v61 }
 0x476   : > { %1229 = vmatmul.mubr.f32.gmra.mxu1 %v1079_v21 }
 0x52a   : > { %v1212_v46 = vpop.f32.mrf.mxu1 }
 0x52b   : > { %v3997_v7 = vmul.f32 %v1241_v13, %v1212_v46 }
 0x52c   : > { %v1214_v19 = vpop.f32.mrf.mxu1 }
 0x52d   : > { %v1256_v20 = vsub.f32 0.0, %v3997_v7  ;;  %v4000_v14 = vmul.f32 %v1245_v48, %v1214_v19 }
 0x52e   : > { %v1218_v18 = vpop.f32.mrf.mxu1 }
 0x52f   : > { %v1264_v21 = vmul.f32 1.442695, %v1256_v20  ;;  %v1257_v27 = vsub.f32 0.0, %v4000_v14  ;;  %v4003_v22 = vmul.f32 %v1241_v13, %v1218_v18 }
 0x530   : > { %v1220_v51 = vpop.f32.mrf.mxu1 }
 0x531   : > { %3025 = vpow2.f32 %v1264_v21  ;;  %v1266_v24 = vmul.f32 1.442695, %v1257_v27  ;;  %v1258_v25 = vsub.f32 0.0, %v4003_v22  ;;  %v1251_v39 = vmul.f32 %v1245_v48, %v1220_v51 }
 0x532   : > { %v1224_v32 = vpop.f32.mrf.mxu1 }
 0x533   : > { %3027 = vpow2.f32 %v1266_v24  ;;  %v1268_v29 = vmul.f32 1.442695, %v1258_v25  ;;  %v1259_v63 = vsub.f32 0.0, %v1251_v39  ;;  %v1252_v30 = vmul.f32 %v1241_v13, %v1224_v32 }
 0x534   : > { %v1226_v56 = vpop.f32.mrf.mxu1 }
 0x535   : > { %3029 = vpow2.f32 %v1268_v29  ;;  %v1270_v47 = vmul.f32 1.442695, %v1259_v63  ;;  %v1260_v33 = vsub.f32 0.0, %v1252_v30  ;;  %v1253_v34 = vmul.f32 %v1245_v48, %v1226_v56 }
 0x536   : > { %v1230_v6 = vpop.f32.mrf.mxu1 }
 0x537   : > { %3031 = vpow2.f32 %v1270_v47  ;;  %v1272_v35 = vmul.f32 1.442695, %v1260_v33  ;;  %v1261_v36 = vsub.f32 0.0, %v1253_v34  ;;  %v1254_v5 = vmul.f32 %v1241_v13, %v1230_v6 }
 0x538   : > { %v1232_v4 = vpop.f32.mrf.mxu1  ;;  %v1474_v6 = vmul.f32 0.7, %v3956_v17 }
 0x539   : > { %3033 = vpow2.f32 %v1272_v35  ;;  %v1274_v40 = vmul.f32 1.442695, %v1261_v36  ;;  %v1262_v16 = vsub.f32 0.0, %v1254_v5  ;;  %v1255_v42 = vmul.f32 %v1245_v48, %v1232_v4 }
 0x53a   : > { %v1475_v36 = vmul.f32 0.7, %v3953_v43 }
 0x53b   : > { %3035 = vpow2.f32 %v1274_v40  ;;  %v1276_v44 = vmul.f32 1.442695, %v1262_v16  ;;  %v1263_v11 = vsub.f32 0.0, %v1255_v42 }
 0x53d   : > { %3037 = vpow2.f32 %v1276_v44  ;;  %v1278_v45 = vmul.f32 1.442695, %v1263_v11 }
 0x53e   : > { %v3026_v49 = vpop.eup %3025 }
 0x53f   : > { %v1280_v50 = vadd.f32 1.0, %v3026_v49  ;;  %3039 = vpow2.f32 %v1278_v45 }
 0x540   : > { %v3028_v52 = vpop.eup %3027 }
 0x541   : > { %3041 = vrcp.f32 %v1280_v50  ;;  %v1281_v10 = vadd.f32 1.0, %v3028_v52  ;;  %v1477_v50 = vmul.f32 0.7, %v3961_v53 }
 0x542   : > { %v3030_v54 = vpop.eup %3029 }
 0x543   : > { %3043 = vrcp.f32 %v1281_v10  ;;  %v1282_v58 = vadd.f32 1.0, %v3030_v54  ;;  %v1478_v10 = vmul.f32 0.7, %v3972_v28  ;;  %v1480_v28 = vmul.f32 0.7, %v3980_v62 }
 0x544   : > { %v3032_v59 = vpop.eup %3031 }
 0x545   : > { %3045 = vrcp.f32 %v1282_v58  ;;  %v1283_v60 = vadd.f32 1.0, %v3032_v59 }
 0x546   : > { %v3034_v0 = vpop.eup %3033 }
 0x547   : > { %3047 = vrcp.f32 %v1283_v60  ;;  %v1284_v1 = vadd.f32 1.0, %v3034_v0  ;;  %v1479_v0 = vmul.f32 0.7, %v3969_v26 }
 0x548   : > { %v3036_v3 = vpop.eup %3035 }
 0x549   : > { %3049 = vrcp.f32 %v1284_v1  ;;  %v1285_v38 = vadd.f32 1.0, %v3036_v3 }
 0x54a   : > { %v3038_v15 = vpop.eup %3037 }
 0x54b   : > { %3051 = vrcp.f32 %v1285_v38  ;;  %v1286_v37 = vadd.f32 1.0, %v3038_v15 }
 0x54c   : > { %v3040_v8 = vpop.eup %3039 }
 0x54d   : > { %3053 = vrcp.f32 %v1286_v37  ;;  %v1287_v9 = vadd.f32 1.0, %v3040_v8 }
 0x54e   : > { %v3042_v41 = vpop.eup %3041 }
 0x54f   : > { %3055 = vrcp.f32 %v1287_v9  ;;  %v1304_v61 = vmul.f32 %v3042_v41, %v3997_v7 }
 0x550   : > { %v3044_v12 = vpop.eup %3043 }
 0x551   : > { %v1305_v2 = vmul.f32 %v3044_v12, %v4000_v14  ;;  %v1312_v19 = vmul.f32 1.6778524, %v1304_v61  ;;  %v1481_v61 = vmul.f32 0.7, %v3977_v31 }
 0x552   : > { %v3046_v13 = vpop.eup %3045 }
 0x553   : > { %v1313_v48 = vmul.f32 1.6778524, %v1305_v2  ;;  %v1306_v20 = vmul.f32 %v3046_v13, %v4003_v22 }
 0x554   : > { %v3048_v46 = vpop.eup %3047 }
 0x555   : > { %v1307_v18 = vmul.f32 %v3048_v46, %v1251_v39  ;;  %1449 = vmatprep.mubr.f32.mxu0 %v1313_v48  ;;  %v1314_v24 = vmul.f32 1.6778524, %v1306_v20 }
 0x556   : > { %v3050_v21 = vpop.eup %3049  ;;  %1450 = vmatmul.mubr.f32.vlgmr.msra.gmra.mxu0 %v1312_v19 }
 0x557   : > { %v1315_v27 = vmul.f32 1.6778524, %v1307_v18  ;;  %v1308_v25 = vmul.f32 %v3050_v21, %v1252_v30 }
 0x558   : > { %v3052_v51 = vpop.eup %3051 }
 0x559   : > { %v1309_v32 = vmul.f32 %v3052_v51, %v1253_v34  ;;  %1455 = vmatprep.mubr.f32.mxu0 %v1315_v27  ;;  %v1316_v63 = vmul.f32 1.6778524, %v1308_v25  ;;  %v2730_v25 = vld [vmem:[%s4661_s2 + $0x4f8] sm:$0xff] }
 0x55a   : > { %v3054_v29 = vpop.eup %3053  ;;  %1456 = vmatmul.mubr.f32.gmra.mxu0 %v1314_v24  ;;  %1703 = vmatprep.subr.mxu1 %v2730_v25  ;;  %v2740_v25 = vld [vmem:[%s4661_s2 + $0x548] sm:$0xff] }
 0x55b   : > { %v1317_v7 = vmul.f32 1.6778524, %v1309_v32  ;;  %v1310_v56 = vmul.f32 %v3054_v29, %v1254_v5  ;;  %v2729_v32 = vld [vmem:[%s4661_s2 + $0x4f0] sm:$0xff]  ;;  %v2728_v29 = vld [vmem:[%s4661_s2 + $0x4e8] sm:$0xff] }
 0x55c   : > { %v3056_v14 = vpop.eup %3055  ;;  %1704 = vmatpush1.msra.mxu1 %v2729_v32  ;;  %v2739_v32 = vld [vmem:[%s4661_s2 + $0x540] sm:$0xff] }
 0x55d   : > { %v1311_v47 = vmul.f32 %v3056_v14, %v1255_v42  ;;  %1461 = vmatprep.mubr.f32.mxu0 %v1317_v7  ;;  %v1318_v39 = vmul.f32 1.6778524, %v1310_v56  ;;  %v1476_v42 = vmul.f32 0.7, %v3964_v23  ;;  %1705 = vmatprep.subr.mxu1 %v2728_v29  ;;  %v2727_v7 = vld [vmem:[%s4661_s2 + $0x4e0] sm:$0xff]  ;;  %v2726_v14 = vld [vmem:[%s4661_s2 + $0x4d8] sm:$0xff] }
 0x55e   : > { %1462 = vmatmul.mubr.f32.gmra.mxu0 %v1316_v63  ;;  %1706 = vmatpush1.msra.mxu1 %v2727_v7  ;;  %v2725_v63 = vld [vmem:[%s4661_s2 + $0x4d0] sm:$0xff]  ;;  %v2724_v56 = vld [vmem:[%s4661_s2 + $0x4c8] sm:$0xff]  ;;  %v2738_v29 = vld [vmem:[%s4661_s2 + $0x538] sm:$0xff] }
 0x55f   : > { %v1319_v22 = vmul.f32 1.6778524, %v1311_v47  ;;  %1707 = vmatprep.subr.mxu1 %v2726_v14  ;;  %v2723_v47 = vld [vmem:[%s4661_s2 + $0x4c0] sm:$0xff]  ;;  %v2737_v7 = vld [vmem:[%s4661_s2 + $0x530] sm:$0xff]  ;;  %v2736_v14 = vld [vmem:[%s4661_s2 + $0x528] sm:$0xff] }
 0x560   : > { %1708 = vmatpush1.msra.mxu1 %v2725_v63  ;;  %v2735_v63 = vld [vmem:[%s4661_s2 + $0x520] sm:$0xff] }
 0x561   : > { %1467 = vmatprep.mubr.f32.mxu0 %v1319_v22  ;;  %1709 = vmatprep.subr.mxu1 %v2724_v56  ;;  %v2722_v22 = vld [vmem:[%s4661_s2 + $0x4b8] sm:$0xff] }
 0x562   : > { %1468 = vmatmul.mubr.f32.gmra.mxu0 %v1318_v39  ;;  %1710 = vmatpush1.msra.mxu1 %v2723_v47  ;;  %v2721_v39 = vld [vmem:[%s4661_s2 + $0x4b0] sm:$0xff]  ;;  %v2734_v56 = vld [vmem:[%s4661_s2 + $0x518] sm:$0xff] }
 0x563   : > { %1711 = vmatprep.subr.mxu1 %v2722_v22  ;;  %v2733_v47 = vld [vmem:[%s4661_s2 + $0x510] sm:$0xff]  ;;  %v2732_v22 = vld [vmem:[%s4661_s2 + $0x508] sm:$0xff] }
 0x564   : > { %1712 = vmatpush1.msra.mxu1 %v2721_v39  ;;  %v2731_v39 = vld [vmem:[%s4661_s2 + $0x500] sm:$0xff] }
 0x616   : > { %v1451_v33 = vpop.f32.mrf.mxu0 }
 0x617   : > { %v1482_v35 = vmul.f32 0.3, %v1451_v33  ;;  %v2720_v33 = vld [vmem:[%s4661_s2 + $0x4a8] sm:$0xff] }
 0x618   : > { %v1453_v30 = vpop.f32.mrf.mxu0  ;;  %1713 = vmatprep.subr.mxu1 %v2720_v33  ;;  %v1909_v33 = vld [vmem:[#allocation2 + $0x4f8] sm:$0xff] }
 0x619   : > { %v1490_v34 = vadd.f32 %v1482_v35, %v1474_v6  ;;  %v1483_v4 = vmul.f32 0.3, %v1453_v30  ;;  %v2719_v6 = vld [vmem:[%s4661_s2 + $0x4a0] sm:$0xff]  ;;  %v2718_v35 = vld [vmem:[%s4661_s2 + $0x498] sm:$0xff]  ;;  %v2717_v30 = vld [vmem:[%s4661_s2 + $0x490] sm:$0xff]  ;;  %1942 = vmatprep.subr.mxu0 %v1909_v33 }
 0x61a   : > { %v1457_v40 = vpop.f32.mrf.mxu0  ;;  %1714 = vmatpush1.msra.mxu1 %v2719_v6  ;;  %v1908_v6 = vld [vmem:[#allocation2 + $0x4f0] sm:$0xff] }
 0x61b   : > { %v4011_v16 = vmul.f32 1.3130643, %v1490_v34  ;;  %v1491_v5 = vadd.f32 %v1483_v4, %v1475_v36  ;;  %v1484_v44 = vmul.f32 0.3, %v1457_v40  ;;  %1715 = vmatprep.subr.mxu1 %v2718_v35  ;;  %v2716_v34 = vld [vmem:[%s4661_s2 + $0x488] sm:$0xff]  ;;  %v2715_v36 = vld [vmem:[%s4661_s2 + $0x480] sm:$0xff]  ;;  %1943 = vmatpush1.msra.mxu0 %v1908_v6 }
 0x61c   : > { %v1459_v11 = vpop.f32.mrf.mxu0  ;;  %1716 = vmatpush1.msra.mxu1 %v2717_v30  ;;  %v2714_v4 = vld [vmem:[%s4661_s2 + $0x478] sm:$0xff]  ;;  %v2713_v40 = vld [vmem:[%s4661_s2 + $0x470] sm:$0xff]  ;;  %v1907_v35 = vld [vmem:[#allocation2 + $0x4e8] sm:$0xff] }
 0x61d   : > { %v4014_v45 = vmul.f32 1.3130643, %v1491_v5  ;;  %v1492_v49 = vadd.f32 %v1484_v44, %v1476_v42  ;;  %v1485_v17 = vmul.f32 0.3, %v1459_v11  ;;  %v1506_v43 = vmul.f32 %v4011_v16, %v4011_v16  ;;  %1717 = vmatprep.subr.mxu1 %v2716_v34  ;;  %v2712_v5 = vld [vmem:[%s4661_s2 + $0x468] sm:$0xff]  ;;  %v2711_v42 = vld [vmem:[%s4661_s2 + $0x460] sm:$0xff]  ;;  %1944 = vmatprep.subr.mxu0 %v1907_v35 }
 0x61e   : > { %v1463_v52 = vpop.f32.mrf.mxu0  ;;  %1718 = vmatpush1.msra.mxu1 %v2715_v36  ;;  %v2710_v44 = vld [vmem:[%s4661_s2 + $0x458] sm:$0xff]  ;;  %v2709_v11 = vld [vmem:[%s4661_s2 + $0x450] sm:$0xff]  ;;  %v1906_v30 = vld [vmem:[#allocation2 + $0x4e0] sm:$0xff] }
 0x61f   : > { %v4020_v54 = vmul.f32 1.3130643, %v1492_v49  ;;  %v1493_v58 = vadd.f32 %v1485_v17, %v1477_v50  ;;  %v1486_v59 = vmul.f32 0.3, %v1463_v52  ;;  %v1507_v23 = vmul.f32 %v4014_v45, %v4014_v45  ;;  %1719 = vmatprep.subr.mxu1 %v2714_v4  ;;  %v2708_v49 = vld [vmem:[%s4661_s2 + $0x448] sm:$0xff]  ;;  %v2707_v50 = vld [vmem:[%s4661_s2 + $0x440] sm:$0xff]  ;;  %1945 = vmatpush1.msra.mxu0 %v1906_v30 }
 0x620   : > { %v1465_v60 = vpop.f32.mrf.mxu0  ;;  %1720 = vmatpush1.msra.mxu1 %v2713_v40  ;;  %v2706_v17 = vld [vmem:[%s4661_s2 + $0x438] sm:$0xff]  ;;  %v2705_v52 = vld [vmem:[%s4661_s2 + $0x430] sm:$0xff]  ;;  %v1903_v4 = vld [vmem:[#allocation2 + $0x4c8] sm:$0xff] }
 0x621   : > { %v4025_v1 = vmul.f32 1.3130643, %v1493_v58  ;;  %v1494_v53 = vadd.f32 %v1486_v59, %v1478_v10  ;;  %v1487_v3 = vmul.f32 0.3, %v1465_v60  ;;  %v1514_v38 = vadd.f32 %v1507_v23, %v1506_v43  ;;  %1721 = vmatprep.subr.mxu1 %v2712_v5  ;;  %v2704_v10 = vld [vmem:[%s4661_s2 + $0x428] sm:$0xff]  ;;  %v2703_v43 = vld [vmem:[%s4661_s2 + $0x420] sm:$0xff] }
 0x622   : > { %v1469_v15 = vpop.f32.mrf.mxu0  ;;  %v1508_v37 = vmul.f32 %v4020_v54, %v4020_v54  ;;  %1722 = vmatpush1.msra.mxu1 %v2711_v42  ;;  %v2702_v58 = vld [vmem:[%s4661_s2 + $0x418] sm:$0xff]  ;;  %v2701_v59 = vld [vmem:[%s4661_s2 + $0x410] sm:$0xff]  ;;  %v2700_v23 = vld [vmem:[%s4661_s2 + $0x408] sm:$0xff] }
 0x623   : > { %v4030_v8 = vmul.f32 1.3130643, %v1494_v53  ;;  %v1495_v9 = vadd.f32 %v1487_v3, %v1479_v0  ;;  %v1488_v41 = vmul.f32 0.3, %v1469_v15  ;;  %1515 = vadd.xlane.f32.xlu0 %v1514_v38  ;;  %v1509_v12 = vmul.f32 %v4025_v1, %v4025_v1  ;;  %1723 = vmatprep.subr.mxu1 %v2710_v44  ;;  %v2699_v60 = vld [vmem:[%s4661_s2 + $0x400] sm:$0xff]  ;;  %v2762_v0 = vld [vmem:[%s4661_s2 + $0x5f8] sm:$0xff] }
 0x624   : > { %v1471_v26 = vpop.f32.mrf.mxu0  ;;  %1724 = vmatpush1.msra.mxu1 %v2709_v11  ;;  %v2761_v53 = vld [vmem:[%s4661_s2 + $0x5f0] sm:$0xff]  ;;  %v2760_v3 = vld [vmem:[%s4661_s2 + $0x5e8] sm:$0xff]  ;;  %v2759_v38 = vld [vmem:[%s4661_s2 + $0x5e0] sm:$0xff] }
 0x625   : > { %v4035_v2 = vmul.f32 1.3130643, %v1495_v9  ;;  %v1496_v13 = vadd.f32 %v1488_v41, %v1480_v28  ;;  %v1489_v48 = vmul.f32 0.3, %v1471_v26  ;;  %v1517_v46 = vadd.f32 %v1509_v12, %v1508_v37  ;;  %1725 = vmatprep.subr.mxu1 %v2708_v49  ;;  %v2758_v15 = vld [vmem:[%s4661_s2 + $0x5d8] sm:$0xff]  ;;  %v2757_v28 = vld [vmem:[%s4661_s2 + $0x5d0] sm:$0xff] }
 0x626   : > { %v1510_v20 = vmul.f32 %v4030_v8, %v4030_v8  ;;  %1726 = vmatpush1.msra.mxu1 %v2707_v50  ;;  %v2756_v37 = vld [vmem:[%s4661_s2 + $0x5c8] sm:$0xff]  ;;  %v2755_v9 = vld [vmem:[%s4661_s2 + $0x5c0] sm:$0xff]  ;;  %v2754_v41 = vld [vmem:[%s4661_s2 + $0x5b8] sm:$0xff] }
 0x627   : > { %v4037_v62 = vmul.f32 1.3130643, %v1496_v13  ;;  %v1497_v19 = vadd.f32 %v1489_v48, %v1481_v61  ;;  %1518 = vadd.xlane.f32.xlu1 %v1517_v46  ;;  %v1511_v18 = vmul.f32 %v4035_v2, %v4035_v2  ;;  %1727 = vmatprep.subr.mxu1 %v2706_v17  ;;  %v2753_v12 = vld [vmem:[%s4661_s2 + $0x5b0] sm:$0xff]  ;;  %v2752_v26 = vld [vmem:[%s4661_s2 + $0x5a8] sm:$0xff]  ;;  %v2751_v61 = vld [vmem:[%s4661_s2 + $0x5a0] sm:$0xff] }
 0x628   : > { %1728 = vmatpush1.msra.mxu1 %v2705_v52  ;;  %v2750_v13 = vld [vmem:[%s4661_s2 + $0x598] sm:$0xff]  ;;  %v2749_v48 = vld [vmem:[%s4661_s2 + $0x590] sm:$0xff]  ;;  %v2748_v46 = vld [vmem:[%s4661_s2 + $0x588] sm:$0xff] }
 0x629   : > { %v4043_v21 = vmul.f32 1.3130643, %v1497_v19  ;;  %v1520_v27 = vadd.f32 %v1511_v18, %v1510_v20  ;;  %v1512_v31 = vmul.f32 %v4037_v62, %v4037_v62  ;;  %1729 = vmatprep.subr.mxu1 %v2704_v10  ;;  %v2747_v19 = vld [vmem:[%s4661_s2 + $0x580] sm:$0xff]  ;;  %v2746_v20 = vld [vmem:[%s4661_s2 + $0x578] sm:$0xff]  ;;  %v2745_v18 = vld [vmem:[%s4661_s2 + $0x570] sm:$0xff] }
 0x62a   : > { %1730 = vmatpush1.msra.mxu1 %v2703_v43  ;;  %v1905_v34 = vld [vmem:[#allocation2 + $0x4d8] sm:$0xff]  ;;  %v1904_v36 = vld [vmem:[#allocation2 + $0x4d0] sm:$0xff]  ;;  %v1902_v40 = vld [vmem:[#allocation2 + $0x4c0] sm:$0xff] }
 0x62b   : > { %1521 = vadd.xlane.f32.xlu0 %v1520_v27  ;;  %v1513_v51 = vmul.f32 %v4043_v21, %v4043_v21  ;;  %1731 = vmatprep.subr.mxu1 %v2702_v58  ;;  %v2744_v27 = vld [vmem:[%s4661_s2 + $0x568] sm:$0xff]  ;;  %v1901_v5 = vld [vmem:[#allocation2 + $0x4b8] sm:$0xff]  ;;  %v1900_v42 = vld [vmem:[#allocation2 + $0x4b0] sm:$0xff] }
 0x62c   : > { %1732 = vmatpush1.msra.mxu1 %v2701_v59  ;;  %1946 = vmatprep.subr.mxu0 %v1905_v34  ;;  %v1899_v44 = vld [vmem:[#allocation2 + $0x4a8] sm:$0xff]  ;;  %v1898_v11 = vld [vmem:[#allocation2 + $0x4a0] sm:$0xff]  ;;  %v1897_v49 = vld [vmem:[#allocation2 + $0x498] sm:$0xff] }
 0x62d   : > { %v1523_v24 = vadd.f32 %v1513_v51, %v1512_v31  ;;  %1733 = vmatprep.subr.mxu1 %v2700_v23  ;;  %v2743_v31 = vld [vmem:[%s4661_s2 + $0x560] sm:$0xff]  ;;  %v2742_v51 = vld [vmem:[%s4661_s2 + $0x558] sm:$0xff]  ;;  %1947 = vmatpush1.msra.mxu0 %v1904_v36  ;;  %v1896_v50 = vld [vmem:[#allocation2 + $0x490] sm:$0xff] }
 0x62e   : > { %1734 = vmatpush1.msra.mxu1 %v2699_v60  ;;  %1948 = vmatprep.subr.mxu0 %v1903_v4  ;;  %v1895_v17 = vld [vmem:[#allocation2 + $0x488] sm:$0xff]  ;;  %v1894_v52 = vld [vmem:[#allocation2 + $0x480] sm:$0xff]  ;;  %v1893_v10 = vld [vmem:[#allocation2 + $0x478] sm:$0xff] }
 0x62f   : > { %1524 = vadd.xlane.f32.xlu1 %v1523_v24  ;;  %1735 = vmatprep.subr.mxu1 %v2762_v0  ;;  %v2741_v24 = vld [vmem:[%s4661_s2 + $0x550] sm:$0xff]  ;;  %v1891_v58 = vld [vmem:[#allocation2 + $0x468] sm:$0xff]  ;;  %v1890_v59 = vld [vmem:[#allocation2 + $0x460] sm:$0xff] }
 0x630   : > { %1736 = vmatpush2.msra.mxu1 %v2761_v53  ;;  %1949 = vmatpush1.msra.mxu0 %v1902_v40  ;;  %v1892_v43 = vld [vmem:[#allocation2 + $0x470] sm:$0xff] }
 0x631   : > { %1737 = vmatprep.subr.mxu1 %v2760_v3  ;;  %1950 = vmatprep.subr.mxu0 %v1901_v5 }
 0x632   : > { %1738 = vmatpush2.msra.mxu1 %v2759_v38  ;;  %1951 = vmatpush1.msra.mxu0 %v1900_v42 }
 0x633   : > { %1739 = vmatprep.subr.mxu1 %v2758_v15  ;;  %1952 = vmatprep.subr.mxu0 %v1899_v44 }
 0x634   : > { %1740 = vmatpush2.msra.mxu1 %v2757_v28  ;;  %1953 = vmatpush1.msra.mxu0 %v1898_v11 }
 0x635   : > { %1741 = vmatprep.subr.mxu1 %v2756_v37  ;;  %1954 = vmatprep.subr.mxu0 %v1897_v49 }
 0x636   : > { %1742 = vmatpush2.msra.mxu1 %v2755_v9  ;;  %1955 = vmatpush1.msra.mxu0 %v1896_v50 }
 0x637   : > { %1743 = vmatprep.subr.mxu1 %v2754_v41  ;;  %1956 = vmatprep.subr.mxu0 %v1895_v17 }
 0x638   : > { %1744 = vmatpush2.msra.mxu1 %v2753_v12  ;;  %1957 = vmatpush1.msra.mxu0 %v1894_v52 }
 0x639   : > { %1745 = vmatprep.subr.mxu1 %v2752_v26  ;;  %1958 = vmatprep.subr.mxu0 %v1893_v10 }
 0x63a   : > { %1746 = vmatpush2.msra.mxu1 %v2751_v61  ;;  %1959 = vmatpush1.msra.mxu0 %v1892_v43 }
 0x63b   : > { %1747 = vmatprep.subr.mxu1 %v2750_v13  ;;  %1960 = vmatprep.subr.mxu0 %v1891_v58 }
 0x63c   : > { %1748 = vmatpush2.msra.mxu1 %v2749_v48  ;;  %1961 = vmatpush1.msra.mxu0 %v1890_v59 }
 0x63d   : > { %1749 = vmatprep.subr.mxu1 %v2748_v46 }
 0x63e   : > { %1750 = vmatpush2.msra.mxu1 %v2747_v19 }
 0x63f   : > { %1751 = vmatprep.subr.mxu1 %v2746_v20 }
 0x640   : > { %1752 = vmatpush2.msra.mxu1 %v2745_v18 }
 0x641   : > { %1753 = vmatprep.subr.mxu1 %v2744_v27 }
 0x642   : > { %1754 = vmatpush2.msra.mxu1 %v2743_v31 }
 0x643   : > { %1755 = vmatprep.subr.mxu1 %v2742_v51 }
 0x644   : > { %1756 = vmatpush2.msra.mxu1 %v2741_v24 }
 0x645   : > { %1757 = vmatprep.subr.mxu1 %v2740_v25 }
 0x646   : > { %1758 = vmatpush2.msra.mxu1 %v2739_v32 }
 0x647   : > { %1759 = vmatprep.subr.mxu1 %v2738_v29 }
 0x648   : > { %1760 = vmatpush2.msra.mxu1 %v2737_v7 }
 0x649   : > { %1761 = vmatprep.subr.mxu1 %v2736_v14 }
 0x64a   : > { %1762 = vmatpush2.msra.mxu1 %v2735_v63 }
 0x64b   : > { %1763 = vmatprep.subr.mxu1 %v2734_v56 }
 0x64c   : > { %1764 = vmatpush2.msra.mxu1 %v2733_v47 }
 0x64d   : > { %1765 = vmatprep.subr.mxu1 %v2732_v22 }
 0x64e   : > { %1766 = vmatpush2.msra.mxu1 %v2731_v39 }
 0x6ac   : > { %v1516_v23 = vpop.xlane.xlu0 %1515 }
 0x6ad   : > { %3057 = vrsqrt.f32 %v1516_v23  ;;  %vm1528_vm0 = vcmp.eq.f32.partialorder %v1516_v23, inf  ;;  %v1531_v15 = vand.u32 2147483648, %v1516_v23  ;;  %vm1530_vm1 = vcmp.eq.f32.partialorder %v1516_v23, 0.0 }
 0x6b0   : > { %v1519_v60 = vpop.xlane.xlu1 %1518 }
 0x6b1   : > { %3059 = vrsqrt.f32 %v1519_v60  ;;  %vm1535_vm2 = vcmp.eq.f32.partialorder %v1519_v60, inf  ;;  %v1538_v26 = vand.u32 2147483648, %v1519_v60  ;;  %vm1537_vm3 = vcmp.eq.f32.partialorder %v1519_v60, 0.0 }
 0x6b4   : > { %v1522_v0 = vpop.xlane.xlu0 %1521 }
 0x6b5   : > { %3061 = vrsqrt.f32 %v1522_v0  ;;  %vm1542_vm4 = vcmp.eq.f32.partialorder %v1522_v0, inf  ;;  %v1545_v18 = vand.u32 2147483648, %v1522_v0  ;;  %vm1544_vm5 = vcmp.eq.f32.partialorder %v1522_v0, 0.0 }
 0x6b8   : > { %v1525_v53 = vpop.xlane.xlu1 %1524 }
 0x6b9   : > { %3063 = vrsqrt.f32 %v1525_v53  ;;  %vm1549_vm6 = vcmp.eq.f32.partialorder %v1525_v53, inf  ;;  %v1552_v29 = vand.u32 2147483648, %v1525_v53  ;;  %vm1551_vm7 = vcmp.eq.f32.partialorder %v1525_v53, 0.0 }
 0x6ba   : > { %v3058_v3 = vpop.eup %3057 }
 0x6bb   : > { %v1527_v38 = vmul.f32 %v3058_v3, %v1516_v23 }
 0x6bd   : > { %v1529_v28 = vsel %vm1528_vm0, %v1516_v23, %v1527_v38 }
 0x6be   : > { %v3060_v37 = vpop.eup %3059  ;;  %v1532_v9 = vsel %vm1530_vm1, %v1531_v15, %v1529_v28 }
 0x6bf   : > { %v1554_v41 = vmul.f32 0.0625, %v1532_v9  ;;  %v1534_v12 = vmul.f32 %v3060_v37, %v1519_v60 }
 0x6c1   : > { %v1558_v61 = vadd.f32 0.0001, %v1554_v41  ;;  %v1536_v13 = vsel %vm1535_vm2, %v1519_v60, %v1534_v12 }
 0x6c2   : > { %v3062_v48 = vpop.eup %3061  ;;  %v1539_v46 = vsel %vm1537_vm3, %v1538_v26, %v1536_v13 }
 0x6c3   : > { %3065 = vrcp.f32 %v1558_v61  ;;  %v1555_v19 = vmul.f32 0.0625, %v1539_v46  ;;  %v1541_v20 = vmul.f32 %v3062_v48, %v1522_v0 }
 0x6c5   : > { %v1559_v27 = vadd.f32 0.0001, %v1555_v19  ;;  %v1543_v31 = vsel %vm1542_vm4, %v1522_v0, %v1541_v20 }
 0x6c6   : > { %v3064_v51 = vpop.eup %3063  ;;  %v1546_v24 = vsel %vm1544_vm5, %v1545_v18, %v1543_v31 }
 0x6c7   : > { %3067 = vrcp.f32 %v1559_v27  ;;  %v1556_v25 = vmul.f32 0.0625, %v1546_v24  ;;  %v1548_v32 = vmul.f32 %v3064_v51, %v1525_v53 }
 0x6c9   : > { %v1560_v7 = vadd.f32 0.0001, %v1556_v25  ;;  %v1550_v14 = vsel %vm1549_vm6, %v1525_v53, %v1548_v32 }
 0x6ca   : > { %v1553_v63 = vsel %vm1551_vm7, %v1552_v29, %v1550_v14 }
 0x6cb   : > { %3069 = vrcp.f32 %v1560_v7  ;;  %v1557_v56 = vmul.f32 0.0625, %v1553_v63 }
 0x6cd   : > { %v1561_v47 = vadd.f32 0.0001, %v1557_v56 }
 0x6cf   : > { %3071 = vrcp.f32 %v1561_v47 }
 0x6d0   : > { %v3066_v22 = vpop.eup %3065 }
 0x6d1   : > { %v4242_v39 = vmul.f32 %v3066_v22, %v4014_v45  ;;  %v4245_v33 = vmul.f32 %v3066_v22, %v4011_v16 }
 0x6d3   : > { %v1575_v6 = vsub.f32 0.0, %v4242_v39  ;;  %v1574_v35 = vsub.f32 0.0, %v4245_v33 }
 0x6d4   : > { %v3068_v30 = vpop.eup %3067 }
 0x6d5   : > { %v1584_v34 = vmul.f32 1.442695, %v1575_v6  ;;  %v1582_v36 = vmul.f32 1.442695, %v1574_v35  ;;  %v4250_v4 = vmul.f32 %v3068_v30, %v4025_v1  ;;  %v4253_v40 = vmul.f32 %v3068_v30, %v4020_v54 }
 0x6d7   : > { %3073 = vpow2.f32 %v1584_v34  ;;  %v1577_v45 = vsub.f32 0.0, %v4250_v4  ;;  %v1576_v5 = vsub.f32 0.0, %v4253_v40 }
 0x6d8   : > { %v3070_v16 = vpop.eup %3069  ;;  %3075 = vpow2.f32 %v1582_v36 }
 0x6d9   : > { %v1588_v42 = vmul.f32 1.442695, %v1577_v45  ;;  %v1586_v44 = vmul.f32 1.442695, %v1576_v5  ;;  %v4258_v11 = vmul.f32 %v3070_v16, %v4035_v2  ;;  %v4261_v49 = vmul.f32 %v3070_v16, %v4030_v8  ;;  %v1889_v45 = vld [vmem:[#allocation2 + $0x458] sm:$0xff]  ;;  %v1888_v5 = vld [vmem:[#allocation2 + $0x450] sm:$0xff] }
 0x6da   : > { %1962 = vmatprep.subr.mxu0 %v1889_v45  ;;  %v1887_v16 = vld [vmem:[#allocation2 + $0x448] sm:$0xff] }
 0x6db   : > { %3077 = vpow2.f32 %v1588_v42  ;;  %v1579_v1 = vsub.f32 0.0, %v4258_v11  ;;  %v1578_v54 = vsub.f32 0.0, %v4261_v49  ;;  %1963 = vmatpush1.msra.mxu0 %v1888_v5  ;;  %v1886_v42 = vld [vmem:[#allocation2 + $0x440] sm:$0xff] }
 0x6dc   : > { %v3072_v50 = vpop.eup %3071  ;;  %3079 = vpow2.f32 %v1586_v44  ;;  %1964 = vmatprep.subr.mxu0 %v1887_v16  ;;  %v1885_v44 = vld [vmem:[#allocation2 + $0x438] sm:$0xff] }
 0x6dd   : > { %v1592_v17 = vmul.f32 1.442695, %v1579_v1  ;;  %v1590_v52 = vmul.f32 1.442695, %v1578_v54  ;;  %v4266_v10 = vmul.f32 %v3072_v50, %v4043_v21  ;;  %v4269_v43 = vmul.f32 %v3072_v50, %v4037_v62  ;;  %1965 = vmatpush1.msra.mxu0 %v1886_v42  ;;  %v1884_v1 = vld [vmem:[#allocation2 + $0x430] sm:$0xff]  ;;  %v1883_v54 = vld [vmem:[#allocation2 + $0x428] sm:$0xff] }
 0x6de   : > { %1966 = vmatprep.subr.mxu0 %v1885_v44  ;;  %v1882_v50 = vld [vmem:[#allocation2 + $0x420] sm:$0xff] }
 0x6df   : > { %3081 = vpow2.f32 %v1592_v17  ;;  %v1581_v2 = vsub.f32 0.0, %v4266_v10  ;;  %v1580_v8 = vsub.f32 0.0, %v4269_v43  ;;  %1967 = vmatpush1.msra.mxu0 %v1884_v1  ;;  %v1881_v17 = vld [vmem:[#allocation2 + $0x418] sm:$0xff] }
 0x6e0   : > { %3083 = vpow2.f32 %v1590_v52  ;;  %1968 = vmatprep.subr.mxu0 %v1883_v54  ;;  %v1880_v52 = vld [vmem:[#allocation2 + $0x410] sm:$0xff] }
 0x6e1   : > { %v1596_v58 = vmul.f32 1.442695, %v1581_v2  ;;  %v1594_v59 = vmul.f32 1.442695, %v1580_v8  ;;  %1969 = vmatpush1.msra.mxu0 %v1882_v50  ;;  %v1879_v2 = vld [vmem:[#allocation2 + $0x408] sm:$0xff]  ;;  %v1878_v8 = vld [vmem:[#allocation2 + $0x400] sm:$0xff] }
 0x6e2   : > { %1970 = vmatprep.subr.mxu0 %v1881_v17 }
 0x6e3   : > { %3085 = vpow2.f32 %v1596_v58  ;;  %1971 = vmatpush1.msra.mxu0 %v1880_v52  ;;  %v1941_v58 = vld [vmem:[#allocation2 + $0x5f8] sm:$0xff] }
 0x6e4   : > { %v3074_v23 = vpop.eup %3073  ;;  %3087 = vpow2.f32 %v1594_v59  ;;  %1972 = vmatprep.subr.mxu0 %v1879_v2  ;;  %v1940_v59 = vld [vmem:[#allocation2 + $0x5f0] sm:$0xff] }
 0x6e5   : > { %v3076_v60 = vpop.eup %3075  ;;  %v1599_v0 = vadd.f32 1.0, %v3074_v23  ;;  %1973 = vmatpush1.msra.mxu0 %v1878_v8  ;;  %v1939_v23 = vld [vmem:[#allocation2 + $0x5e8] sm:$0xff] }
 0x6e6   : > { %v1598_v53 = vadd.f32 1.0, %v3076_v60  ;;  %1974 = vmatprep.subr.mxu0 %v1941_v58  ;;  %v1938_v60 = vld [vmem:[#allocation2 + $0x5e0] sm:$0xff] }
 0x6e7   : > { %3089 = vrcp.f32 %v1599_v0  ;;  %1975 = vmatpush2.msra.mxu0 %v1940_v59  ;;  %v1937_v0 = vld [vmem:[#allocation2 + $0x5d8] sm:$0xff] }
 0x6e8   : > { %v3078_v21 = vpop.eup %3077  ;;  %3091 = vrcp.f32 %v1598_v53  ;;  %1976 = vmatprep.subr.mxu0 %v1939_v23  ;;  %v1936_v53 = vld [vmem:[#allocation2 + $0x5d0] sm:$0xff] }
 0x6e9   : > { %v3080_v3 = vpop.eup %3079  ;;  %v1601_v62 = vadd.f32 1.0, %v3078_v21  ;;  %1977 = vmatpush2.msra.mxu0 %v1938_v60  ;;  %v1935_v21 = vld [vmem:[#allocation2 + $0x5c8] sm:$0xff] }
 0x6ea   : > { %v1600_v38 = vadd.f32 1.0, %v3080_v3  ;;  %1978 = vmatprep.subr.mxu0 %v1937_v0  ;;  %v1934_v3 = vld [vmem:[#allocation2 + $0x5c0] sm:$0xff] }
 0x6eb   : > { %3093 = vrcp.f32 %v1601_v62  ;;  %1979 = vmatpush2.msra.mxu0 %v1936_v53  ;;  %v1933_v62 = vld [vmem:[#allocation2 + $0x5b8] sm:$0xff] }
 0x6ec   : > { %v3082_v15 = vpop.eup %3081  ;;  %3095 = vrcp.f32 %v1600_v38  ;;  %1980 = vmatprep.subr.mxu0 %v1935_v21  ;;  %v1932_v38 = vld [vmem:[#allocation2 + $0x5b0] sm:$0xff] }
 0x6ed   : > { %v3084_v28 = vpop.eup %3083  ;;  %v1603_v37 = vadd.f32 1.0, %v3082_v15  ;;  %1981 = vmatpush2.msra.mxu0 %v1934_v3  ;;  %v1931_v15 = vld [vmem:[#allocation2 + $0x5a8] sm:$0xff] }
 0x6ee   : > { %v1602_v9 = vadd.f32 1.0, %v3084_v28  ;;  %1982 = vmatprep.subr.mxu0 %v1933_v62  ;;  %v1930_v28 = vld [vmem:[#allocation2 + $0x5a0] sm:$0xff] }
 0x6ef   : > { %3097 = vrcp.f32 %v1603_v37  ;;  %1983 = vmatpush2.msra.mxu0 %v1932_v38  ;;  %v1929_v37 = vld [vmem:[#allocation2 + $0x598] sm:$0xff] }
 0x6f0   : > { %v3086_v41 = vpop.eup %3085  ;;  %3099 = vrcp.f32 %v1602_v9  ;;  %1984 = vmatprep.subr.mxu0 %v1931_v15  ;;  %v1928_v9 = vld [vmem:[#allocation2 + $0x590] sm:$0xff] }
 0x6f1   : > { %v3088_v12 = vpop.eup %3087  ;;  %v1605_v26 = vadd.f32 1.0, %v3086_v41  ;;  %1985 = vmatpush2.msra.mxu0 %v1930_v28  ;;  %v1927_v41 = vld [vmem:[#allocation2 + $0x588] sm:$0xff] }
 0x6f2   : > { %v1604_v61 = vadd.f32 1.0, %v3088_v12  ;;  %1986 = vmatprep.subr.mxu0 %v1929_v37  ;;  %v1926_v12 = vld [vmem:[#allocation2 + $0x580] sm:$0xff] }
 0x6f3   : > { %3101 = vrcp.f32 %v1605_v26  ;;  %1987 = vmatpush2.msra.mxu0 %v1928_v9  ;;  %v1925_v26 = vld [vmem:[#allocation2 + $0x578] sm:$0xff] }
 0x6f4   : > { %v3090_v13 = vpop.eup %3089  ;;  %3103 = vrcp.f32 %v1604_v61  ;;  %1988 = vmatprep.subr.mxu0 %v1927_v41  ;;  %v1924_v61 = vld [vmem:[#allocation2 + $0x570] sm:$0xff] }
 0x6f5   : > { %v3092_v48 = vpop.eup %3091  ;;  %v1623_v46 = vmul.f32 %v3090_v13, %v4242_v39  ;;  %1989 = vmatpush2.msra.mxu0 %v1926_v12  ;;  %v1923_v13 = vld [vmem:[#allocation2 + $0x568] sm:$0xff] }
 0x6f6   : > { %v1622_v19 = vmul.f32 %v3092_v48, %v4245_v33  ;;  %1990 = vmatprep.subr.mxu0 %v1925_v26  ;;  %v1922_v48 = vld [vmem:[#allocation2 + $0x560] sm:$0xff] }
 0x6f7   : > { %v1631_v20 = vmul.f32 1.6778524, %v1623_v46  ;;  %1991 = vmatpush2.msra.mxu0 %v1924_v61  ;;  %v1921_v46 = vld [vmem:[#allocation2 + $0x558] sm:$0xff] }
 0x6f8   : > { %v3094_v18 = vpop.eup %3093  ;;  %v1630_v27 = vmul.f32 1.6778524, %v1622_v19  ;;  %1992 = vmatprep.subr.mxu0 %v1923_v13  ;;  %v1920_v19 = vld [vmem:[#allocation2 + $0x550] sm:$0xff] }
 0x6f9   : > { %v3096_v31 = vpop.eup %3095  ;;  %1767 = vmatprep.mubr.f32.mxu1 %v1631_v20  ;;  %v1625_v51 = vmul.f32 %v3094_v18, %v4250_v4  ;;  %1993 = vmatpush2.msra.mxu0 %v1922_v48  ;;  %v1919_v20 = vld [vmem:[#allocation2 + $0x548] sm:$0xff]  ;;  %v1918_v18 = vld [vmem:[#allocation2 + $0x540] sm:$0xff] }
 0x6fa   : > { %1768 = vmatmul.mubr.f32.vlgmr.msra.gmra.mxu1 %v1630_v27  ;;  %v1624_v24 = vmul.f32 %v3096_v31, %v4253_v40  ;;  %1994 = vmatprep.subr.mxu0 %v1921_v46  ;;  %v1917_v27 = vld [vmem:[#allocation2 + $0x538] sm:$0xff]  ;;  %v1916_v31 = vld [vmem:[#allocation2 + $0x530] sm:$0xff] }
 0x6fb   : > { %v1633_v25 = vmul.f32 1.6778524, %v1625_v51  ;;  %1995 = vmatpush2.msra.mxu0 %v1920_v19  ;;  %v1915_v51 = vld [vmem:[#allocation2 + $0x528] sm:$0xff] }
 0x6fc   : > { %v3098_v32 = vpop.eup %3097  ;;  %v1632_v29 = vmul.f32 1.6778524, %v1624_v24  ;;  %1996 = vmatprep.subr.mxu0 %v1919_v20  ;;  %v1914_v24 = vld [vmem:[#allocation2 + $0x520] sm:$0xff] }
 0x6fd   : > { %v3100_v7 = vpop.eup %3099  ;;  %1773 = vmatprep.mubr.f32.mxu1 %v1633_v25  ;;  %v1627_v14 = vmul.f32 %v3098_v32, %v4258_v11  ;;  %1997 = vmatpush2.msra.mxu0 %v1918_v18  ;;  %v1913_v25 = vld [vmem:[#allocation2 + $0x518] sm:$0xff]  ;;  %v1912_v32 = vld [vmem:[#allocation2 + $0x510] sm:$0xff] }
 0x6fe   : > { %1774 = vmatmul.mubr.f32.gmra.mxu1 %v1632_v29  ;;  %v1626_v63 = vmul.f32 %v3100_v7, %v4261_v49  ;;  %1998 = vmatprep.subr.mxu0 %v1917_v27  ;;  %v1911_v29 = vld [vmem:[#allocation2 + $0x508] sm:$0xff]  ;;  %v1910_v7 = vld [vmem:[#allocation2 + $0x500] sm:$0xff] }
 0x6ff   : > { %v1635_v56 = vmul.f32 1.6778524, %v1627_v14  ;;  %1999 = vmatpush2.msra.mxu0 %v1916_v31  ;;  %v2763_v14 = vld [vmem:[%s4664_s5 + $0x4] sm:$0x3] }
 0x700   : > { %v3102_v47 = vpop.eup %3101  ;;  %v1634_v22 = vmul.f32 1.6778524, %v1626_v63  ;;  %2000 = vmatprep.subr.mxu0 %v1915_v51  ;;  %v1798_v63 = vrot.slane %v2763_v14, %v3699_v55 }
 0x701   : > { %v3104_v6 = vpop.eup %3103  ;;  %1779 = vmatprep.mubr.f32.mxu1 %v1635_v56  ;;  %v1629_v35 = vmul.f32 %v3102_v47, %v4266_v10  ;;  %2001 = vmatpush2.msra.mxu0 %v1914_v24  ;;  %v1802_v56 = vrot.slane %v2763_v14, %v3704_v57 }
 0x702   : > { %1780 = vmatmul.mubr.f32.gmra.mxu1 %v1634_v22  ;;  %v1628_v30 = vmul.f32 %v3104_v6, %v4269_v43  ;;  %2002 = vmatprep.subr.mxu0 %v1913_v25 }
 0x703   : > { %v1637_v34 = vmul.f32 1.6778524, %v1629_v35  ;;  %2003 = vmatpush2.msra.mxu0 %v1912_v32 }
 0x704   : > { %v1636_v36 = vmul.f32 1.6778524, %v1628_v30  ;;  %2004 = vmatprep.subr.mxu0 %v1911_v29 }
 0x705   : > { %1785 = vmatprep.mubr.f32.mxu1 %v1637_v34  ;;  %2005 = vmatpush2.msra.mxu0 %v1910_v7 }
 0x706   : > { %1786 = vmatmul.mubr.f32.gmra.mxu1 %v1636_v36 }
 0x7ba   : > { %v1769_v47 = vpop.f32.mrf.mxu1 }
 0x7bb   : > { %v4286_v22 = vmul.f32 %v1798_v63, %v1769_v47 }
 0x7bc   : > { %v1771_v6 = vpop.f32.mrf.mxu1 }
 0x7bd   : > { %v1813_v35 = vsub.f32 0.0, %v4286_v22  ;;  %v4289_v30 = vmul.f32 %v1802_v56, %v1771_v6 }
 0x7be   : > { %v1775_v34 = vpop.f32.mrf.mxu1 }
 0x7bf   : > { %v1821_v36 = vmul.f32 1.442695, %v1813_v35  ;;  %v1814_v45 = vsub.f32 0.0, %v4289_v30  ;;  %v4292_v5 = vmul.f32 %v1798_v63, %v1775_v34 }
 0x7c0   : > { %v1777_v16 = vpop.f32.mrf.mxu1 }
 0x7c1   : > { %3105 = vpow2.f32 %v1821_v36  ;;  %v1823_v42 = vmul.f32 1.442695, %v1814_v45  ;;  %v1815_v44 = vsub.f32 0.0, %v4292_v5  ;;  %v1808_v1 = vmul.f32 %v1802_v56, %v1777_v16 }
 0x7c2   : > { %v1781_v54 = vpop.f32.mrf.mxu1 }
 0x7c3   : > { %3107 = vpow2.f32 %v1823_v42  ;;  %v1825_v50 = vmul.f32 1.442695, %v1815_v44  ;;  %v1816_v17 = vsub.f32 0.0, %v1808_v1  ;;  %v1809_v52 = vmul.f32 %v1798_v63, %v1781_v54 }
 0x7c4   : > { %v1783_v2 = vpop.f32.mrf.mxu1 }
 0x7c5   : > { %3109 = vpow2.f32 %v1825_v50  ;;  %v1827_v8 = vmul.f32 1.442695, %v1816_v17  ;;  %v1817_v58 = vsub.f32 0.0, %v1809_v52  ;;  %v1810_v59 = vmul.f32 %v1802_v56, %v1783_v2 }
 0x7c6   : > { %v1787_v23 = vpop.f32.mrf.mxu1 }
 0x7c7   : > { %3111 = vpow2.f32 %v1827_v8  ;;  %v1829_v60 = vmul.f32 1.442695, %v1817_v58  ;;  %v1818_v0 = vsub.f32 0.0, %v1810_v59  ;;  %v1811_v53 = vmul.f32 %v1798_v63, %v1787_v23 }
 0x7c8   : > { %v1789_v21 = vpop.f32.mrf.mxu1  ;;  %v2031_v23 = vmul.f32 0.7, %v4245_v33 }
 0x7c9   : > { %3113 = vpow2.f32 %v1829_v60  ;;  %v1831_v3 = vmul.f32 1.442695, %v1818_v0  ;;  %v1819_v62 = vsub.f32 0.0, %v1811_v53  ;;  %v1812_v38 = vmul.f32 %v1802_v56, %v1789_v21 }
 0x7ca   : > { %v2032_v0 = vmul.f32 0.7, %v4242_v39 }
 0x7cb   : > { %3115 = vpow2.f32 %v1831_v3  ;;  %v1833_v15 = vmul.f32 1.442695, %v1819_v62  ;;  %v1820_v28 = vsub.f32 0.0, %v1812_v38 }
 0x7cd   : > { %3117 = vpow2.f32 %v1833_v15  ;;  %v1835_v37 = vmul.f32 1.442695, %v1820_v28 }
 0x7ce   : > { %v3106_v9 = vpop.eup %3105 }
 0x7cf   : > { %v1837_v41 = vadd.f32 1.0, %v3106_v9  ;;  %3119 = vpow2.f32 %v1835_v37 }
 0x7d0   : > { %v3108_v12 = vpop.eup %3107 }
 0x7d1   : > { %3121 = vrcp.f32 %v1837_v41  ;;  %v1838_v26 = vadd.f32 1.0, %v3108_v12  ;;  %v2034_v41 = vmul.f32 0.7, %v4250_v4 }
 0x7d2   : > { %v3110_v61 = vpop.eup %3109 }
 0x7d3   : > { %3123 = vrcp.f32 %v1838_v26  ;;  %v1839_v13 = vadd.f32 1.0, %v3110_v61  ;;  %v2035_v26 = vmul.f32 0.7, %v4261_v49  ;;  %v2037_v49 = vmul.f32 0.7, %v4269_v43 }
 0x7d4   : > { %v3112_v48 = vpop.eup %3111 }
 0x7d5   : > { %3125 = vrcp.f32 %v1839_v13  ;;  %v1840_v46 = vadd.f32 1.0, %v3112_v48 }
 0x7d6   : > { %v3114_v19 = vpop.eup %3113 }
 0x7d7   : > { %3127 = vrcp.f32 %v1840_v46  ;;  %v1841_v20 = vadd.f32 1.0, %v3114_v19  ;;  %v2036_v19 = vmul.f32 0.7, %v4258_v11 }
 0x7d8   : > { %v3116_v18 = vpop.eup %3115 }
 0x7d9   : > { %3129 = vrcp.f32 %v1841_v20  ;;  %v1842_v27 = vadd.f32 1.0, %v3116_v18 }
 0x7da   : > { %v3118_v31 = vpop.eup %3117 }
 0x7db   : > { %3131 = vrcp.f32 %v1842_v27  ;;  %v1843_v51 = vadd.f32 1.0, %v3118_v31 }
 0x7dc   : > { %v3120_v24 = vpop.eup %3119 }
 0x7dd   : > { %3133 = vrcp.f32 %v1843_v51  ;;  %v1844_v25 = vadd.f32 1.0, %v3120_v24 }
 0x7de   : > { %v3122_v32 = vpop.eup %3121 }
 0x7df   : > { %3135 = vrcp.f32 %v1844_v25  ;;  %v1861_v7 = vmul.f32 %v3122_v32, %v4286_v22 }
 0x7e0   : > { %v3124_v29 = vpop.eup %3123 }
 0x7e1   : > { %v1862_v14 = vmul.f32 %v3124_v29, %v4289_v30  ;;  %v1869_v6 = vmul.f32 1.6778524, %v1861_v7  ;;  %v2038_v7 = vmul.f32 0.7, %v4266_v10 }
 0x7e2   : > { %v3126_v63 = vpop.eup %3125 }
 0x7e3   : > { %v1870_v56 = vmul.f32 1.6778524, %v1862_v14  ;;  %v1863_v35 = vmul.f32 %v3126_v63, %v4292_v5 }
 0x7e4   : > { %v3128_v47 = vpop.eup %3127 }
 0x7e5   : > { %v1864_v34 = vmul.f32 %v3128_v47, %v1808_v1  ;;  %2006 = vmatprep.mubr.f32.mxu0 %v1870_v56  ;;  %v1871_v42 = vmul.f32 1.6778524, %v1863_v35 }
 0x7e6   : > { %v3130_v36 = vpop.eup %3129  ;;  %2007 = vmatmul.mubr.f32.vlgmr.msra.gmra.mxu0 %v1869_v6 }
 0x7e7   : > { %v1872_v45 = vmul.f32 1.6778524, %v1864_v34  ;;  %v1865_v44 = vmul.f32 %v3130_v36, %v1809_v52 }
 0x7e8   : > { %v3132_v16 = vpop.eup %3131 }
 0x7e9   : > { %v1866_v54 = vmul.f32 %v3132_v16, %v1810_v59  ;;  %2012 = vmatprep.mubr.f32.mxu0 %v1872_v45  ;;  %v1873_v17 = vmul.f32 1.6778524, %v1865_v44  ;;  %v2795_v44 = vld [vmem:[%s4661_s2 + $0x6f8] sm:$0xff] }
 0x7ea   : > { %v3134_v50 = vpop.eup %3133  ;;  %2013 = vmatmul.mubr.f32.gmra.mxu0 %v1871_v42  ;;  %2260 = vmatprep.subr.mxu1 %v2795_v44  ;;  %v2805_v44 = vld [vmem:[%s4661_s2 + $0x748] sm:$0xff] }
 0x7eb   : > { %v1874_v22 = vmul.f32 1.6778524, %v1866_v54  ;;  %v1867_v2 = vmul.f32 %v3134_v50, %v1811_v53  ;;  %v2794_v54 = vld [vmem:[%s4661_s2 + $0x6f0] sm:$0xff]  ;;  %v2793_v50 = vld [vmem:[%s4661_s2 + $0x6e8] sm:$0xff] }
 0x7ec   : > { %v3136_v30 = vpop.eup %3135  ;;  %2261 = vmatpush1.msra.mxu1 %v2794_v54  ;;  %v2804_v54 = vld [vmem:[%s4661_s2 + $0x740] sm:$0xff] }
 0x7ed   : > { %v1868_v8 = vmul.f32 %v3136_v30, %v1812_v38  ;;  %2018 = vmatprep.mubr.f32.mxu0 %v1874_v22  ;;  %v1875_v1 = vmul.f32 1.6778524, %v1867_v2  ;;  %v2033_v38 = vmul.f32 0.7, %v4253_v40  ;;  %2262 = vmatprep.subr.mxu1 %v2793_v50  ;;  %v2792_v22 = vld [vmem:[%s4661_s2 + $0x6e0] sm:$0xff]  ;;  %v2791_v30 = vld [vmem:[%s4661_s2 + $0x6d8] sm:$0xff] }
 0x7ee   : > { %2019 = vmatmul.mubr.f32.gmra.mxu0 %v1873_v17  ;;  %2263 = vmatpush1.msra.mxu1 %v2792_v22  ;;  %v2790_v17 = vld [vmem:[%s4661_s2 + $0x6d0] sm:$0xff]  ;;  %v2789_v2 = vld [vmem:[%s4661_s2 + $0x6c8] sm:$0xff]  ;;  %v2803_v50 = vld [vmem:[%s4661_s2 + $0x738] sm:$0xff] }
 0x7ef   : > { %v1876_v5 = vmul.f32 1.6778524, %v1868_v8  ;;  %2264 = vmatprep.subr.mxu1 %v2791_v30  ;;  %v2788_v8 = vld [vmem:[%s4661_s2 + $0x6c0] sm:$0xff]  ;;  %v2802_v22 = vld [vmem:[%s4661_s2 + $0x730] sm:$0xff]  ;;  %v2801_v30 = vld [vmem:[%s4661_s2 + $0x728] sm:$0xff] }
 0x7f0   : > { %2265 = vmatpush1.msra.mxu1 %v2790_v17  ;;  %v2800_v17 = vld [vmem:[%s4661_s2 + $0x720] sm:$0xff] }
 0x7f1   : > { %2024 = vmatprep.mubr.f32.mxu0 %v1876_v5  ;;  %2266 = vmatprep.subr.mxu1 %v2789_v2  ;;  %v2787_v5 = vld [vmem:[%s4661_s2 + $0x6b8] sm:$0xff] }
 0x7f2   : > { %2025 = vmatmul.mubr.f32.gmra.mxu0 %v1875_v1  ;;  %2267 = vmatpush1.msra.mxu1 %v2788_v8  ;;  %v2786_v1 = vld [vmem:[%s4661_s2 + $0x6b0] sm:$0xff]  ;;  %v2799_v2 = vld [vmem:[%s4661_s2 + $0x718] sm:$0xff] }
 0x7f3   : > { %2268 = vmatprep.subr.mxu1 %v2787_v5  ;;  %v2798_v8 = vld [vmem:[%s4661_s2 + $0x710] sm:$0xff]  ;;  %v2797_v5 = vld [vmem:[%s4661_s2 + $0x708] sm:$0xff] }
 0x7f4   : > { %2269 = vmatpush1.msra.mxu1 %v2786_v1  ;;  %v2796_v1 = vld [vmem:[%s4661_s2 + $0x700] sm:$0xff] }
 0x8a6   : > { %v2008_v58 = vpop.f32.mrf.mxu0 }
 0x8a7   : > { %v2039_v60 = vmul.f32 0.3, %v2008_v58  ;;  %v2785_v58 = vld [vmem:[%s4661_s2 + $0x6a8] sm:$0xff] }
 0x8a8   : > { %v2010_v52 = vpop.f32.mrf.mxu0  ;;  %2270 = vmatprep.subr.mxu1 %v2785_v58 }
 0x8a9   : > { %v2047_v59 = vadd.f32 %v2039_v60, %v2031_v23  ;;  %v2040_v21 = vmul.f32 0.3, %v2010_v52  ;;  %v2784_v23 = vld [vmem:[%s4661_s2 + $0x6a0] sm:$0xff]  ;;  %v2783_v60 = vld [vmem:[%s4661_s2 + $0x698] sm:$0xff]  ;;  %v2782_v52 = vld [vmem:[%s4661_s2 + $0x690] sm:$0xff] }
 0x8aa   : > { %v2014_v3 = vpop.f32.mrf.mxu0  ;;  %2271 = vmatpush1.msra.mxu1 %v2784_v23 }
 0x8ab   : > { %v4300_v62 = vmul.f32 1.3130643, %v2047_v59  ;;  %v2048_v53 = vadd.f32 %v2040_v21, %v2032_v0  ;;  %v2041_v15 = vmul.f32 0.3, %v2014_v3  ;;  %2272 = vmatprep.subr.mxu1 %v2783_v60  ;;  %v2781_v59 = vld [vmem:[%s4661_s2 + $0x688] sm:$0xff]  ;;  %v2780_v0 = vld [vmem:[%s4661_s2 + $0x680] sm:$0xff] }
 0x8ac   : > { %v2016_v28 = vpop.f32.mrf.mxu0  ;;  %2273 = vmatpush1.msra.mxu1 %v2782_v52  ;;  %v2779_v21 = vld [vmem:[%s4661_s2 + $0x678] sm:$0xff]  ;;  %v2778_v3 = vld [vmem:[%s4661_s2 + $0x670] sm:$0xff] }
 0x8ad   : > { %v4303_v37 = vmul.f32 1.3130643, %v2048_v53  ;;  %v2049_v9 = vadd.f32 %v2041_v15, %v2033_v38  ;;  %v2042_v33 = vmul.f32 0.3, %v2016_v28  ;;  %v2063_v39 = vmul.f32 %v4300_v62, %v4300_v62  ;;  %2274 = vmatprep.subr.mxu1 %v2781_v59  ;;  %v2777_v53 = vld [vmem:[%s4661_s2 + $0x668] sm:$0xff]  ;;  %v2776_v38 = vld [vmem:[%s4661_s2 + $0x660] sm:$0xff] }
 0x8ae   : > { %v2020_v12 = vpop.f32.mrf.mxu0  ;;  %2275 = vmatpush1.msra.mxu1 %v2780_v0  ;;  %v2775_v15 = vld [vmem:[%s4661_s2 + $0x658] sm:$0xff]  ;;  %v2774_v28 = vld [vmem:[%s4661_s2 + $0x650] sm:$0xff] }
 0x8af   : > { %v4309_v61 = vmul.f32 1.3130643, %v2049_v9  ;;  %v2050_v13 = vadd.f32 %v2042_v33, %v2034_v41  ;;  %v2043_v48 = vmul.f32 0.3, %v2020_v12  ;;  %v2064_v40 = vmul.f32 %v4303_v37, %v4303_v37  ;;  %2276 = vmatprep.subr.mxu1 %v2779_v21  ;;  %v2773_v9 = vld [vmem:[%s4661_s2 + $0x648] sm:$0xff]  ;;  %v2772_v41 = vld [vmem:[%s4661_s2 + $0x640] sm:$0xff] }
 0x8b0   : > { %v2022_v46 = vpop.f32.mrf.mxu0  ;;  %2277 = vmatpush1.msra.mxu1 %v2778_v3  ;;  %v2771_v33 = vld [vmem:[%s4661_s2 + $0x638] sm:$0xff]  ;;  %v2770_v12 = vld [vmem:[%s4661_s2 + $0x630] sm:$0xff] }
 0x8b1   : > { %v4314_v20 = vmul.f32 1.3130643, %v2050_v13  ;;  %v2051_v4 = vadd.f32 %v2043_v48, %v2035_v26  ;;  %v2044_v18 = vmul.f32 0.3, %v2022_v46  ;;  %v2071_v27 = vadd.f32 %v2064_v40, %v2063_v39  ;;  %2278 = vmatprep.subr.mxu1 %v2777_v53  ;;  %v2769_v26 = vld [vmem:[%s4661_s2 + $0x628] sm:$0xff]  ;;  %v2768_v39 = vld [vmem:[%s4661_s2 + $0x620] sm:$0xff] }
 0x8b2   : > { %v2026_v31 = vpop.f32.mrf.mxu0  ;;  %v2065_v51 = vmul.f32 %v4309_v61, %v4309_v61  ;;  %2279 = vmatpush1.msra.mxu1 %v2776_v38  ;;  %v2767_v13 = vld [vmem:[%s4661_s2 + $0x618] sm:$0xff]  ;;  %v2766_v48 = vld [vmem:[%s4661_s2 + $0x610] sm:$0xff]  ;;  %v2765_v40 = vld [vmem:[%s4661_s2 + $0x608] sm:$0xff] }
 0x8b3   : > { %v4319_v24 = vmul.f32 1.3130643, %v2051_v4  ;;  %v2052_v25 = vadd.f32 %v2044_v18, %v2036_v19  ;;  %v2045_v32 = vmul.f32 0.3, %v2026_v31  ;;  %2072 = vadd.xlane.f32.xlu0 %v2071_v27  ;;  %v2066_v29 = vmul.f32 %v4314_v20, %v4314_v20  ;;  %2280 = vmatprep.subr.mxu1 %v2775_v15  ;;  %v2764_v46 = vld [vmem:[%s4661_s2 + $0x600] sm:$0xff]  ;;  %v2827_v19 = vld [vmem:[%s4661_s2 + $0x7f8] sm:$0xff] }
 0x8b4   : > { %v2028_v11 = vpop.f32.mrf.mxu0  ;;  %2281 = vmatpush1.msra.mxu1 %v2774_v28  ;;  %v2826_v4 = vld [vmem:[%s4661_s2 + $0x7f0] sm:$0xff]  ;;  %v2825_v18 = vld [vmem:[%s4661_s2 + $0x7e8] sm:$0xff]  ;;  %v2824_v27 = vld [vmem:[%s4661_s2 + $0x7e0] sm:$0xff] }
 0x8b5   : > { %v4324_v14 = vmul.f32 1.3130643, %v2052_v25  ;;  %v2053_v63 = vadd.f32 %v2045_v32, %v2037_v49  ;;  %v2046_v56 = vmul.f32 0.3, %v2028_v11  ;;  %v2074_v47 = vadd.f32 %v2066_v29, %v2065_v51  ;;  %2282 = vmatprep.subr.mxu1 %v2773_v9  ;;  %v2823_v31 = vld [vmem:[%s4661_s2 + $0x7d8] sm:$0xff]  ;;  %v2822_v49 = vld [vmem:[%s4661_s2 + $0x7d0] sm:$0xff] }
 0x8b6   : > { %v2067_v35 = vmul.f32 %v4319_v24, %v4319_v24  ;;  %2283 = vmatpush1.msra.mxu1 %v2772_v41  ;;  %v2821_v51 = vld [vmem:[%s4661_s2 + $0x7c8] sm:$0xff]  ;;  %v2820_v25 = vld [vmem:[%s4661_s2 + $0x7c0] sm:$0xff]  ;;  %v2819_v32 = vld [vmem:[%s4661_s2 + $0x7b8] sm:$0xff] }
 0x8b7   : > { %v4326_v43 = vmul.f32 1.3130643, %v2053_v63  ;;  %v2054_v6 = vadd.f32 %v2046_v56, %v2038_v7  ;;  %2075 = vadd.xlane.f32.xlu1 %v2074_v47  ;;  %v2068_v34 = vmul.f32 %v4324_v14, %v4324_v14  ;;  %2284 = vmatprep.subr.mxu1 %v2771_v33  ;;  %v2818_v29 = vld [vmem:[%s4661_s2 + $0x7b0] sm:$0xff]  ;;  %v2817_v11 = vld [vmem:[%s4661_s2 + $0x7a8] sm:$0xff]  ;;  %v2816_v7 = vld [vmem:[%s4661_s2 + $0x7a0] sm:$0xff] }
 0x8b8   : > { %2285 = vmatpush1.msra.mxu1 %v2770_v12  ;;  %v2815_v63 = vld [vmem:[%s4661_s2 + $0x798] sm:$0xff]  ;;  %v2814_v56 = vld [vmem:[%s4661_s2 + $0x790] sm:$0xff]  ;;  %v2813_v47 = vld [vmem:[%s4661_s2 + $0x788] sm:$0xff] }
 0x8b9   : > { %v4332_v36 = vmul.f32 1.3130643, %v2054_v6  ;;  %v2077_v45 = vadd.f32 %v2068_v34, %v2067_v35  ;;  %v2069_v10 = vmul.f32 %v4326_v43, %v4326_v43  ;;  %2286 = vmatprep.subr.mxu1 %v2769_v26  ;;  %v2812_v6 = vld [vmem:[%s4661_s2 + $0x780] sm:$0xff]  ;;  %v2811_v35 = vld [vmem:[%s4661_s2 + $0x778] sm:$0xff]  ;;  %v2810_v34 = vld [vmem:[%s4661_s2 + $0x770] sm:$0xff] }
 0x8ba   : > { %2287 = vmatpush1.msra.mxu1 %v2768_v39 }
 0x8bb   : > { %2078 = vadd.xlane.f32.xlu0 %v2077_v45  ;;  %v2070_v16 = vmul.f32 %v4332_v36, %v4332_v36  ;;  %2288 = vmatprep.subr.mxu1 %v2767_v13  ;;  %v2809_v45 = vld [vmem:[%s4661_s2 + $0x768] sm:$0xff] }
 0x8bc   : > { %2289 = vmatpush1.msra.mxu1 %v2766_v48 }
 0x8bd   : > { %v2080_v42 = vadd.f32 %v2070_v16, %v2069_v10  ;;  %2290 = vmatprep.subr.mxu1 %v2765_v40  ;;  %v2808_v10 = vld [vmem:[%s4661_s2 + $0x760] sm:$0xff]  ;;  %v2807_v16 = vld [vmem:[%s4661_s2 + $0x758] sm:$0xff] }
 0x8be   : > { %2291 = vmatpush1.msra.mxu1 %v2764_v46 }
 0x8bf   : > { %2081 = vadd.xlane.f32.xlu1 %v2080_v42  ;;  %2292 = vmatprep.subr.mxu1 %v2827_v19  ;;  %v2806_v42 = vld [vmem:[%s4661_s2 + $0x750] sm:$0xff] }
 0x8c0   : > { %2293 = vmatpush2.msra.mxu1 %v2826_v4 }
 0x8c1   : > { %2294 = vmatprep.subr.mxu1 %v2825_v18 }
 0x8c2   : > { %2295 = vmatpush2.msra.mxu1 %v2824_v27 }
 0x8c3   : > { %2296 = vmatprep.subr.mxu1 %v2823_v31 }
 0x8c4   : > { %2297 = vmatpush2.msra.mxu1 %v2822_v49 }
 0x8c5   : > { %2298 = vmatprep.subr.mxu1 %v2821_v51 }
 0x8c6   : > { %2299 = vmatpush2.msra.mxu1 %v2820_v25 }
 0x8c7   : > { %2300 = vmatprep.subr.mxu1 %v2819_v32 }
 0x8c8   : > { %2301 = vmatpush2.msra.mxu1 %v2818_v29 }
 0x8c9   : > { %2302 = vmatprep.subr.mxu1 %v2817_v11 }
 0x8ca   : > { %2303 = vmatpush2.msra.mxu1 %v2816_v7 }
 0x8cb   : > { %2304 = vmatprep.subr.mxu1 %v2815_v63 }
 0x8cc   : > { %2305 = vmatpush2.msra.mxu1 %v2814_v56 }
 0x8cd   : > { %2306 = vmatprep.subr.mxu1 %v2813_v47 }
 0x8ce   : > { %2307 = vmatpush2.msra.mxu1 %v2812_v6 }
 0x8cf   : > { %2308 = vmatprep.subr.mxu1 %v2811_v35 }
 0x8d0   : > { %2309 = vmatpush2.msra.mxu1 %v2810_v34 }
 0x8d1   : > { %2310 = vmatprep.subr.mxu1 %v2809_v45 }
 0x8d2   : > { %2311 = vmatpush2.msra.mxu1 %v2808_v10 }
 0x8d3   : > { %2312 = vmatprep.subr.mxu1 %v2807_v16 }
 0x8d4   : > { %2313 = vmatpush2.msra.mxu1 %v2806_v42 }
 0x8d5   : > { %2314 = vmatprep.subr.mxu1 %v2805_v44 }
 0x8d6   : > { %2315 = vmatpush2.msra.mxu1 %v2804_v54 }
 0x8d7   : > { %2316 = vmatprep.subr.mxu1 %v2803_v50 }
 0x8d8   : > { %2317 = vmatpush2.msra.mxu1 %v2802_v22 }
 0x8d9   : > { %2318 = vmatprep.subr.mxu1 %v2801_v30 }
 0x8da   : > { %2319 = vmatpush2.msra.mxu1 %v2800_v17 }
 0x8db   : > { %2320 = vmatprep.subr.mxu1 %v2799_v2 }
 0x8dc   : > { %2321 = vmatpush2.msra.mxu1 %v2798_v8 }
 0x8dd   : > { %2322 = vmatprep.subr.mxu1 %v2797_v5 }
 0x8de   : > { %2323 = vmatpush2.msra.mxu1 %v2796_v1 }
 0x93c   : > { %v2073_v58 = vpop.xlane.xlu0 %2072 }
 0x93d   : > { %3137 = vrsqrt.f32 %v2073_v58  ;;  %vm2085_vm8 = vcmp.eq.f32.partialorder %v2073_v58, inf  ;;  %v2088_v21 = vand.u32 2147483648, %v2073_v58  ;;  %vm2087_vm9 = vcmp.eq.f32.partialorder %v2073_v58, 0.0 }
 0x940   : > { %v2076_v23 = vpop.xlane.xlu1 %2075 }
 0x941   : > { %3139 = vrsqrt.f32 %v2076_v23  ;;  %vm2092_vm10 = vcmp.eq.f32.partialorder %v2076_v23, inf  ;;  %v2095_v9 = vand.u32 2147483648, %v2076_v23  ;;  %vm2094_vm11 = vcmp.eq.f32.partialorder %v2076_v23, 0.0 }
 0x944   : > { %v2079_v60 = vpop.xlane.xlu0 %2078 }
 0x945   : > { %3141 = vrsqrt.f32 %v2079_v60  ;;  %vm2099_vm12 = vcmp.eq.f32.partialorder %v2079_v60, inf  ;;  %v2102_v48 = vand.u32 2147483648, %v2079_v60  ;;  %vm2101_vm13 = vcmp.eq.f32.partialorder %v2079_v60, 0.0 }
 0x948   : > { %v2082_v52 = vpop.xlane.xlu1 %2081 }
 0x949   : > { %3143 = vrsqrt.f32 %v2082_v52  ;;  %vm2106_vm14 = vcmp.eq.f32.partialorder %v2082_v52, inf  ;;  %v2109_v31 = vand.u32 2147483648, %v2082_v52  ;;  %vm2108_vm15 = vcmp.eq.f32.partialorder %v2082_v52, 0.0 }
 0x94a   : > { %v3138_v59 = vpop.eup %3137 }
 0x94b   : > { %v2084_v0 = vmul.f32 %v3138_v59, %v2073_v58 }
 0x94d   : > { %v2086_v3 = vsel %vm2085_vm8, %v2073_v58, %v2084_v0 }
 0x94e   : > { %v3140_v53 = vpop.eup %3139  ;;  %v2089_v38 = vsel %vm2087_vm9, %v2088_v21, %v2086_v3 }
 0x94f   : > { %v2111_v15 = vmul.f32 0.0625, %v2089_v38  ;;  %v2091_v28 = vmul.f32 %v3140_v53, %v2076_v23 }
 0x951   : > { %v2115_v41 = vadd.f32 0.0001, %v2111_v15  ;;  %v2093_v33 = vsel %vm2092_vm10, %v2076_v23, %v2091_v28 }
 0x952   : > { %v3142_v12 = vpop.eup %3141  ;;  %v2096_v26 = vsel %vm2094_vm11, %v2095_v9, %v2093_v33 }
 0x953   : > { %3145 = vrcp.f32 %v2115_v41  ;;  %v2112_v39 = vmul.f32 0.0625, %v2096_v26  ;;  %v2098_v13 = vmul.f32 %v3142_v12, %v2079_v60 }
 0x955   : > { %v2116_v40 = vadd.f32 0.0001, %v2112_v39  ;;  %v2100_v46 = vsel %vm2099_vm12, %v2079_v60, %v2098_v13 }
 0x956   : > { %v3144_v19 = vpop.eup %3143  ;;  %v2103_v4 = vsel %vm2101_vm13, %v2102_v48, %v2100_v46 }
 0x957   : > { %3147 = vrcp.f32 %v2116_v40  ;;  %v2113_v18 = vmul.f32 0.0625, %v2103_v4  ;;  %v2105_v27 = vmul.f32 %v3144_v19, %v2082_v52 }
 0x959   : > { %v2117_v49 = vadd.f32 0.0001, %v2113_v18  ;;  %v2107_v51 = vsel %vm2106_vm14, %v2082_v52, %v2105_v27 }
 0x95a   : > { %v2110_v25 = vsel %vm2108_vm15, %v2109_v31, %v2107_v51 }
 0x95b   : > { %3149 = vrcp.f32 %v2117_v49  ;;  %v2114_v32 = vmul.f32 0.0625, %v2110_v25 }
 0x95d   : > { %v2118_v29 = vadd.f32 0.0001, %v2114_v32 }
 0x95f   : > { %3151 = vrcp.f32 %v2118_v29 }
 0x960   : > { %v3146_v11 = vpop.eup %3145 }
 0x961   : > { %v2121_v7 = vmul.f32 %v3146_v11, %v4303_v37  ;;  %v2120_v63 = vmul.f32 %v3146_v11, %v4300_v62 }
 0x963   : > { %v2132_v56 = vsub.f32 0.0, %v2121_v7  ;;  %v2131_v47 = vsub.f32 0.0, %v2120_v63 }
 0x964   : > { %v3148_v6 = vpop.eup %3147 }
 0x965   : > { %v2141_v35 = vmul.f32 1.442695, %v2132_v56  ;;  %v2139_v34 = vmul.f32 1.442695, %v2131_v47  ;;  %v2124_v45 = vmul.f32 %v3148_v6, %v4314_v20  ;;  %v2123_v10 = vmul.f32 %v3148_v6, %v4309_v61 }
 0x967   : > { %3153 = vpow2.f32 %v2141_v35  ;;  %v2134_v16 = vsub.f32 0.0, %v2124_v45  ;;  %v2133_v42 = vsub.f32 0.0, %v2123_v10  ;;  %v2465_v35 = vld [vmem:[%s4663_s4 + $0xf8] sm:$0xff] }
 0x968   : > { %v3150_v44 = vpop.eup %3149  ;;  %3155 = vpow2.f32 %v2139_v34  ;;  %2831 = vmatprep.subr.mxu0 %v2465_v35  ;;  %v2449_v34 = vld [vmem:[%s4663_s4 + $0x78] sm:$0xff] }
 0x969   : > { %v2145_v54 = vmul.f32 1.442695, %v2134_v16  ;;  %v2143_v50 = vmul.f32 1.442695, %v2133_v42  ;;  %v2127_v37 = vmul.f32 %v3150_v44, %v4324_v14  ;;  %v2126_v62 = vmul.f32 %v3150_v44, %v4319_v24  ;;  %2832 = vmatpush3.msra.mxu0 %v2449_v34  ;;  %v2463_v16 = vld [vmem:[%s4663_s4 + $0xe8] sm:$0xff]  ;;  %v2462_v44 = vld [vmem:[%s4663_s4 + $0xe0] sm:$0xff] }
 0x96a   : > { %v2447_v42 = vld [vmem:[%s4663_s4 + $0x68] sm:$0xff] }
 0x96b   : > { %3157 = vpow2.f32 %v2145_v54  ;;  %v2136_v22 = vsub.f32 0.0, %v2127_v37  ;;  %v2135_v30 = vsub.f32 0.0, %v2126_v62  ;;  %v2446_v54 = vld [vmem:[%s4663_s4 + $0x60] sm:$0xff] }
 0x96c   : > { %v3152_v17 = vpop.eup %3151  ;;  %3159 = vpow2.f32 %v2143_v50  ;;  %v2461_v50 = vld [vmem:[%s4663_s4 + $0xd8] sm:$0xff] }
 0x96d   : > { %v2149_v2 = vmul.f32 1.442695, %v2136_v22  ;;  %v2147_v20 = vmul.f32 1.442695, %v2135_v30  ;;  %v2130_v61 = vmul.f32 %v3152_v17, %v4332_v36  ;;  %v2129_v8 = vmul.f32 %v3152_v17, %v4326_v43  ;;  %v2444_v22 = vld [vmem:[%s4663_s4 + $0x50] sm:$0xff]  ;;  %v2459_v30 = vld [vmem:[%s4663_s4 + $0xc8] sm:$0xff] }
 0x96e   : > { %v2443_v17 = vld [vmem:[%s4663_s4 + $0x48] sm:$0xff] }
 0x96f   : > { %3161 = vpow2.f32 %v2149_v2  ;;  %v2138_v5 = vsub.f32 0.0, %v2130_v61  ;;  %v2137_v1 = vsub.f32 0.0, %v2129_v8  ;;  %v2458_v2 = vld [vmem:[%s4663_s4 + $0xc0] sm:$0xff] }
 0x970   : > { %3163 = vpow2.f32 %v2147_v20  ;;  %v2442_v20 = vld [vmem:[%s4663_s4 + $0x40] sm:$0xff] }
 0x971   : > { %v2153_v58 = vmul.f32 1.442695, %v2138_v5  ;;  %v2151_v23 = vmul.f32 1.442695, %v2137_v1  ;;  %v2456_v5 = vld [vmem:[%s4663_s4 + $0xb0] sm:$0xff] }
 0x972   : > { %v2440_v1 = vld [vmem:[%s4663_s4 + $0x30] sm:$0xff] }
 0x973   : > { %3165 = vpow2.f32 %v2153_v58  ;;  %v2455_v58 = vld [vmem:[%s4663_s4 + $0xa8] sm:$0xff] }
 0x974   : > { %v3154_v14 = vpop.eup %3153  ;;  %3167 = vpow2.f32 %v2151_v23  ;;  %v2439_v23 = vld [vmem:[%s4663_s4 + $0x28] sm:$0xff] }
 0x975   : > { %v3156_v24 = vpop.eup %3155  ;;  %v2156_v60 = vadd.f32 1.0, %v3154_v14  ;;  %v2454_v14 = vld [vmem:[%s4663_s4 + $0xa0] sm:$0xff] }
 0x976   : > { %v2155_v52 = vadd.f32 1.0, %v3156_v24  ;;  %v2438_v24 = vld [vmem:[%s4663_s4 + $0x20] sm:$0xff] }
 0x977   : > { %3169 = vrcp.f32 %v2156_v60  ;;  %v2453_v60 = vld [vmem:[%s4663_s4 + $0x98] sm:$0xff] }
 0x978   : > { %v3158_v59 = vpop.eup %3157  ;;  %3171 = vrcp.f32 %v2155_v52  ;;  %v2437_v52 = vld [vmem:[%s4663_s4 + $0x18] sm:$0xff] }
 0x979   : > { %v3160_v0 = vpop.eup %3159  ;;  %v2158_v21 = vadd.f32 1.0, %v3158_v59  ;;  %v2452_v59 = vld [vmem:[%s4663_s4 + $0x90] sm:$0xff] }
 0x97a   : > { %v2157_v36 = vadd.f32 1.0, %v3160_v0  ;;  %v2436_v0 = vld [vmem:[%s4663_s4 + $0x10] sm:$0xff] }
 0x97b   : > { %3173 = vrcp.f32 %v2158_v21  ;;  %v2451_v21 = vld [vmem:[%s4663_s4 + $0x88] sm:$0xff] }
 0x97c   : > { %v3162_v43 = vpop.eup %3161  ;;  %3175 = vrcp.f32 %v2157_v36  ;;  %v2435_v36 = vld [vmem:[%s4663_s4 + $0x8] sm:$0xff] }
 0x97d   : > { %v3164_v3 = vpop.eup %3163  ;;  %v2160_v53 = vadd.f32 1.0, %v3162_v43  ;;  %v2450_v43 = vld [vmem:[%s4663_s4 + $0x80] sm:$0xff] }
 0x97e   : > { %v2159_v38 = vadd.f32 1.0, %v3164_v3  ;;  %v2434_v3 = vld [vmem:[%s4663_s4] sm:$0xff] }
 0x97f   : > { %3177 = vrcp.f32 %v2160_v53  ;;  %v2828_v53 = vld [vmem:[%s4664_s5 + $0x6] sm:$0x3] }
 0x980   : > { %v3166_v15 = vpop.eup %3165  ;;  %3179 = vrcp.f32 %v2159_v38  ;;  %v2355_v38 = vrot.slane %v2828_v53, %v3699_v55 }
 0x981   : > { %v3168_v28 = vpop.eup %3167  ;;  %v2162_v9 = vadd.f32 1.0, %v3166_v15  ;;  %v2359_v15 = vrot.slane %v2828_v53, %v3704_v57 }
 0x982   : > { %v2161_v41 = vadd.f32 1.0, %v3168_v28 }
 0x983   : > { %3181 = vrcp.f32 %v2162_v9 }
 0x984   : > { %v3170_v33 = vpop.eup %3169  ;;  %3183 = vrcp.f32 %v2161_v41 }
 0x985   : > { %v3172_v12 = vpop.eup %3171  ;;  %v2180_v26 = vmul.f32 %v3170_v33, %v2121_v7 }
 0x986   : > { %v2179_v39 = vmul.f32 %v3172_v12, %v2120_v63 }
 0x987   : > { %v2188_v13 = vmul.f32 1.6778524, %v2180_v26 }
 0x988   : > { %v3174_v48 = vpop.eup %3173  ;;  %v2187_v40 = vmul.f32 1.6778524, %v2179_v39 }
 0x989   : > { %v3176_v46 = vpop.eup %3175  ;;  %2324 = vmatprep.mubr.f32.mxu1 %v2188_v13  ;;  %v2182_v19 = vmul.f32 %v3174_v48, %v2124_v45  ;;  %v2464_v45 = vld [vmem:[%s4663_s4 + $0xf0] sm:$0xff] }
 0x98a   : > { %2325 = vmatmul.mubr.f32.vlgmr.msra.gmra.mxu1 %v2187_v40  ;;  %v2181_v4 = vmul.f32 %v3176_v46, %v2123_v10  ;;  %2833 = vmatprep.subr.mxu0 %v2464_v45  ;;  %v2448_v10 = vld [vmem:[%s4663_s4 + $0x70] sm:$0xff] }
 0x98b   : > { %v2190_v18 = vmul.f32 1.6778524, %v2182_v19  ;;  %2834 = vmatpush3.msra.mxu0 %v2448_v10 }
 0x98c   : > { %v3178_v27 = vpop.eup %3177  ;;  %v2189_v31 = vmul.f32 1.6778524, %v2181_v4  ;;  %2835 = vmatprep.subr.mxu0 %v2463_v16 }
 0x98d   : > { %v3180_v49 = vpop.eup %3179  ;;  %2330 = vmatprep.mubr.f32.mxu1 %v2190_v18  ;;  %v2184_v51 = vmul.f32 %v3178_v27, %v2127_v37  ;;  %2836 = vmatpush3.msra.mxu0 %v2447_v42  ;;  %v2445_v37 = vld [vmem:[%s4663_s4 + $0x58] sm:$0xff] }
 0x98e   : > { %2331 = vmatmul.mubr.f32.gmra.mxu1 %v2189_v31  ;;  %v2183_v25 = vmul.f32 %v3180_v49, %v2126_v62  ;;  %2837 = vmatprep.subr.mxu0 %v2462_v44  ;;  %v2460_v62 = vld [vmem:[%s4663_s4 + $0xd0] sm:$0xff] }
 0x98f   : > { %v2192_v32 = vmul.f32 1.6778524, %v2184_v51  ;;  %2838 = vmatpush3.msra.mxu0 %v2446_v54 }
 0x990   : > { %v3182_v29 = vpop.eup %3181  ;;  %v2191_v11 = vmul.f32 1.6778524, %v2183_v25  ;;  %2839 = vmatprep.subr.mxu0 %v2461_v50 }
 0x991   : > { %v3184_v7 = vpop.eup %3183  ;;  %2336 = vmatprep.mubr.f32.mxu1 %v2192_v32  ;;  %v2186_v63 = vmul.f32 %v3182_v29, %v2130_v61  ;;  %2840 = vmatpush3.msra.mxu0 %v2445_v37  ;;  %v2457_v61 = vld [vmem:[%s4663_s4 + $0xb8] sm:$0xff] }
 0x992   : > { %2337 = vmatmul.mubr.f32.gmra.mxu1 %v2191_v11  ;;  %v2185_v56 = vmul.f32 %v3184_v7, %v2129_v8  ;;  %2841 = vmatprep.subr.mxu0 %v2460_v62  ;;  %v2441_v8 = vld [vmem:[%s4663_s4 + $0x38] sm:$0xff] }
 0x993   : > { %v2194_v47 = vmul.f32 1.6778524, %v2186_v63  ;;  %2842 = vmatpush3.msra.mxu0 %v2444_v22 }
 0x994   : > { %v2193_v6 = vmul.f32 1.6778524, %v2185_v56  ;;  %2843 = vmatprep.subr.mxu0 %v2459_v30 }
 0x995   : > { %2342 = vmatprep.mubr.f32.mxu1 %v2194_v47  ;;  %2844 = vmatpush3.msra.mxu0 %v2443_v17 }
 0x996   : > { %2343 = vmatmul.mubr.f32.gmra.mxu1 %v2193_v6  ;;  %2845 = vmatprep.subr.mxu0 %v2458_v2 }
 0x997   : > { %2846 = vmatpush3.msra.mxu0 %v2442_v20 }
 0x998   : > { %2847 = vmatprep.subr.mxu0 %v2457_v61 }
 0x999   : > { %2848 = vmatpush3.msra.mxu0 %v2441_v8 }
 0x99a   : > { %2849 = vmatprep.subr.mxu0 %v2456_v5 }
 0x99b   : > { %2850 = vmatpush3.msra.mxu0 %v2440_v1 }
 0x99c   : > { %2851 = vmatprep.subr.mxu0 %v2455_v58 }
 0x99d   : > { %2852 = vmatpush3.msra.mxu0 %v2439_v23 }
 0x99e   : > { %2853 = vmatprep.subr.mxu0 %v2454_v14 }
 0x99f   : > { %2854 = vmatpush3.msra.mxu0 %v2438_v24 }
 0x9a0   : > { %2855 = vmatprep.subr.mxu0 %v2453_v60 }
 0x9a1   : > { %2856 = vmatpush3.msra.mxu0 %v2437_v52 }
 0x9a2   : > { %2857 = vmatprep.subr.mxu0 %v2452_v59 }
 0x9a3   : > { %2858 = vmatpush3.msra.mxu0 %v2436_v0 }
 0x9a4   : > { %2859 = vmatprep.subr.mxu0 %v2451_v21 }
 0x9a5   : > { %2860 = vmatpush3.msra.mxu0 %v2435_v36 }
 0x9a6   : > { %2861 = vmatprep.subr.mxu0 %v2450_v43 }
 0x9a7   : > { %2862 = vmatpush3.msra.mxu0 %v2434_v3 }
 0xa4a   : > { %v2326_v28 = vpop.f32.mrf.mxu1 }
 0xa4b   : > { %v4639_v9 = vmul.f32 %v2355_v38, %v2326_v28 }
 0xa4c   : > { %v2328_v41 = vpop.f32.mrf.mxu1 }
 0xa4d   : > { %v2370_v33 = vsub.f32 0.0, %v4639_v9  ;;  %v4642_v12 = vmul.f32 %v2359_v15, %v2328_v41 }
 0xa4e   : > { %v2332_v26 = vpop.f32.mrf.mxu1 }
 0xa4f   : > { %v2378_v39 = vmul.f32 1.442695, %v2370_v33  ;;  %v2371_v13 = vsub.f32 0.0, %v4642_v12  ;;  %v4645_v48 = vmul.f32 %v2355_v38, %v2332_v26 }
 0xa50   : > { %v2334_v40 = vpop.f32.mrf.mxu1 }
 0xa51   : > { %3185 = vpow2.f32 %v2378_v39  ;;  %v2380_v46 = vmul.f32 1.442695, %v2371_v13  ;;  %v2372_v55 = vsub.f32 0.0, %v4645_v48  ;;  %v2365_v57 = vmul.f32 %v2359_v15, %v2334_v40 }
 0xa52   : > { %v2338_v19 = vpop.f32.mrf.mxu1 }
 0xa53   : > { %3187 = vpow2.f32 %v2380_v46  ;;  %v2382_v4 = vmul.f32 1.442695, %v2372_v55  ;;  %v2373_v18 = vsub.f32 0.0, %v2365_v57  ;;  %v2366_v27 = vmul.f32 %v2355_v38, %v2338_v19 }
 0xa54   : > { %v2340_v31 = vpop.f32.mrf.mxu1 }
 0xa55   : > { %3189 = vpow2.f32 %v2382_v4  ;;  %v2384_v49 = vmul.f32 1.442695, %v2373_v18  ;;  %v2374_v51 = vsub.f32 0.0, %v2366_v27  ;;  %v2367_v25 = vmul.f32 %v2359_v15, %v2340_v31 }
 0xa56   : > { %v2344_v32 = vpop.f32.mrf.mxu1 }
 0xa57   : > { %3191 = vpow2.f32 %v2384_v49  ;;  %v2386_v29 = vmul.f32 1.442695, %v2374_v51  ;;  %v2375_v11 = vsub.f32 0.0, %v2367_v25  ;;  %v2368_v7 = vmul.f32 %v2355_v38, %v2344_v32 }
 0xa58   : > { %v2346_v63 = vpop.f32.mrf.mxu1 }
 0xa59   : > { %3193 = vpow2.f32 %v2386_v29  ;;  %v2388_v56 = vmul.f32 1.442695, %v2375_v11  ;;  %v2376_v47 = vsub.f32 0.0, %v2368_v7  ;;  %v2369_v6 = vmul.f32 %v2359_v15, %v2346_v63 }
 0xa5b   : > { %3195 = vpow2.f32 %v2388_v56  ;;  %v2390_v35 = vmul.f32 1.442695, %v2376_v47  ;;  %v2377_v34 = vsub.f32 0.0, %v2369_v6 }
 0xa5d   : > { %3197 = vpow2.f32 %v2390_v35  ;;  %v2392_v45 = vmul.f32 1.442695, %v2377_v34 }
 0xa5e   : > { %v3186_v10 = vpop.eup %3185 }
 0xa5f   : > { %v2394_v16 = vadd.f32 1.0, %v3186_v10  ;;  %3199 = vpow2.f32 %v2392_v45 }
 0xa60   : > { %v3188_v42 = vpop.eup %3187 }
 0xa61   : > { %3201 = vrcp.f32 %v2394_v16  ;;  %v2395_v44 = vadd.f32 1.0, %v3188_v42 }
 0xa62   : > { %v3190_v54 = vpop.eup %3189 }
 0xa63   : > { %3203 = vrcp.f32 %v2395_v44  ;;  %v2396_v50 = vadd.f32 1.0, %v3190_v54 }
 0xa64   : > { %v3192_v37 = vpop.eup %3191 }
 0xa65   : > { %3205 = vrcp.f32 %v2396_v50  ;;  %v2397_v62 = vadd.f32 1.0, %v3192_v37 }
 0xa66   : > { %v3194_v22 = vpop.eup %3193 }
 0xa67   : > { %3207 = vrcp.f32 %v2397_v62  ;;  %v2398_v30 = vadd.f32 1.0, %v3194_v22 }
 0xa68   : > { %v3196_v17 = vpop.eup %3195 }
 0xa69   : > { %3209 = vrcp.f32 %v2398_v30  ;;  %v2399_v2 = vadd.f32 1.0, %v3196_v17 }
 0xa6a   : > { %v3198_v20 = vpop.eup %3197 }
 0xa6b   : > { %3211 = vrcp.f32 %v2399_v2  ;;  %v2400_v61 = vadd.f32 1.0, %v3198_v20 }
 0xa6c   : > { %v3200_v8 = vpop.eup %3199 }
 0xa6d   : > { %3213 = vrcp.f32 %v2400_v61  ;;  %v2401_v5 = vadd.f32 1.0, %v3200_v8 }
 0xa6e   : > { %v3202_v1 = vpop.eup %3201 }
 0xa6f   : > { %3215 = vrcp.f32 %v2401_v5  ;;  %v2418_v23 = vmul.f32 %v3202_v1, %v4639_v9 }
 0xa70   : > { %v3204_v58 = vpop.eup %3203 }
 0xa71   : > { %v2419_v14 = vmul.f32 %v3204_v58, %v4642_v12  ;;  %v2426_v59 = vmul.f32 1.6778524, %v2418_v23 }
 0xa72   : > { %v3206_v24 = vpop.eup %3205 }
 0xa73   : > { %v2427_v60 = vmul.f32 1.6778524, %v2419_v14  ;;  %v2420_v0 = vmul.f32 %v3206_v24, %v4645_v48 }
 0xa74   : > { %v3208_v52 = vpop.eup %3207 }
 0xa75   : > { %v2421_v21 = vmul.f32 %v3208_v52, %v2365_v57  ;;  %2530 = vmatprep.mubr.f32.mxu0 %v2427_v60  ;;  %v2428_v53 = vmul.f32 1.6778524, %v2420_v0 }
 0xa76   : > { %v3210_v36 = vpop.eup %3209  ;;  %2531 = vmatmul.mubr.f32.vlgmr.msra.gmra.mxu0 %v2426_v59 }
 0xa77   : > { %v2429_v43 = vmul.f32 1.6778524, %v2421_v21  ;;  %v2422_v38 = vmul.f32 %v3210_v36, %v2366_v27 }
 0xa78   : > { %v3212_v3 = vpop.eup %3211 }
 0xa79   : > { %v2423_v15 = vmul.f32 %v3212_v3, %v2367_v25  ;;  %2535 = vmatprep.mubr.f32.mxu0 %v2429_v43  ;;  %v2430_v33 = vmul.f32 1.6778524, %v2422_v38 }
 0xa7a   : > { %v3214_v28 = vpop.eup %3213  ;;  %2536 = vmatmul.mubr.f32.gmra.mxu0 %v2428_v53 }
 0xa7b   : > { %v2431_v9 = vmul.f32 1.6778524, %v2423_v15  ;;  %v2424_v12 = vmul.f32 %v3214_v28, %v2368_v7 }
 0xa7c   : > { %v3216_v41 = vpop.eup %3215 }
 0xa7d   : > { %v2425_v26 = vmul.f32 %v3216_v41, %v2369_v6  ;;  %2540 = vmatprep.mubr.f32.mxu0 %v2431_v9  ;;  %v2432_v13 = vmul.f32 1.6778524, %v2424_v12 }
 0xa7e   : > { %2541 = vmatmul.mubr.f32.gmra.mxu0 %v2430_v33 }
 0xa7f   : > { %v2433_v39 = vmul.f32 1.6778524, %v2425_v26 }
 0xa81   : > { %2545 = vmatprep.mubr.f32.mxu0 %v2433_v39 }
 0xa82   : > { %2546 = vmatmul.mubr.f32.gmra.mxu0 %v2432_v13 }
 0xb36   : > { %v2863_v48 = vpop.f32.mrf.mxu0 }
 0xb38   : > { %v2864_v40 = vpop.f32.mrf.mxu0 }
 0xb39   : > { %v2865_v46 = vadd.f32 %v2864_v40, %v2863_v48 }
 0xb3a   : > { %v2866_v55 = vpop.f32.mrf.mxu0 }
 0xb3b   : > { %2551 = vst [vmem:[%s268_s8] sm:$0xff] %v2865_v46 }
 0xb3c   : > { %v2867_v57 = vpop.f32.mrf.mxu0 }
 0xb3d   : > { %v2868_v19 = vadd.f32 %v2867_v57, %v2866_v55 }
 0xb3e   : > { %v2869_v4 = vpop.f32.mrf.mxu0 }
 0xb3f   : > { %2552 = vst [vmem:[%s268_s8 + $0x8] sm:$0xff] %v2868_v19 }
 0xb40   : > { %v2870_v18 = vpop.f32.mrf.mxu0 }
 0xb41   : > { %v2871_v27 = vadd.f32 %v2870_v18, %v2869_v4 }
 0xb42   : > { %v2872_v31 = vpop.f32.mrf.mxu0 }
 0xb43   : > { %2553 = vst [vmem:[%s268_s8 + $0x10] sm:$0xff] %v2871_v27 }
 0xb44   : > { %v2873_v49 = vpop.f32.mrf.mxu0 }
 0xb45   : > { %v2874_v51 = vadd.f32 %v2873_v49, %v2872_v31 }
 0xb47   : > { %2554 = vst [vmem:[%s268_s8 + $0x18] sm:$0xff] %v2874_v51 }
 0xb48 PF: > { %s17_s21 = sadd.s32 1, %s3253_s21  }
 0xb49   : > { %p14_p1 = scmp.ge.s32.totalorder %s17_s21, 4  }
 0xb4b   :  { %16 = sbr.rel (!%p14_p1) target bundleno = 1 (0x1), region = 87 }
 0xb50   :  { %2577 = vsyncpa [#allocation3], 1 }
 0xb51   :  { %2579 = vsyncpa [#allocation3 + $0x1], 1 }

</bundles_post_ra>
